<compile_context>
chip_gen: v7x
topology: tpu7x:2x2x1
jax: 0.10.0
libtpu: 0.0.40
codegen_flags: <defaults>
</compile_context>

<pallas_src>
import math
import jax
import jax.numpy as jnp
from jax.experimental import pallas as pl

# --- model configuration (small, consistent with the module) ---------------
B = 2            # batch_size
H = 32           # hidden_size
O = 4            # output_size
L = 8            # chain length
IN = 1           # input_size (per-cell scalar input)
F1, F2 = 32, 32  # fc_layers_intra = fc_layers_out = [32, 32]
EPS = 1e-5       # torch LayerNorm default eps

# --- packed cell-slab row layout (per cell, 128 lanes wide) -----------------
R_WS    = 0      # [64,128]  input = [h_space|c_space]; cols: [h_l1|c_l1|h_sk|c_sk]
R_WT    = 64     # [64,128]  input = [h_time |c_time ]; same column meaning
R_W2    = 128    # [64,128]  block-diag layer-2, cols 64:128 zero
R_W3    = 192    # [64,128]  block-diag layer-3, cols 64:128 zero
R_WHH   = 256    # [32,128]  gamma_h-scaled W_hh (g-gate cols x2)
R_B1    = 288    # [1,128]   [hp_b1 | cp_b1 | 0]
R_B2    = 289    # [1,128]   [hp_b2 | cp_b2 | 0]
R_B3    = 290    # [1,128]   [hp_b3+hp_bsk | cp_b3+cp_bsk | 0]
R_WIH   = 291    # [1,128]   w_ih row (g-gate cols x2)
R_BLSTM = 292    # [1,128]   b_ih + b_hh + beta_h @ W_hh  (g-gate cols x2)
R_LNG   = 293    # [1,128]   cell-norm gamma in lanes 0:H
R_LNB   = 294    # [1,128]   cell-norm beta  in lanes 0:H
CELL_ROWS = 296

# --- packed head-slab row layout --------------------------------------------
HR_W1  = 0       # [64,128]  cols 0:F1 = fc w1, cols F1:F1+H = skip proj
HR_W2  = 64      # [32,128]  cols 0:F2 = fc w2
HR_W3  = 96      # [32,128]  cols 0:H  = fc w3
HR_WF  = 128     # [32,128]  cols 0:O  = final linear
HR_B1  = 160
HR_B2  = 161
HR_B3  = 162
HR_LNG = 163
HR_LNB = 164
HR_BF  = 165
HEAD_ROWS = 168


# --- in-kernel helper: LayerNorm normalization, one-pass stats, no affine ---
def _norm(v):
    mu = jnp.mean(v, axis=-1, keepdims=True)
    ms = jnp.mean(v * v, axis=-1, keepdims=True)
    var = ms - mu * mu
    return (v - mu) * jax.lax.rsqrt(var + EPS)


# --- fused kernel: whole chain + output head in one invocation --------------
def lattice_kernel(x_ref, hcext_ref, chain_ref, cw_ref, hd_ref,
                   out_ref, hcall_ref):
    hc = hcext_ref[...]                 # [B, 2H] running [h_space | c_space]
    xfull = x_ref[...]                  # [B, L]
    hc_parts = []

    for i in range(L):                  # statically unrolled chain
        ci = cw_ref.at[i]               # [296,128] ref view for cell i
        hc_t = chain_ref[i]             # [B, 2H] = [h_time | c_time]

        # layer-1 + skip projections: two accumulated K=64 matmuls, no concat.
        t1 = (jnp.dot(hc,   ci[R_WS:R_WS + 2 * H, :], preferred_element_type=jnp.float32)
              + jnp.dot(hc_t, ci[R_WT:R_WT + 2 * H, :], preferred_element_type=jnp.float32)
              + ci[R_B1:R_B1 + 1, :])                   # [B,128]
        y1 = jnp.maximum(t1[:, :2 * F1], 0.0)           # [B,64]
        skip = t1[:, 2 * F1:]                           # [B,64] raw skip outputs

        t2 = (jnp.dot(y1, ci[R_W2:R_W2 + 2 * F1, :], preferred_element_type=jnp.float32)
              + ci[R_B2:R_B2 + 1, :])
        y2 = jnp.maximum(t2[:, :2 * F2], 0.0)           # [B,64]

        t3 = (jnp.dot(y2, ci[R_W3:R_W3 + 2 * F2, :], preferred_element_type=jnp.float32)
              + ci[R_B3:R_B3 + 1, :])
        y3 = t3[:, :2 * H] + skip                       # [B,64] = [hid proc | cell proc]

        # LayerNorms: hidden affine folded into W_hh; cell affine applied here.
        ph = _norm(y3[:, :H])                           # [B,H]
        pc = _norm(y3[:, H:]) * ci[R_LNG:R_LNG + 1, :H] + ci[R_LNB:R_LNB + 1, :H]

        # LSTMCell(input_size=1): K=1 input "matmul" is a broadcast multiply.
        xi = xfull[:, i:i + 1]                          # [B,1]
        gates = (xi * ci[R_WIH:R_WIH + 1, :]
                 + jnp.dot(ph, ci[R_WHH:R_WHH + H, :], preferred_element_type=jnp.float32)
                 + ci[R_BLSTM:R_BLSTM + 1, :])          # [B,4H]
        sig = jax.nn.sigmoid(gates)                     # single EUP pass
        i_g = sig[:, 0:H]
        f_g = sig[:, H:2 * H]
        g_g = 2.0 * sig[:, 2 * H:3 * H] - 1.0           # tanh(x) = 2*sigmoid(2x)-1
        o_g = sig[:, 3 * H:4 * H]
        c_new = f_g * pc + i_g * g_g
        h_new = o_g * jnp.tanh(c_new)

        hc = jnp.concatenate([h_new, c_new], axis=1)    # [B,2H]
        hc_parts.append(hc)

    # Fused output head: fc_out (+skip) -> LayerNorm -> Linear -> sigmoid.
    th = (jnp.dot(hc, hd_ref[HR_W1:HR_W1 + 2 * H, :], preferred_element_type=jnp.float32)
          + hd_ref[HR_B1:HR_B1 + 1, :])                 # [B,128]
    hy1 = jnp.maximum(th[:, :F1], 0.0)
    hskip = th[:, F1:F1 + H]
    ht2 = (jnp.dot(hy1, hd_ref[HR_W2:HR_W2 + F1, :], preferred_element_type=jnp.float32)
           + hd_ref[HR_B2:HR_B2 + 1, :])
    hy2 = jnp.maximum(ht2[:, :F2], 0.0)
    ht3 = (jnp.dot(hy2, hd_ref[HR_W3:HR_W3 + F2, :], preferred_element_type=jnp.float32)
           + hd_ref[HR_B3:HR_B3 + 1, :])
    hy3 = ht3[:, :H] + hskip                            # [B,H]
    hn = _norm(hy3) * hd_ref[HR_LNG:HR_LNG + 1, :H] + hd_ref[HR_LNB:HR_LNB + 1, :H]
    logits = (jnp.dot(hn, hd_ref[HR_WF:HR_WF + H, :], preferred_element_type=jnp.float32)
              + hd_ref[HR_BF:HR_BF + 1, :])             # [B,128] (cols O: are 0)

    # Lane-dense stores, written exactly once.
    out_ref[...] = jax.nn.sigmoid(logits)               # [B,128]
    hcall_ref[...] = jnp.concatenate(hc_parts, axis=1)  # [B, L*2H] = [2,512]


# --- parameter init (deterministic, Xavier-style) ---------------------------
def _xavier(key, fan_in, fan_out):
    limit = math.sqrt(6.0 / (fan_in + fan_out))
    return jax.random.uniform(key, (fan_in, fan_out), jnp.float32, -limit, limit)


def _init_fcnn(key, in_dim, f1, f2, out_dim):
    k = jax.random.split(key, 4)
    return dict(
        w1=_xavier(k[0], in_dim, f1), b1=jnp.zeros((f1,), jnp.float32),
        w2=_xavier(k[1], f1, f2),     b2=jnp.zeros((f2,), jnp.float32),
        w3=_xavier(k[2], f2, out_dim), b3=jnp.zeros((out_dim,), jnp.float32),
        wsk=_xavier(k[3], in_dim, out_dim), bsk=jnp.zeros((out_dim,), jnp.float32))


def _pack_cell(hp, cp, ln, lstm):
    """Pack one cell into a [CELL_ROWS, 128] lane-dense slab."""
    lnh_g, lnh_b, lnc_g, lnc_b = ln             # each [H]
    w_ih, w_hh, b_ih, b_hh = lstm               # [1,4H], [H,4H], [4H], [4H]
    gscale = jnp.ones((4 * H,), jnp.float32).at[2 * H:3 * H].set(2.0)

    S = jnp.zeros((CELL_ROWS, 128), jnp.float32)
    # W_s : input [h_space | c_space]
    S = S.at[R_WS + 0:R_WS + H,     0:F1].set(hp["w1"][:H])
    S = S.at[R_WS + H:R_WS + 2 * H, F1:2 * F1].set(cp["w1"][:H])
    S = S.at[R_WS + 0:R_WS + H,     64:64 + H].set(hp["wsk"][:H])
    S = S.at[R_WS + H:R_WS + 2 * H, 64 + H:64 + 2 * H].set(cp["wsk"][:H])
    # W_t : input [h_time | c_time]
    S = S.at[R_WT + 0:R_WT + H,     0:F1].set(hp["w1"][H:])
    S = S.at[R_WT + H:R_WT + 2 * H, F1:2 * F1].set(cp["w1"][H:])
    S = S.at[R_WT + 0:R_WT + H,     64:64 + H].set(hp["wsk"][H:])
    S = S.at[R_WT + H:R_WT + 2 * H, 64 + H:64 + 2 * H].set(cp["wsk"][H:])
    # W_2 / W_3 block-diagonal
    S = S.at[R_W2 + 0:R_W2 + F1,      0:F2].set(hp["w2"])
    S = S.at[R_W2 + F1:R_W2 + 2 * F1, F2:2 * F2].set(cp["w2"])
    S = S.at[R_W3 + 0:R_W3 + F2,      0:H].set(hp["w3"])
    S = S.at[R_W3 + F2:R_W3 + 2 * F2, H:2 * H].set(cp["w3"])
    # W_hh with hidden-LayerNorm gamma folded in, g-gate columns x2
    S = S.at[R_WHH:R_WHH + H, :].set((lnh_g[:, None] * w_hh) * gscale[None, :])
    # biases / vectors
    S = S.at[R_B1, 0:F1].set(hp["b1"]).at[R_B1, F1:2 * F1].set(cp["b1"])
    S = S.at[R_B2, 0:F2].set(hp["b2"]).at[R_B2, F2:2 * F2].set(cp["b2"])
    S = S.at[R_B3, 0:H].set(hp["b3"] + hp["bsk"]).at[R_B3, H:2 * H].set(cp["b3"] + cp["bsk"])
    S = S.at[R_WIH, :].set(w_ih[0] * gscale)
    S = S.at[R_BLSTM, :].set((b_ih + b_hh + lnh_b @ w_hh) * gscale)
    S = S.at[R_LNG, 0:H].set(lnc_g)
    S = S.at[R_LNB, 0:H].set(lnc_b)
    return S


def _pack_head(fc, ln_g, ln_b, wf, bf):
    Sh = jnp.zeros((HEAD_ROWS, 128), jnp.float32)
    Sh = Sh.at[HR_W1:HR_W1 + 2 * H, 0:F1].set(fc["w1"])
    Sh = Sh.at[HR_W1:HR_W1 + 2 * H, F1:F1 + H].set(fc["wsk"])
    Sh = Sh.at[HR_W2:HR_W2 + F1, 0:F2].set(fc["w2"])
    Sh = Sh.at[HR_W3:HR_W3 + F2, 0:H].set(fc["w3"])
    Sh = Sh.at[HR_WF:HR_WF + H, 0:O].set(wf)
    Sh = Sh.at[HR_B1, 0:F1].set(fc["b1"])
    Sh = Sh.at[HR_B2, 0:F2].set(fc["b2"])
    Sh = Sh.at[HR_B3, 0:H].set(fc["b3"] + fc["bsk"])
    Sh = Sh.at[HR_LNG, 0:H].set(ln_g)
    Sh = Sh.at[HR_LNB, 0:H].set(ln_b)
    Sh = Sh.at[HR_BF, 0:O].set(bf)
    return Sh


def init_params(key):
    kcells, khead = jax.random.split(key)
    cell_keys = jax.random.split(kcells, L)
    slabs = []
    for ck in cell_keys:
        k = jax.random.split(ck, 4)
        hp = _init_fcnn(k[0], 2 * H, F1, F2, H)
        cp = _init_fcnn(k[1], 2 * H, F1, F2, H)
        ln = (jnp.ones((H,), jnp.float32), jnp.zeros((H,), jnp.float32),
              jnp.ones((H,), jnp.float32), jnp.zeros((H,), jnp.float32))
        w_ih = _xavier(k[2], IN, 4 * H)
        # TODO(synk): PyTorch uses orthogonal init for weight_hh; Xavier used
        # here (init-only difference, forward math identical).
        w_hh = _xavier(k[3], H, 4 * H)
        b_ih = jnp.zeros((4 * H,), jnp.float32).at[H:2 * H].set(1.0)
        b_hh = jnp.zeros((4 * H,), jnp.float32).at[H:2 * H].set(1.0)
        slabs.append(_pack_cell(hp, cp, ln, (w_ih, w_hh, b_ih, b_hh)))
    cellw = jnp.stack(slabs, axis=0)                     # [L, 296, 128]

    kh = jax.random.split(khead, 2)
    fc = _init_fcnn(kh[0], 2 * H, F1, F2, H)
    headw = _pack_head(fc, jnp.ones((H,), jnp.float32), jnp.zeros((H,), jnp.float32),
                       _xavier(kh[1], H, O), jnp.zeros((O,), jnp.float32))
    return {"cellw": cellw, "headw": headw}


# --- forward wrapper ---------------------------------------------------------
@jax.jit
def lattice_rnn_forward(params, x, h_ext, c_ext, chain_h, chain_c):
    """x: [B, L, 1]; h_ext, c_ext: [B, H]; chain_h, chain_c: [L, B, H]."""
    x_bl = jnp.squeeze(x, axis=2).astype(jnp.float32)                 # [B, L]
    hc_ext = jnp.concatenate([h_ext, c_ext], axis=1)                  # [B, 2H]
    chain_hc = jnp.concatenate([chain_h, chain_c], axis=2)            # [L, B, 2H]

    out_pad, hc_all = pl.pallas_call(
        lattice_kernel,
        out_shape=(jax.ShapeDtypeStruct((B, 128), jnp.float32),       # lane-dense
                   jax.ShapeDtypeStruct((B, L * 2 * H), jnp.float32)),  # [2, 512]
    )(x_bl, hc_ext, chain_hc, params["cellw"], params["headw"])

    out = out_pad[:, :O]
    hc = hc_all.reshape(B, L, 2 * H)
    nh = jnp.transpose(hc[:, :, :H], (1, 0, 2))                       # [L, B, H]
    nc = jnp.transpose(hc[:, :, H:], (1, 0, 2))
    return out, nh[-1], nc[-1], (nh, nc)


# --- main --------------------------------------------------------------------
if __name__ == "__main__":
    root = jax.random.PRNGKey(0)
    k_param, k_x, k_he, k_ce, k_ch, k_cc = jax.random.split(root, 6)

    params = init_params(k_param)

    x = jax.random.normal(k_x, (B, L, 1), jnp.float32)        # [batch, chain, 1]
    h_ext = jax.random.normal(k_he, (B, H), jnp.float32) * 0.1
    c_ext = jax.random.normal(k_ce, (B, H), jnp.float32) * 0.1
    chain_h = jax.random.normal(k_ch, (L, B, H), jnp.float32) * 0.1
    chain_c = jax.random.normal(k_cc, (L, B, H), jnp.float32) * 0.1

    output, final_h, final_c, (nh, nc) = lattice_rnn_forward(
        params, x, h_ext, c_ext, chain_h, chain_c)

    jax.block_until_ready((output, final_h, final_c, nh, nc))
    assert output.shape == (B, O)
    assert final_h.shape == (B, H) and final_c.shape == (B, H)
    assert nh.shape == (L, B, H) and nc.shape == (L, B, H)
    print("KERNEL_OK")
</pallas_src>

<mosaic_0001>
module attributes {stable_mosaic.version = 11 : i64} {
  func.func @lattice_kernel(%arg0: memref<2x8xf32, #tpu.memory_space<vmem>>, %arg1: memref<2x64xf32, #tpu.memory_space<vmem>>, %arg2: memref<8x2x64xf32, #tpu.memory_space<vmem>>, %arg3: memref<8x296x128xf32, #tpu.memory_space<vmem>>, %arg4: memref<168x128xf32, #tpu.memory_space<vmem>>, %arg5: memref<2x128xf32, #tpu.memory_space<vmem>>, %arg6: memref<2x512xf32, #tpu.memory_space<vmem>>) attributes {dimension_semantics = [], scalar_prefetch = 0 : i64, scratch_operands = 0 : i64, tpu.core_type = #tpu.core_type<tc>} {
    %c0 = arith.constant 0 : index
    %c0_0 = arith.constant 0 : index
    %0 = vector.load %arg1[%c0, %c0_0] : memref<2x64xf32, #tpu.memory_space<vmem>>, vector<2x64xf32>
    %c0_1 = arith.constant 0 : index
    %c0_2 = arith.constant 0 : index
    %1 = vector.load %arg0[%c0_1, %c0_2] : memref<2x8xf32, #tpu.memory_space<vmem>>, vector<2x8xf32>
    %c0_3 = arith.constant 0 : index
    %c0_4 = arith.constant 0 : index
    %c0_5 = arith.constant 0 : index
    %2 = vector.load %arg2[%c0_3, %c0_4, %c0_5] : memref<8x2x64xf32, #tpu.memory_space<vmem>>, vector<1x2x64xf32>
    %3 = vector.shape_cast %2 : vector<1x2x64xf32> to vector<2x64xf32>
    %c0_i32 = arith.constant 0 : i32
    %c0_i32_6 = arith.constant 0 : i32
    %c0_i32_7 = arith.constant 0 : i32
    %4 = tpu.memref_slice %arg3[%c0_i32, %c0_i32_6, %c0_i32_7] : memref<8x296x128xf32, #tpu.memory_space<vmem>> -> memref<1x296x128xf32, #tpu.memory_space<vmem>>
    %5 = tpu.memref_squeeze %4 : memref<1x296x128xf32, #tpu.memory_space<vmem>> -> memref<296x128xf32, #tpu.memory_space<vmem>>
    %c0_8 = arith.constant 0 : index
    %c0_9 = arith.constant 0 : index
    %6 = vector.load %5[%c0_8, %c0_9] : memref<296x128xf32, #tpu.memory_space<vmem>>, vector<64x128xf32>
    %cst = arith.constant dense<0.000000e+00> : vector<2x128xf32>
    %7 = tpu.matmul %0, %6, %cst {dimension_numbers = #tpu.dot_dimension_numbers<[1], [0], [0], [1], [0, 0, 1, 1], [], []>} : vector<2x64xf32>, vector<64x128xf32>, vector<2x128xf32> -> vector<2x128xf32>
    %c0_i32_10 = arith.constant 0 : i32
    %c0_i32_11 = arith.constant 0 : i32
    %c0_i32_12 = arith.constant 0 : i32
    %8 = tpu.memref_slice %arg3[%c0_i32_10, %c0_i32_11, %c0_i32_12] : memref<8x296x128xf32, #tpu.memory_space<vmem>> -> memref<1x296x128xf32, #tpu.memory_space<vmem>>
    %9 = tpu.memref_squeeze %8 : memref<1x296x128xf32, #tpu.memory_space<vmem>> -> memref<296x128xf32, #tpu.memory_space<vmem>>
    %c64 = arith.constant 64 : index
    %c0_13 = arith.constant 0 : index
    %10 = vector.load %9[%c64, %c0_13] : memref<296x128xf32, #tpu.memory_space<vmem>>, vector<64x128xf32>
    %cst_14 = arith.constant dense<0.000000e+00> : vector<2x128xf32>
    %11 = tpu.matmul %3, %10, %cst_14 {dimension_numbers = #tpu.dot_dimension_numbers<[1], [0], [0], [1], [0, 0, 1, 1], [], []>} : vector<2x64xf32>, vector<64x128xf32>, vector<2x128xf32> -> vector<2x128xf32>
    %12 = arith.addf %7, %11 : vector<2x128xf32>
    %c0_i32_15 = arith.constant 0 : i32
    %c0_i32_16 = arith.constant 0 : i32
    %c0_i32_17 = arith.constant 0 : i32
    %13 = tpu.memref_slice %arg3[%c0_i32_15, %c0_i32_16, %c0_i32_17] : memref<8x296x128xf32, #tpu.memory_space<vmem>> -> memref<1x296x128xf32, #tpu.memory_space<vmem>>
    %14 = tpu.memref_squeeze %13 : memref<1x296x128xf32, #tpu.memory_space<vmem>> -> memref<296x128xf32, #tpu.memory_space<vmem>>
    %c288 = arith.constant 288 : index
    %c0_18 = arith.constant 0 : index
    %15 = vector.load %14[%c288, %c0_18] : memref<296x128xf32, #tpu.memory_space<vmem>>, vector<1x128xf32>
    %16 = vector.broadcast %15 : vector<1x128xf32> to vector<2x128xf32>
    %17 = arith.addf %12, %16 : vector<2x128xf32>
    %18 = vector.extract_strided_slice %17 {offsets = [0, 0], sizes = [2, 64], strides = [1, 1]} : vector<2x128xf32> to vector<2x64xf32>
    %cst_19 = arith.constant 0.000000e+00 : f32
    %19 = vector.broadcast %cst_19 : f32 to vector<2x64xf32>
    %20 = arith.maximumf %18, %19 : vector<2x64xf32>
    %21 = vector.extract_strided_slice %17 {offsets = [0, 64], sizes = [2, 64], strides = [1, 1]} : vector<2x128xf32> to vector<2x64xf32>
    %c0_i32_20 = arith.constant 0 : i32
    %c0_i32_21 = arith.constant 0 : i32
    %c0_i32_22 = arith.constant 0 : i32
    %22 = tpu.memref_slice %arg3[%c0_i32_20, %c0_i32_21, %c0_i32_22] : memref<8x296x128xf32, #tpu.memory_space<vmem>> -> memref<1x296x128xf32, #tpu.memory_space<vmem>>
    %23 = tpu.memref_squeeze %22 : memref<1x296x128xf32, #tpu.memory_space<vmem>> -> memref<296x128xf32, #tpu.memory_space<vmem>>
    %c128 = arith.constant 128 : index
    %c0_23 = arith.constant 0 : index
    %24 = vector.load %23[%c128, %c0_23] : memref<296x128xf32, #tpu.memory_space<vmem>>, vector<64x128xf32>
    %cst_24 = arith.constant dense<0.000000e+00> : vector<2x128xf32>
    %25 = tpu.matmul %20, %24, %cst_24 {dimension_numbers = #tpu.dot_dimension_numbers<[1], [0], [0], [1], [0, 0, 1, 1], [], []>} : vector<2x64xf32>, vector<64x128xf32>, vector<2x128xf32> -> vector<2x128xf32>
    %c0_i32_25 = arith.constant 0 : i32
    %c0_i32_26 = arith.constant 0 : i32
    %c0_i32_27 = arith.constant 0 : i32
    %26 = tpu.memref_slice %arg3[%c0_i32_25, %c0_i32_26, %c0_i32_27] : memref<8x296x128xf32, #tpu.memory_space<vmem>> -> memref<1x296x128xf32, #tpu.memory_space<vmem>>
    %27 = tpu.memref_squeeze %26 : memref<1x296x128xf32, #tpu.memory_space<vmem>> -> memref<296x128xf32, #tpu.memory_space<vmem>>
    %c289 = arith.constant 289 : index
    %c0_28 = arith.constant 0 : index
    %28 = vector.load %27[%c289, %c0_28] : memref<296x128xf32, #tpu.memory_space<vmem>>, vector<1x128xf32>
    %29 = vector.broadcast %28 : vector<1x128xf32> to vector<2x128xf32>
    %30 = arith.addf %25, %29 : vector<2x128xf32>
    %31 = vector.extract_strided_slice %30 {offsets = [0, 0], sizes = [2, 64], strides = [1, 1]} : vector<2x128xf32> to vector<2x64xf32>
    %cst_29 = arith.constant 0.000000e+00 : f32
    %32 = vector.broadcast %cst_29 : f32 to vector<2x64xf32>
    %33 = arith.maximumf %31, %32 : vector<2x64xf32>
    %c0_i32_30 = arith.constant 0 : i32
    %c0_i32_31 = arith.constant 0 : i32
    %c0_i32_32 = arith.constant 0 : i32
    %34 = tpu.memref_slice %arg3[%c0_i32_30, %c0_i32_31, %c0_i32_32] : memref<8x296x128xf32, #tpu.memory_space<vmem>> -> memref<1x296x128xf32, #tpu.memory_space<vmem>>
    %35 = tpu.memref_squeeze %34 : memref<1x296x128xf32, #tpu.memory_space<vmem>> -> memref<296x128xf32, #tpu.memory_space<vmem>>
    %c192 = arith.constant 192 : index
    %c0_33 = arith.constant 0 : index
    %36 = vector.load %35[%c192, %c0_33] : memref<296x128xf32, #tpu.memory_space<vmem>>, vector<64x128xf32>
    %cst_34 = arith.constant dense<0.000000e+00> : vector<2x128xf32>
    %37 = tpu.matmul %33, %36, %cst_34 {dimension_numbers = #tpu.dot_dimension_numbers<[1], [0], [0], [1], [0, 0, 1, 1], [], []>} : vector<2x64xf32>, vector<64x128xf32>, vector<2x128xf32> -> vector<2x128xf32>
    %c0_i32_35 = arith.constant 0 : i32
    %c0_i32_36 = arith.constant 0 : i32
    %c0_i32_37 = arith.constant 0 : i32
    %38 = tpu.memref_slice %arg3[%c0_i32_35, %c0_i32_36, %c0_i32_37] : memref<8x296x128xf32, #tpu.memory_space<vmem>> -> memref<1x296x128xf32, #tpu.memory_space<vmem>>
    %39 = tpu.memref_squeeze %38 : memref<1x296x128xf32, #tpu.memory_space<vmem>> -> memref<296x128xf32, #tpu.memory_space<vmem>>
    %c290 = arith.constant 290 : index
    %c0_38 = arith.constant 0 : index
    %40 = vector.load %39[%c290, %c0_38] : memref<296x128xf32, #tpu.memory_space<vmem>>, vector<1x128xf32>
    %41 = vector.broadcast %40 : vector<1x128xf32> to vector<2x128xf32>
    %42 = arith.addf %37, %41 : vector<2x128xf32>
    %43 = vector.extract_strided_slice %42 {offsets = [0, 0], sizes = [2, 64], strides = [1, 1]} : vector<2x128xf32> to vector<2x64xf32>
    %44 = arith.addf %43, %21 : vector<2x64xf32>
    %45 = vector.extract_strided_slice %44 {offsets = [0, 0], sizes = [2, 32], strides = [1, 1]} : vector<2x64xf32> to vector<2x32xf32>
    %cst_39 = arith.constant dense<0.000000e+00> : vector<2xf32>
    %46 = vector.multi_reduction <add>, %45, %cst_39 [1] : vector<2x32xf32> to vector<2xf32>
    %47 = vector.shape_cast %46 : vector<2xf32> to vector<2x1xf32>
    %cst_40 = arith.constant 3.200000e+01 : f32
    %48 = vector.broadcast %cst_40 : f32 to vector<2x1xf32>
    %49 = arith.divf %47, %48 : vector<2x1xf32>
    %50 = arith.mulf %45, %45 : vector<2x32xf32>
    %cst_41 = arith.constant dense<0.000000e+00> : vector<2xf32>
    %51 = vector.multi_reduction <add>, %50, %cst_41 [1] : vector<2x32xf32> to vector<2xf32>
    %52 = vector.shape_cast %51 : vector<2xf32> to vector<2x1xf32>
    %cst_42 = arith.constant 3.200000e+01 : f32
    %53 = vector.broadcast %cst_42 : f32 to vector<2x1xf32>
    %54 = arith.divf %52, %53 : vector<2x1xf32>
    %55 = arith.mulf %49, %49 : vector<2x1xf32>
    %56 = arith.subf %54, %55 : vector<2x1xf32>
    %57 = vector.broadcast %49 : vector<2x1xf32> to vector<2x32xf32>
    %58 = arith.subf %45, %57 : vector<2x32xf32>
    %cst_43 = arith.constant 9.99999974E-6 : f32
    %59 = vector.broadcast %cst_43 : f32 to vector<2x1xf32>
    %60 = arith.addf %56, %59 : vector<2x1xf32>
    %61 = math.rsqrt %60 : vector<2x1xf32>
    %62 = vector.broadcast %61 : vector<2x1xf32> to vector<2x32xf32>
    %63 = arith.mulf %58, %62 : vector<2x32xf32>
    %64 = vector.extract_strided_slice %44 {offsets = [0, 32], sizes = [2, 32], strides = [1, 1]} : vector<2x64xf32> to vector<2x32xf32>
    %cst_44 = arith.constant dense<0.000000e+00> : vector<2xf32>
    %65 = vector.multi_reduction <add>, %64, %cst_44 [1] : vector<2x32xf32> to vector<2xf32>
    %66 = vector.shape_cast %65 : vector<2xf32> to vector<2x1xf32>
    %cst_45 = arith.constant 3.200000e+01 : f32
    %67 = vector.broadcast %cst_45 : f32 to vector<2x1xf32>
    %68 = arith.divf %66, %67 : vector<2x1xf32>
    %69 = arith.mulf %64, %64 : vector<2x32xf32>
    %cst_46 = arith.constant dense<0.000000e+00> : vector<2xf32>
    %70 = vector.multi_reduction <add>, %69, %cst_46 [1] : vector<2x32xf32> to vector<2xf32>
    %71 = vector.shape_cast %70 : vector<2xf32> to vector<2x1xf32>
    %cst_47 = arith.constant 3.200000e+01 : f32
    %72 = vector.broadcast %cst_47 : f32 to vector<2x1xf32>
    %73 = arith.divf %71, %72 : vector<2x1xf32>
    %74 = arith.mulf %68, %68 : vector<2x1xf32>
    %75 = arith.subf %73, %74 : vector<2x1xf32>
    %76 = vector.broadcast %68 : vector<2x1xf32> to vector<2x32xf32>
    %77 = arith.subf %64, %76 : vector<2x32xf32>
    %cst_48 = arith.constant 9.99999974E-6 : f32
    %78 = vector.broadcast %cst_48 : f32 to vector<2x1xf32>
    %79 = arith.addf %75, %78 : vector<2x1xf32>
    %80 = math.rsqrt %79 : vector<2x1xf32>
    %81 = vector.broadcast %80 : vector<2x1xf32> to vector<2x32xf32>
    %82 = arith.mulf %77, %81 : vector<2x32xf32>
    %c0_i32_49 = arith.constant 0 : i32
    %c0_i32_50 = arith.constant 0 : i32
    %c0_i32_51 = arith.constant 0 : i32
    %83 = tpu.memref_slice %arg3[%c0_i32_49, %c0_i32_50, %c0_i32_51] : memref<8x296x128xf32, #tpu.memory_space<vmem>> -> memref<1x296x128xf32, #tpu.memory_space<vmem>>
    %84 = tpu.memref_squeeze %83 : memref<1x296x128xf32, #tpu.memory_space<vmem>> -> memref<296x128xf32, #tpu.memory_space<vmem>>
    %c293 = arith.constant 293 : index
    %c0_52 = arith.constant 0 : index
    %85 = vector.load %84[%c293, %c0_52] : memref<296x128xf32, #tpu.memory_space<vmem>>, vector<1x32xf32>
    %86 = vector.broadcast %85 : vector<1x32xf32> to vector<2x32xf32>
    %87 = arith.mulf %82, %86 : vector<2x32xf32>
    %c0_i32_53 = arith.constant 0 : i32
    %c0_i32_54 = arith.constant 0 : i32
    %c0_i32_55 = arith.constant 0 : i32
    %88 = tpu.memref_slice %arg3[%c0_i32_53, %c0_i32_54, %c0_i32_55] : memref<8x296x128xf32, #tpu.memory_space<vmem>> -> memref<1x296x128xf32, #tpu.memory_space<vmem>>
    %89 = tpu.memref_squeeze %88 : memref<1x296x128xf32, #tpu.memory_space<vmem>> -> memref<296x128xf32, #tpu.memory_space<vmem>>
    %c294 = arith.constant 294 : index
    %c0_56 = arith.constant 0 : index
    %90 = vector.load %89[%c294, %c0_56] : memref<296x128xf32, #tpu.memory_space<vmem>>, vector<1x32xf32>
    %91 = vector.broadcast %90 : vector<1x32xf32> to vector<2x32xf32>
    %92 = arith.addf %87, %91 : vector<2x32xf32>
    %93 = vector.extract_strided_slice %1 {offsets = [0, 0], sizes = [2, 1], strides = [1, 1]} : vector<2x8xf32> to vector<2x1xf32>
    %c0_i32_57 = arith.constant 0 : i32
    %c0_i32_58 = arith.constant 0 : i32
    %c0_i32_59 = arith.constant 0 : i32
    %94 = tpu.memref_slice %arg3[%c0_i32_57, %c0_i32_58, %c0_i32_59] : memref<8x296x128xf32, #tpu.memory_space<vmem>> -> memref<1x296x128xf32, #tpu.memory_space<vmem>>
    %95 = tpu.memref_squeeze %94 : memref<1x296x128xf32, #tpu.memory_space<vmem>> -> memref<296x128xf32, #tpu.memory_space<vmem>>
    %c291 = arith.constant 291 : index
    %c0_60 = arith.constant 0 : index
    %96 = vector.load %95[%c291, %c0_60] : memref<296x128xf32, #tpu.memory_space<vmem>>, vector<1x128xf32>
    %97 = vector.broadcast %93 : vector<2x1xf32> to vector<2x128xf32>
    %98 = vector.broadcast %96 : vector<1x128xf32> to vector<2x128xf32>
    %99 = arith.mulf %97, %98 : vector<2x128xf32>
    %c0_i32_61 = arith.constant 0 : i32
    %c0_i32_62 = arith.constant 0 : i32
    %c0_i32_63 = arith.constant 0 : i32
    %100 = tpu.memref_slice %arg3[%c0_i32_61, %c0_i32_62, %c0_i32_63] : memref<8x296x128xf32, #tpu.memory_space<vmem>> -> memref<1x296x128xf32, #tpu.memory_space<vmem>>
    %101 = tpu.memref_squeeze %100 : memref<1x296x128xf32, #tpu.memory_space<vmem>> -> memref<296x128xf32, #tpu.memory_space<vmem>>
    %c256 = arith.constant 256 : index
    %c0_64 = arith.constant 0 : index
    %102 = vector.load %101[%c256, %c0_64] : memref<296x128xf32, #tpu.memory_space<vmem>>, vector<32x128xf32>
    %cst_65 = arith.constant dense<0.000000e+00> : vector<2x128xf32>
    %103 = tpu.matmul %63, %102, %cst_65 {dimension_numbers = #tpu.dot_dimension_numbers<[1], [0], [0], [1], [0, 0, 1, 1], [], []>} : vector<2x32xf32>, vector<32x128xf32>, vector<2x128xf32> -> vector<2x128xf32>
    %104 = arith.addf %99, %103 : vector<2x128xf32>
    %c0_i32_66 = arith.constant 0 : i32
    %c0_i32_67 = arith.constant 0 : i32
    %c0_i32_68 = arith.constant 0 : i32
    %105 = tpu.memref_slice %arg3[%c0_i32_66, %c0_i32_67, %c0_i32_68] : memref<8x296x128xf32, #tpu.memory_space<vmem>> -> memref<1x296x128xf32, #tpu.memory_space<vmem>>
    %106 = tpu.memref_squeeze %105 : memref<1x296x128xf32, #tpu.memory_space<vmem>> -> memref<296x128xf32, #tpu.memory_space<vmem>>
    %c292 = arith.constant 292 : index
    %c0_69 = arith.constant 0 : index
    %107 = vector.load %106[%c292, %c0_69] : memref<296x128xf32, #tpu.memory_space<vmem>>, vector<1x128xf32>
    %108 = vector.broadcast %107 : vector<1x128xf32> to vector<2x128xf32>
    %109 = arith.addf %104, %108 : vector<2x128xf32>
    %110 = arith.negf %109 : vector<2x128xf32>
    %111 = math.exp %110 : vector<2x128xf32>
    %cst_70 = arith.constant 1.000000e+00 : f32
    %112 = vector.broadcast %cst_70 : f32 to vector<2x128xf32>
    %113 = arith.addf %112, %111 : vector<2x128xf32>
    %114 = arith.divf %112, %113 : vector<2x128xf32>
    %115 = vector.extract_strided_slice %114 {offsets = [0, 0], sizes = [2, 32], strides = [1, 1]} : vector<2x128xf32> to vector<2x32xf32>
    %116 = vector.extract_strided_slice %114 {offsets = [0, 32], sizes = [2, 32], strides = [1, 1]} : vector<2x128xf32> to vector<2x32xf32>
    %117 = vector.extract_strided_slice %114 {offsets = [0, 64], sizes = [2, 32], strides = [1, 1]} : vector<2x128xf32> to vector<2x32xf32>
    %cst_71 = arith.constant 2.000000e+00 : f32
    %118 = vector.broadcast %cst_71 : f32 to vector<2x32xf32>
    %119 = arith.mulf %118, %117 : vector<2x32xf32>
    %cst_72 = arith.constant 1.000000e+00 : f32
    %120 = vector.broadcast %cst_72 : f32 to vector<2x32xf32>
    %121 = arith.subf %119, %120 : vector<2x32xf32>
    %122 = vector.extract_strided_slice %114 {offsets = [0, 96], sizes = [2, 32], strides = [1, 1]} : vector<2x128xf32> to vector<2x32xf32>
    %123 = arith.mulf %116, %92 : vector<2x32xf32>
    %124 = arith.mulf %115, %121 : vector<2x32xf32>
    %125 = arith.addf %123, %124 : vector<2x32xf32>
    %126 = math.tanh %125 : vector<2x32xf32>
    %127 = arith.mulf %122, %126 : vector<2x32xf32>
    %128 = tpu.concatenate %127, %125 in 1 : vector<2x32xf32>, vector<2x32xf32> -> vector<2x64xf32>
    %c1 = arith.constant 1 : index
    %c0_73 = arith.constant 0 : index
    %c0_74 = arith.constant 0 : index
    %129 = vector.load %arg2[%c1, %c0_73, %c0_74] : memref<8x2x64xf32, #tpu.memory_space<vmem>>, vector<1x2x64xf32>
    %130 = vector.shape_cast %129 : vector<1x2x64xf32> to vector<2x64xf32>
    %c1_i32 = arith.constant 1 : i32
    %c0_i32_75 = arith.constant 0 : i32
    %c0_i32_76 = arith.constant 0 : i32
    %131 = tpu.memref_slice %arg3[%c1_i32, %c0_i32_75, %c0_i32_76] : memref<8x296x128xf32, #tpu.memory_space<vmem>> -> memref<1x296x128xf32, #tpu.memory_space<vmem>>
    %132 = tpu.memref_squeeze %131 : memref<1x296x128xf32, #tpu.memory_space<vmem>> -> memref<296x128xf32, #tpu.memory_space<vmem>>
    %c0_77 = arith.constant 0 : index
    %c0_78 = arith.constant 0 : index
    %133 = vector.load %132[%c0_77, %c0_78] : memref<296x128xf32, #tpu.memory_space<vmem>>, vector<64x128xf32>
    %cst_79 = arith.constant dense<0.000000e+00> : vector<2x128xf32>
    %134 = tpu.matmul %128, %133, %cst_79 {dimension_numbers = #tpu.dot_dimension_numbers<[1], [0], [0], [1], [0, 0, 1, 1], [], []>} : vector<2x64xf32>, vector<64x128xf32>, vector<2x128xf32> -> vector<2x128xf32>
    %c1_i32_80 = arith.constant 1 : i32
    %c0_i32_81 = arith.constant 0 : i32
    %c0_i32_82 = arith.constant 0 : i32
    %135 = tpu.memref_slice %arg3[%c1_i32_80, %c0_i32_81, %c0_i32_82] : memref<8x296x128xf32, #tpu.memory_space<vmem>> -> memref<1x296x128xf32, #tpu.memory_space<vmem>>
    %136 = tpu.memref_squeeze %135 : memref<1x296x128xf32, #tpu.memory_space<vmem>> -> memref<296x128xf32, #tpu.memory_space<vmem>>
    %c64_83 = arith.constant 64 : index
    %c0_84 = arith.constant 0 : index
    %137 = vector.load %136[%c64_83, %c0_84] : memref<296x128xf32, #tpu.memory_space<vmem>>, vector<64x128xf32>
    %cst_85 = arith.constant dense<0.000000e+00> : vector<2x128xf32>
    %138 = tpu.matmul %130, %137, %cst_85 {dimension_numbers = #tpu.dot_dimension_numbers<[1], [0], [0], [1], [0, 0, 1, 1], [], []>} : vector<2x64xf32>, vector<64x128xf32>, vector<2x128xf32> -> vector<2x128xf32>
    %139 = arith.addf %134, %138 : vector<2x128xf32>
    %c1_i32_86 = arith.constant 1 : i32
    %c0_i32_87 = arith.constant 0 : i32
    %c0_i32_88 = arith.constant 0 : i32
    %140 = tpu.memref_slice %arg3[%c1_i32_86, %c0_i32_87, %c0_i32_88] : memref<8x296x128xf32, #tpu.memory_space<vmem>> -> memref<1x296x128xf32, #tpu.memory_space<vmem>>
    %141 = tpu.memref_squeeze %140 : memref<1x296x128xf32, #tpu.memory_space<vmem>> -> memref<296x128xf32, #tpu.memory_space<vmem>>
    %c288_89 = arith.constant 288 : index
    %c0_90 = arith.constant 0 : index
    %142 = vector.load %141[%c288_89, %c0_90] : memref<296x128xf32, #tpu.memory_space<vmem>>, vector<1x128xf32>
    %143 = vector.broadcast %142 : vector<1x128xf32> to vector<2x128xf32>
    %144 = arith.addf %139, %143 : vector<2x128xf32>
    %145 = vector.extract_strided_slice %144 {offsets = [0, 0], sizes = [2, 64], strides = [1, 1]} : vector<2x128xf32> to vector<2x64xf32>
    %cst_91 = arith.constant 0.000000e+00 : f32
    %146 = vector.broadcast %cst_91 : f32 to vector<2x64xf32>
    %147 = arith.maximumf %145, %146 : vector<2x64xf32>
    %148 = vector.extract_strided_slice %144 {offsets = [0, 64], sizes = [2, 64], strides = [1, 1]} : vector<2x128xf32> to vector<2x64xf32>
    %c1_i32_92 = arith.constant 1 : i32
    %c0_i32_93 = arith.constant 0 : i32
    %c0_i32_94 = arith.constant 0 : i32
    %149 = tpu.memref_slice %arg3[%c1_i32_92, %c0_i32_93, %c0_i32_94] : memref<8x296x128xf32, #tpu.memory_space<vmem>> -> memref<1x296x128xf32, #tpu.memory_space<vmem>>
    %150 = tpu.memref_squeeze %149 : memref<1x296x128xf32, #tpu.memory_space<vmem>> -> memref<296x128xf32, #tpu.memory_space<vmem>>
    %c128_95 = arith.constant 128 : index
    %c0_96 = arith.constant 0 : index
    %151 = vector.load %150[%c128_95, %c0_96] : memref<296x128xf32, #tpu.memory_space<vmem>>, vector<64x128xf32>
    %cst_97 = arith.constant dense<0.000000e+00> : vector<2x128xf32>
    %152 = tpu.matmul %147, %151, %cst_97 {dimension_numbers = #tpu.dot_dimension_numbers<[1], [0], [0], [1], [0, 0, 1, 1], [], []>} : vector<2x64xf32>, vector<64x128xf32>, vector<2x128xf32> -> vector<2x128xf32>
    %c1_i32_98 = arith.constant 1 : i32
    %c0_i32_99 = arith.constant 0 : i32
    %c0_i32_100 = arith.constant 0 : i32
    %153 = tpu.memref_slice %arg3[%c1_i32_98, %c0_i32_99, %c0_i32_100] : memref<8x296x128xf32, #tpu.memory_space<vmem>> -> memref<1x296x128xf32, #tpu.memory_space<vmem>>
    %154 = tpu.memref_squeeze %153 : memref<1x296x128xf32, #tpu.memory_space<vmem>> -> memref<296x128xf32, #tpu.memory_space<vmem>>
    %c289_101 = arith.constant 289 : index
    %c0_102 = arith.constant 0 : index
    %155 = vector.load %154[%c289_101, %c0_102] : memref<296x128xf32, #tpu.memory_space<vmem>>, vector<1x128xf32>
    %156 = vector.broadcast %155 : vector<1x128xf32> to vector<2x128xf32>
    %157 = arith.addf %152, %156 : vector<2x128xf32>
    %158 = vector.extract_strided_slice %157 {offsets = [0, 0], sizes = [2, 64], strides = [1, 1]} : vector<2x128xf32> to vector<2x64xf32>
    %cst_103 = arith.constant 0.000000e+00 : f32
    %159 = vector.broadcast %cst_103 : f32 to vector<2x64xf32>
    %160 = arith.maximumf %158, %159 : vector<2x64xf32>
    %c1_i32_104 = arith.constant 1 : i32
    %c0_i32_105 = arith.constant 0 : i32
    %c0_i32_106 = arith.constant 0 : i32
    %161 = tpu.memref_slice %arg3[%c1_i32_104, %c0_i32_105, %c0_i32_106] : memref<8x296x128xf32, #tpu.memory_space<vmem>> -> memref<1x296x128xf32, #tpu.memory_space<vmem>>
    %162 = tpu.memref_squeeze %161 : memref<1x296x128xf32, #tpu.memory_space<vmem>> -> memref<296x128xf32, #tpu.memory_space<vmem>>
    %c192_107 = arith.constant 192 : index
    %c0_108 = arith.constant 0 : index
    %163 = vector.load %162[%c192_107, %c0_108] : memref<296x128xf32, #tpu.memory_space<vmem>>, vector<64x128xf32>
    %cst_109 = arith.constant dense<0.000000e+00> : vector<2x128xf32>
    %164 = tpu.matmul %160, %163, %cst_109 {dimension_numbers = #tpu.dot_dimension_numbers<[1], [0], [0], [1], [0, 0, 1, 1], [], []>} : vector<2x64xf32>, vector<64x128xf32>, vector<2x128xf32> -> vector<2x128xf32>
    %c1_i32_110 = arith.constant 1 : i32
    %c0_i32_111 = arith.constant 0 : i32
    %c0_i32_112 = arith.constant 0 : i32
    %165 = tpu.memref_slice %arg3[%c1_i32_110, %c0_i32_111, %c0_i32_112] : memref<8x296x128xf32, #tpu.memory_space<vmem>> -> memref<1x296x128xf32, #tpu.memory_space<vmem>>
    %166 = tpu.memref_squeeze %165 : memref<1x296x128xf32, #tpu.memory_space<vmem>> -> memref<296x128xf32, #tpu.memory_space<vmem>>
    %c290_113 = arith.constant 290 : index
    %c0_114 = arith.constant 0 : index
    %167 = vector.load %166[%c290_113, %c0_114] : memref<296x128xf32, #tpu.memory_space<vmem>>, vector<1x128xf32>
    %168 = vector.broadcast %167 : vector<1x128xf32> to vector<2x128xf32>
    %169 = arith.addf %164, %168 : vector<2x128xf32>
    %170 = vector.extract_strided_slice %169 {offsets = [0, 0], sizes = [2, 64], strides = [1, 1]} : vector<2x128xf32> to vector<2x64xf32>
    %171 = arith.addf %170, %148 : vector<2x64xf32>
    %172 = vector.extract_strided_slice %171 {offsets = [0, 0], sizes = [2, 32], strides = [1, 1]} : vector<2x64xf32> to vector<2x32xf32>
    %cst_115 = arith.constant dense<0.000000e+00> : vector<2xf32>
    %173 = vector.multi_reduction <add>, %172, %cst_115 [1] : vector<2x32xf32> to vector<2xf32>
    %174 = vector.shape_cast %173 : vector<2xf32> to vector<2x1xf32>
    %cst_116 = arith.constant 3.200000e+01 : f32
    %175 = vector.broadcast %cst_116 : f32 to vector<2x1xf32>
    %176 = arith.divf %174, %175 : vector<2x1xf32>
    %177 = arith.mulf %172, %172 : vector<2x32xf32>
    %cst_117 = arith.constant dense<0.000000e+00> : vector<2xf32>
    %178 = vector.multi_reduction <add>, %177, %cst_117 [1] : vector<2x32xf32> to vector<2xf32>
    %179 = vector.shape_cast %178 : vector<2xf32> to vector<2x1xf32>
    %cst_118 = arith.constant 3.200000e+01 : f32
    %180 = vector.broadcast %cst_118 : f32 to vector<2x1xf32>
    %181 = arith.divf %179, %180 : vector<2x1xf32>
    %182 = arith.mulf %176, %176 : vector<2x1xf32>
    %183 = arith.subf %181, %182 : vector<2x1xf32>
    %184 = vector.broadcast %176 : vector<2x1xf32> to vector<2x32xf32>
    %185 = arith.subf %172, %184 : vector<2x32xf32>
    %cst_119 = arith.constant 9.99999974E-6 : f32
    %186 = vector.broadcast %cst_119 : f32 to vector<2x1xf32>
    %187 = arith.addf %183, %186 : vector<2x1xf32>
    %188 = math.rsqrt %187 : vector<2x1xf32>
    %189 = vector.broadcast %188 : vector<2x1xf32> to vector<2x32xf32>
    %190 = arith.mulf %185, %189 : vector<2x32xf32>
    %191 = vector.extract_strided_slice %171 {offsets = [0, 32], sizes = [2, 32], strides = [1, 1]} : vector<2x64xf32> to vector<2x32xf32>
    %cst_120 = arith.constant dense<0.000000e+00> : vector<2xf32>
    %192 = vector.multi_reduction <add>, %191, %cst_120 [1] : vector<2x32xf32> to vector<2xf32>
    %193 = vector.shape_cast %192 : vector<2xf32> to vector<2x1xf32>
    %cst_121 = arith.constant 3.200000e+01 : f32
    %194 = vector.broadcast %cst_121 : f32 to vector<2x1xf32>
    %195 = arith.divf %193, %194 : vector<2x1xf32>
    %196 = arith.mulf %191, %191 : vector<2x32xf32>
    %cst_122 = arith.constant dense<0.000000e+00> : vector<2xf32>
    %197 = vector.multi_reduction <add>, %196, %cst_122 [1] : vector<2x32xf32> to vector<2xf32>
    %198 = vector.shape_cast %197 : vector<2xf32> to vector<2x1xf32>
    %cst_123 = arith.constant 3.200000e+01 : f32
    %199 = vector.broadcast %cst_123 : f32 to vector<2x1xf32>
    %200 = arith.divf %198, %199 : vector<2x1xf32>
    %201 = arith.mulf %195, %195 : vector<2x1xf32>
    %202 = arith.subf %200, %201 : vector<2x1xf32>
    %203 = vector.broadcast %195 : vector<2x1xf32> to vector<2x32xf32>
    %204 = arith.subf %191, %203 : vector<2x32xf32>
    %cst_124 = arith.constant 9.99999974E-6 : f32
    %205 = vector.broadcast %cst_124 : f32 to vector<2x1xf32>
    %206 = arith.addf %202, %205 : vector<2x1xf32>
    %207 = math.rsqrt %206 : vector<2x1xf32>
    %208 = vector.broadcast %207 : vector<2x1xf32> to vector<2x32xf32>
    %209 = arith.mulf %204, %208 : vector<2x32xf32>
    %c1_i32_125 = arith.constant 1 : i32
    %c0_i32_126 = arith.constant 0 : i32
    %c0_i32_127 = arith.constant 0 : i32
    %210 = tpu.memref_slice %arg3[%c1_i32_125, %c0_i32_126, %c0_i32_127] : memref<8x296x128xf32, #tpu.memory_space<vmem>> -> memref<1x296x128xf32, #tpu.memory_space<vmem>>
    %211 = tpu.memref_squeeze %210 : memref<1x296x128xf32, #tpu.memory_space<vmem>> -> memref<296x128xf32, #tpu.memory_space<vmem>>
    %c293_128 = arith.constant 293 : index
    %c0_129 = arith.constant 0 : index
    %212 = vector.load %211[%c293_128, %c0_129] : memref<296x128xf32, #tpu.memory_space<vmem>>, vector<1x32xf32>
    %213 = vector.broadcast %212 : vector<1x32xf32> to vector<2x32xf32>
    %214 = arith.mulf %209, %213 : vector<2x32xf32>
    %c1_i32_130 = arith.constant 1 : i32
    %c0_i32_131 = arith.constant 0 : i32
    %c0_i32_132 = arith.constant 0 : i32
    %215 = tpu.memref_slice %arg3[%c1_i32_130, %c0_i32_131, %c0_i32_132] : memref<8x296x128xf32, #tpu.memory_space<vmem>> -> memref<1x296x128xf32, #tpu.memory_space<vmem>>
    %216 = tpu.memref_squeeze %215 : memref<1x296x128xf32, #tpu.memory_space<vmem>> -> memref<296x128xf32, #tpu.memory_space<vmem>>
    %c294_133 = arith.constant 294 : index
    %c0_134 = arith.constant 0 : index
    %217 = vector.load %216[%c294_133, %c0_134] : memref<296x128xf32, #tpu.memory_space<vmem>>, vector<1x32xf32>
    %218 = vector.broadcast %217 : vector<1x32xf32> to vector<2x32xf32>
    %219 = arith.addf %214, %218 : vector<2x32xf32>
    %220 = vector.extract_strided_slice %1 {offsets = [0, 1], sizes = [2, 1], strides = [1, 1]} : vector<2x8xf32> to vector<2x1xf32>
    %c1_i32_135 = arith.constant 1 : i32
    %c0_i32_136 = arith.constant 0 : i32
    %c0_i32_137 = arith.constant 0 : i32
    %221 = tpu.memref_slice %arg3[%c1_i32_135, %c0_i32_136, %c0_i32_137] : memref<8x296x128xf32, #tpu.memory_space<vmem>> -> memref<1x296x128xf32, #tpu.memory_space<vmem>>
    %222 = tpu.memref_squeeze %221 : memref<1x296x128xf32, #tpu.memory_space<vmem>> -> memref<296x128xf32, #tpu.memory_space<vmem>>
    %c291_138 = arith.constant 291 : index
    %c0_139 = arith.constant 0 : index
    %223 = vector.load %222[%c291_138, %c0_139] : memref<296x128xf32, #tpu.memory_space<vmem>>, vector<1x128xf32>
    %224 = vector.broadcast %220 : vector<2x1xf32> to vector<2x128xf32>
    %225 = vector.broadcast %223 : vector<1x128xf32> to vector<2x128xf32>
    %226 = arith.mulf %224, %225 : vector<2x128xf32>
    %c1_i32_140 = arith.constant 1 : i32
    %c0_i32_141 = arith.constant 0 : i32
    %c0_i32_142 = arith.constant 0 : i32
    %227 = tpu.memref_slice %arg3[%c1_i32_140, %c0_i32_141, %c0_i32_142] : memref<8x296x128xf32, #tpu.memory_space<vmem>> -> memref<1x296x128xf32, #tpu.memory_space<vmem>>
    %228 = tpu.memref_squeeze %227 : memref<1x296x128xf32, #tpu.memory_space<vmem>> -> memref<296x128xf32, #tpu.memory_space<vmem>>
    %c256_143 = arith.constant 256 : index
    %c0_144 = arith.constant 0 : index
    %229 = vector.load %228[%c256_143, %c0_144] : memref<296x128xf32, #tpu.memory_space<vmem>>, vector<32x128xf32>
    %cst_145 = arith.constant dense<0.000000e+00> : vector<2x128xf32>
    %230 = tpu.matmul %190, %229, %cst_145 {dimension_numbers = #tpu.dot_dimension_numbers<[1], [0], [0], [1], [0, 0, 1, 1], [], []>} : vector<2x32xf32>, vector<32x128xf32>, vector<2x128xf32> -> vector<2x128xf32>
    %231 = arith.addf %226, %230 : vector<2x128xf32>
    %c1_i32_146 = arith.constant 1 : i32
    %c0_i32_147 = arith.constant 0 : i32
    %c0_i32_148 = arith.constant 0 : i32
    %232 = tpu.memref_slice %arg3[%c1_i32_146, %c0_i32_147, %c0_i32_148] : memref<8x296x128xf32, #tpu.memory_space<vmem>> -> memref<1x296x128xf32, #tpu.memory_space<vmem>>
    %233 = tpu.memref_squeeze %232 : memref<1x296x128xf32, #tpu.memory_space<vmem>> -> memref<296x128xf32, #tpu.memory_space<vmem>>
    %c292_149 = arith.constant 292 : index
    %c0_150 = arith.constant 0 : index
    %234 = vector.load %233[%c292_149, %c0_150] : memref<296x128xf32, #tpu.memory_space<vmem>>, vector<1x128xf32>
    %235 = vector.broadcast %234 : vector<1x128xf32> to vector<2x128xf32>
    %236 = arith.addf %231, %235 : vector<2x128xf32>
    %237 = arith.negf %236 : vector<2x128xf32>
    %238 = math.exp %237 : vector<2x128xf32>
    %cst_151 = arith.constant 1.000000e+00 : f32
    %239 = vector.broadcast %cst_151 : f32 to vector<2x128xf32>
    %240 = arith.addf %239, %238 : vector<2x128xf32>
    %241 = arith.divf %239, %240 : vector<2x128xf32>
    %242 = vector.extract_strided_slice %241 {offsets = [0, 0], sizes = [2, 32], strides = [1, 1]} : vector<2x128xf32> to vector<2x32xf32>
    %243 = vector.extract_strided_slice %241 {offsets = [0, 32], sizes = [2, 32], strides = [1, 1]} : vector<2x128xf32> to vector<2x32xf32>
    %244 = vector.extract_strided_slice %241 {offsets = [0, 64], sizes = [2, 32], strides = [1, 1]} : vector<2x128xf32> to vector<2x32xf32>
    %cst_152 = arith.constant 2.000000e+00 : f32
    %245 = vector.broadcast %cst_152 : f32 to vector<2x32xf32>
    %246 = arith.mulf %245, %244 : vector<2x32xf32>
    %cst_153 = arith.constant 1.000000e+00 : f32
    %247 = vector.broadcast %cst_153 : f32 to vector<2x32xf32>
    %248 = arith.subf %246, %247 : vector<2x32xf32>
    %249 = vector.extract_strided_slice %241 {offsets = [0, 96], sizes = [2, 32], strides = [1, 1]} : vector<2x128xf32> to vector<2x32xf32>
    %250 = arith.mulf %243, %219 : vector<2x32xf32>
    %251 = arith.mulf %242, %248 : vector<2x32xf32>
    %252 = arith.addf %250, %251 : vector<2x32xf32>
    %253 = math.tanh %252 : vector<2x32xf32>
    %254 = arith.mulf %249, %253 : vector<2x32xf32>
    %255 = tpu.concatenate %254, %252 in 1 : vector<2x32xf32>, vector<2x32xf32> -> vector<2x64xf32>
    %c2 = arith.constant 2 : index
    %c0_154 = arith.constant 0 : index
    %c0_155 = arith.constant 0 : index
    %256 = vector.load %arg2[%c2, %c0_154, %c0_155] : memref<8x2x64xf32, #tpu.memory_space<vmem>>, vector<1x2x64xf32>
    %257 = vector.shape_cast %256 : vector<1x2x64xf32> to vector<2x64xf32>
    %c2_i32 = arith.constant 2 : i32
    %c0_i32_156 = arith.constant 0 : i32
    %c0_i32_157 = arith.constant 0 : i32
    %258 = tpu.memref_slice %arg3[%c2_i32, %c0_i32_156, %c0_i32_157] : memref<8x296x128xf32, #tpu.memory_space<vmem>> -> memref<1x296x128xf32, #tpu.memory_space<vmem>>
    %259 = tpu.memref_squeeze %258 : memref<1x296x128xf32, #tpu.memory_space<vmem>> -> memref<296x128xf32, #tpu.memory_space<vmem>>
    %c0_158 = arith.constant 0 : index
    %c0_159 = arith.constant 0 : index
    %260 = vector.load %259[%c0_158, %c0_159] : memref<296x128xf32, #tpu.memory_space<vmem>>, vector<64x128xf32>
    %cst_160 = arith.constant dense<0.000000e+00> : vector<2x128xf32>
    %261 = tpu.matmul %255, %260, %cst_160 {dimension_numbers = #tpu.dot_dimension_numbers<[1], [0], [0], [1], [0, 0, 1, 1], [], []>} : vector<2x64xf32>, vector<64x128xf32>, vector<2x128xf32> -> vector<2x128xf32>
    %c2_i32_161 = arith.constant 2 : i32
    %c0_i32_162 = arith.constant 0 : i32
    %c0_i32_163 = arith.constant 0 : i32
    %262 = tpu.memref_slice %arg3[%c2_i32_161, %c0_i32_162, %c0_i32_163] : memref<8x296x128xf32, #tpu.memory_space<vmem>> -> memref<1x296x128xf32, #tpu.memory_space<vmem>>
    %263 = tpu.memref_squeeze %262 : memref<1x296x128xf32, #tpu.memory_space<vmem>> -> memref<296x128xf32, #tpu.memory_space<vmem>>
    %c64_164 = arith.constant 64 : index
    %c0_165 = arith.constant 0 : index
    %264 = vector.load %263[%c64_164, %c0_165] : memref<296x128xf32, #tpu.memory_space<vmem>>, vector<64x128xf32>
    %cst_166 = arith.constant dense<0.000000e+00> : vector<2x128xf32>
    %265 = tpu.matmul %257, %264, %cst_166 {dimension_numbers = #tpu.dot_dimension_numbers<[1], [0], [0], [1], [0, 0, 1, 1], [], []>} : vector<2x64xf32>, vector<64x128xf32>, vector<2x128xf32> -> vector<2x128xf32>
    %266 = arith.addf %261, %265 : vector<2x128xf32>
    %c2_i32_167 = arith.constant 2 : i32
    %c0_i32_168 = arith.constant 0 : i32
    %c0_i32_169 = arith.constant 0 : i32
    %267 = tpu.memref_slice %arg3[%c2_i32_167, %c0_i32_168, %c0_i32_169] : memref<8x296x128xf32, #tpu.memory_space<vmem>> -> memref<1x296x128xf32, #tpu.memory_space<vmem>>
    %268 = tpu.memref_squeeze %267 : memref<1x296x128xf32, #tpu.memory_space<vmem>> -> memref<296x128xf32, #tpu.memory_space<vmem>>
    %c288_170 = arith.constant 288 : index
    %c0_171 = arith.constant 0 : index
    %269 = vector.load %268[%c288_170, %c0_171] : memref<296x128xf32, #tpu.memory_space<vmem>>, vector<1x128xf32>
    %270 = vector.broadcast %269 : vector<1x128xf32> to vector<2x128xf32>
    %271 = arith.addf %266, %270 : vector<2x128xf32>
    %272 = vector.extract_strided_slice %271 {offsets = [0, 0], sizes = [2, 64], strides = [1, 1]} : vector<2x128xf32> to vector<2x64xf32>
    %cst_172 = arith.constant 0.000000e+00 : f32
    %273 = vector.broadcast %cst_172 : f32 to vector<2x64xf32>
    %274 = arith.maximumf %272, %273 : vector<2x64xf32>
    %275 = vector.extract_strided_slice %271 {offsets = [0, 64], sizes = [2, 64], strides = [1, 1]} : vector<2x128xf32> to vector<2x64xf32>
    %c2_i32_173 = arith.constant 2 : i32
    %c0_i32_174 = arith.constant 0 : i32
    %c0_i32_175 = arith.constant 0 : i32
    %276 = tpu.memref_slice %arg3[%c2_i32_173, %c0_i32_174, %c0_i32_175] : memref<8x296x128xf32, #tpu.memory_space<vmem>> -> memref<1x296x128xf32, #tpu.memory_space<vmem>>
    %277 = tpu.memref_squeeze %276 : memref<1x296x128xf32, #tpu.memory_space<vmem>> -> memref<296x128xf32, #tpu.memory_space<vmem>>
    %c128_176 = arith.constant 128 : index
    %c0_177 = arith.constant 0 : index
    %278 = vector.load %277[%c128_176, %c0_177] : memref<296x128xf32, #tpu.memory_space<vmem>>, vector<64x128xf32>
    %cst_178 = arith.constant dense<0.000000e+00> : vector<2x128xf32>
    %279 = tpu.matmul %274, %278, %cst_178 {dimension_numbers = #tpu.dot_dimension_numbers<[1], [0], [0], [1], [0, 0, 1, 1], [], []>} : vector<2x64xf32>, vector<64x128xf32>, vector<2x128xf32> -> vector<2x128xf32>
    %c2_i32_179 = arith.constant 2 : i32
    %c0_i32_180 = arith.constant 0 : i32
    %c0_i32_181 = arith.constant 0 : i32
    %280 = tpu.memref_slice %arg3[%c2_i32_179, %c0_i32_180, %c0_i32_181] : memref<8x296x128xf32, #tpu.memory_space<vmem>> -> memref<1x296x128xf32, #tpu.memory_space<vmem>>
    %281 = tpu.memref_squeeze %280 : memref<1x296x128xf32, #tpu.memory_space<vmem>> -> memref<296x128xf32, #tpu.memory_space<vmem>>
    %c289_182 = arith.constant 289 : index
    %c0_183 = arith.constant 0 : index
    %282 = vector.load %281[%c289_182, %c0_183] : memref<296x128xf32, #tpu.memory_space<vmem>>, vector<1x128xf32>
    %283 = vector.broadcast %282 : vector<1x128xf32> to vector<2x128xf32>
    %284 = arith.addf %279, %283 : vector<2x128xf32>
    %285 = vector.extract_strided_slice %284 {offsets = [0, 0], sizes = [2, 64], strides = [1, 1]} : vector<2x128xf32> to vector<2x64xf32>
    %cst_184 = arith.constant 0.000000e+00 : f32
    %286 = vector.broadcast %cst_184 : f32 to vector<2x64xf32>
    %287 = arith.maximumf %285, %286 : vector<2x64xf32>
    %c2_i32_185 = arith.constant 2 : i32
    %c0_i32_186 = arith.constant 0 : i32
    %c0_i32_187 = arith.constant 0 : i32
    %288 = tpu.memref_slice %arg3[%c2_i32_185, %c0_i32_186, %c0_i32_187] : memref<8x296x128xf32, #tpu.memory_space<vmem>> -> memref<1x296x128xf32, #tpu.memory_space<vmem>>
    %289 = tpu.memref_squeeze %288 : memref<1x296x128xf32, #tpu.memory_space<vmem>> -> memref<296x128xf32, #tpu.memory_space<vmem>>
    %c192_188 = arith.constant 192 : index
    %c0_189 = arith.constant 0 : index
    %290 = vector.load %289[%c192_188, %c0_189] : memref<296x128xf32, #tpu.memory_space<vmem>>, vector<64x128xf32>
    %cst_190 = arith.constant dense<0.000000e+00> : vector<2x128xf32>
    %291 = tpu.matmul %287, %290, %cst_190 {dimension_numbers = #tpu.dot_dimension_numbers<[1], [0], [0], [1], [0, 0, 1, 1], [], []>} : vector<2x64xf32>, vector<64x128xf32>, vector<2x128xf32> -> vector<2x128xf32>
    %c2_i32_191 = arith.constant 2 : i32
    %c0_i32_192 = arith.constant 0 : i32
    %c0_i32_193 = arith.constant 0 : i32
    %292 = tpu.memref_slice %arg3[%c2_i32_191, %c0_i32_192, %c0_i32_193] : memref<8x296x128xf32, #tpu.memory_space<vmem>> -> memref<1x296x128xf32, #tpu.memory_space<vmem>>
    %293 = tpu.memref_squeeze %292 : memref<1x296x128xf32, #tpu.memory_space<vmem>> -> memref<296x128xf32, #tpu.memory_space<vmem>>
    %c290_194 = arith.constant 290 : index
    %c0_195 = arith.constant 0 : index
    %294 = vector.load %293[%c290_194, %c0_195] : memref<296x128xf32, #tpu.memory_space<vmem>>, vector<1x128xf32>
    %295 = vector.broadcast %294 : vector<1x128xf32> to vector<2x128xf32>
    %296 = arith.addf %291, %295 : vector<2x128xf32>
    %297 = vector.extract_strided_slice %296 {offsets = [0, 0], sizes = [2, 64], strides = [1, 1]} : vector<2x128xf32> to vector<2x64xf32>
    %298 = arith.addf %297, %275 : vector<2x64xf32>
    %299 = vector.extract_strided_slice %298 {offsets = [0, 0], sizes = [2, 32], strides = [1, 1]} : vector<2x64xf32> to vector<2x32xf32>
    %cst_196 = arith.constant dense<0.000000e+00> : vector<2xf32>
    %300 = vector.multi_reduction <add>, %299, %cst_196 [1] : vector<2x32xf32> to vector<2xf32>
    %301 = vector.shape_cast %300 : vector<2xf32> to vector<2x1xf32>
    %cst_197 = arith.constant 3.200000e+01 : f32
    %302 = vector.broadcast %cst_197 : f32 to vector<2x1xf32>
    %303 = arith.divf %301, %302 : vector<2x1xf32>
    %304 = arith.mulf %299, %299 : vector<2x32xf32>
    %cst_198 = arith.constant dense<0.000000e+00> : vector<2xf32>
    %305 = vector.multi_reduction <add>, %304, %cst_198 [1] : vector<2x32xf32> to vector<2xf32>
    %306 = vector.shape_cast %305 : vector<2xf32> to vector<2x1xf32>
    %cst_199 = arith.constant 3.200000e+01 : f32
    %307 = vector.broadcast %cst_199 : f32 to vector<2x1xf32>
    %308 = arith.divf %306, %307 : vector<2x1xf32>
    %309 = arith.mulf %303, %303 : vector<2x1xf32>
    %310 = arith.subf %308, %309 : vector<2x1xf32>
    %311 = vector.broadcast %303 : vector<2x1xf32> to vector<2x32xf32>
    %312 = arith.subf %299, %311 : vector<2x32xf32>
    %cst_200 = arith.constant 9.99999974E-6 : f32
    %313 = vector.broadcast %cst_200 : f32 to vector<2x1xf32>
    %314 = arith.addf %310, %313 : vector<2x1xf32>
    %315 = math.rsqrt %314 : vector<2x1xf32>
    %316 = vector.broadcast %315 : vector<2x1xf32> to vector<2x32xf32>
    %317 = arith.mulf %312, %316 : vector<2x32xf32>
    %318 = vector.extract_strided_slice %298 {offsets = [0, 32], sizes = [2, 32], strides = [1, 1]} : vector<2x64xf32> to vector<2x32xf32>
    %cst_201 = arith.constant dense<0.000000e+00> : vector<2xf32>
    %319 = vector.multi_reduction <add>, %318, %cst_201 [1] : vector<2x32xf32> to vector<2xf32>
    %320 = vector.shape_cast %319 : vector<2xf32> to vector<2x1xf32>
    %cst_202 = arith.constant 3.200000e+01 : f32
    %321 = vector.broadcast %cst_202 : f32 to vector<2x1xf32>
    %322 = arith.divf %320, %321 : vector<2x1xf32>
    %323 = arith.mulf %318, %318 : vector<2x32xf32>
    %cst_203 = arith.constant dense<0.000000e+00> : vector<2xf32>
    %324 = vector.multi_reduction <add>, %323, %cst_203 [1] : vector<2x32xf32> to vector<2xf32>
    %325 = vector.shape_cast %324 : vector<2xf32> to vector<2x1xf32>
    %cst_204 = arith.constant 3.200000e+01 : f32
    %326 = vector.broadcast %cst_204 : f32 to vector<2x1xf32>
    %327 = arith.divf %325, %326 : vector<2x1xf32>
    %328 = arith.mulf %322, %322 : vector<2x1xf32>
    %329 = arith.subf %327, %328 : vector<2x1xf32>
    %330 = vector.broadcast %322 : vector<2x1xf32> to vector<2x32xf32>
    %331 = arith.subf %318, %330 : vector<2x32xf32>
    %cst_205 = arith.constant 9.99999974E-6 : f32
    %332 = vector.broadcast %cst_205 : f32 to vector<2x1xf32>
    %333 = arith.addf %329, %332 : vector<2x1xf32>
    %334 = math.rsqrt %333 : vector<2x1xf32>
    %335 = vector.broadcast %334 : vector<2x1xf32> to vector<2x32xf32>
    %336 = arith.mulf %331, %335 : vector<2x32xf32>
    %c2_i32_206 = arith.constant 2 : i32
    %c0_i32_207 = arith.constant 0 : i32
    %c0_i32_208 = arith.constant 0 : i32
    %337 = tpu.memref_slice %arg3[%c2_i32_206, %c0_i32_207, %c0_i32_208] : memref<8x296x128xf32, #tpu.memory_space<vmem>> -> memref<1x296x128xf32, #tpu.memory_space<vmem>>
    %338 = tpu.memref_squeeze %337 : memref<1x296x128xf32, #tpu.memory_space<vmem>> -> memref<296x128xf32, #tpu.memory_space<vmem>>
    %c293_209 = arith.constant 293 : index
    %c0_210 = arith.constant 0 : index
    %339 = vector.load %338[%c293_209, %c0_210] : memref<296x128xf32, #tpu.memory_space<vmem>>, vector<1x32xf32>
    %340 = vector.broadcast %339 : vector<1x32xf32> to vector<2x32xf32>
    %341 = arith.mulf %336, %340 : vector<2x32xf32>
    %c2_i32_211 = arith.constant 2 : i32
    %c0_i32_212 = arith.constant 0 : i32
    %c0_i32_213 = arith.constant 0 : i32
    %342 = tpu.memref_slice %arg3[%c2_i32_211, %c0_i32_212, %c0_i32_213] : memref<8x296x128xf32, #tpu.memory_space<vmem>> -> memref<1x296x128xf32, #tpu.memory_space<vmem>>
    %343 = tpu.memref_squeeze %342 : memref<1x296x128xf32, #tpu.memory_space<vmem>> -> memref<296x128xf32, #tpu.memory_space<vmem>>
    %c294_214 = arith.constant 294 : index
    %c0_215 = arith.constant 0 : index
    %344 = vector.load %343[%c294_214, %c0_215] : memref<296x128xf32, #tpu.memory_space<vmem>>, vector<1x32xf32>
    %345 = vector.broadcast %344 : vector<1x32xf32> to vector<2x32xf32>
    %346 = arith.addf %341, %345 : vector<2x32xf32>
    %347 = vector.extract_strided_slice %1 {offsets = [0, 2], sizes = [2, 1], strides = [1, 1]} : vector<2x8xf32> to vector<2x1xf32>
    %c2_i32_216 = arith.constant 2 : i32
    %c0_i32_217 = arith.constant 0 : i32
    %c0_i32_218 = arith.constant 0 : i32
    %348 = tpu.memref_slice %arg3[%c2_i32_216, %c0_i32_217, %c0_i32_218] : memref<8x296x128xf32, #tpu.memory_space<vmem>> -> memref<1x296x128xf32, #tpu.memory_space<vmem>>
    %349 = tpu.memref_squeeze %348 : memref<1x296x128xf32, #tpu.memory_space<vmem>> -> memref<296x128xf32, #tpu.memory_space<vmem>>
    %c291_219 = arith.constant 291 : index
    %c0_220 = arith.constant 0 : index
    %350 = vector.load %349[%c291_219, %c0_220] : memref<296x128xf32, #tpu.memory_space<vmem>>, vector<1x128xf32>
    %351 = vector.broadcast %347 : vector<2x1xf32> to vector<2x128xf32>
    %352 = vector.broadcast %350 : vector<1x128xf32> to vector<2x128xf32>
    %353 = arith.mulf %351, %352 : vector<2x128xf32>
    %c2_i32_221 = arith.constant 2 : i32
    %c0_i32_222 = arith.constant 0 : i32
    %c0_i32_223 = arith.constant 0 : i32
    %354 = tpu.memref_slice %arg3[%c2_i32_221, %c0_i32_222, %c0_i32_223] : memref<8x296x128xf32, #tpu.memory_space<vmem>> -> memref<1x296x128xf32, #tpu.memory_space<vmem>>
    %355 = tpu.memref_squeeze %354 : memref<1x296x128xf32, #tpu.memory_space<vmem>> -> memref<296x128xf32, #tpu.memory_space<vmem>>
    %c256_224 = arith.constant 256 : index
    %c0_225 = arith.constant 0 : index
    %356 = vector.load %355[%c256_224, %c0_225] : memref<296x128xf32, #tpu.memory_space<vmem>>, vector<32x128xf32>
    %cst_226 = arith.constant dense<0.000000e+00> : vector<2x128xf32>
    %357 = tpu.matmul %317, %356, %cst_226 {dimension_numbers = #tpu.dot_dimension_numbers<[1], [0], [0], [1], [0, 0, 1, 1], [], []>} : vector<2x32xf32>, vector<32x128xf32>, vector<2x128xf32> -> vector<2x128xf32>
    %358 = arith.addf %353, %357 : vector<2x128xf32>
    %c2_i32_227 = arith.constant 2 : i32
    %c0_i32_228 = arith.constant 0 : i32
    %c0_i32_229 = arith.constant 0 : i32
    %359 = tpu.memref_slice %arg3[%c2_i32_227, %c0_i32_228, %c0_i32_229] : memref<8x296x128xf32, #tpu.memory_space<vmem>> -> memref<1x296x128xf32, #tpu.memory_space<vmem>>
    %360 = tpu.memref_squeeze %359 : memref<1x296x128xf32, #tpu.memory_space<vmem>> -> memref<296x128xf32, #tpu.memory_space<vmem>>
    %c292_230 = arith.constant 292 : index
    %c0_231 = arith.constant 0 : index
    %361 = vector.load %360[%c292_230, %c0_231] : memref<296x128xf32, #tpu.memory_space<vmem>>, vector<1x128xf32>
    %362 = vector.broadcast %361 : vector<1x128xf32> to vector<2x128xf32>
    %363 = arith.addf %358, %362 : vector<2x128xf32>
    %364 = arith.negf %363 : vector<2x128xf32>
    %365 = math.exp %364 : vector<2x128xf32>
    %cst_232 = arith.constant 1.000000e+00 : f32
    %366 = vector.broadcast %cst_232 : f32 to vector<2x128xf32>
    %367 = arith.addf %366, %365 : vector<2x128xf32>
    %368 = arith.divf %366, %367 : vector<2x128xf32>
    %369 = vector.extract_strided_slice %368 {offsets = [0, 0], sizes = [2, 32], strides = [1, 1]} : vector<2x128xf32> to vector<2x32xf32>
    %370 = vector.extract_strided_slice %368 {offsets = [0, 32], sizes = [2, 32], strides = [1, 1]} : vector<2x128xf32> to vector<2x32xf32>
    %371 = vector.extract_strided_slice %368 {offsets = [0, 64], sizes = [2, 32], strides = [1, 1]} : vector<2x128xf32> to vector<2x32xf32>
    %cst_233 = arith.constant 2.000000e+00 : f32
    %372 = vector.broadcast %cst_233 : f32 to vector<2x32xf32>
    %373 = arith.mulf %372, %371 : vector<2x32xf32>
    %cst_234 = arith.constant 1.000000e+00 : f32
    %374 = vector.broadcast %cst_234 : f32 to vector<2x32xf32>
    %375 = arith.subf %373, %374 : vector<2x32xf32>
    %376 = vector.extract_strided_slice %368 {offsets = [0, 96], sizes = [2, 32], strides = [1, 1]} : vector<2x128xf32> to vector<2x32xf32>
    %377 = arith.mulf %370, %346 : vector<2x32xf32>
    %378 = arith.mulf %369, %375 : vector<2x32xf32>
    %379 = arith.addf %377, %378 : vector<2x32xf32>
    %380 = math.tanh %379 : vector<2x32xf32>
    %381 = arith.mulf %376, %380 : vector<2x32xf32>
    %382 = tpu.concatenate %381, %379 in 1 : vector<2x32xf32>, vector<2x32xf32> -> vector<2x64xf32>
    %c3 = arith.constant 3 : index
    %c0_235 = arith.constant 0 : index
    %c0_236 = arith.constant 0 : index
    %383 = vector.load %arg2[%c3, %c0_235, %c0_236] : memref<8x2x64xf32, #tpu.memory_space<vmem>>, vector<1x2x64xf32>
    %384 = vector.shape_cast %383 : vector<1x2x64xf32> to vector<2x64xf32>
    %c3_i32 = arith.constant 3 : i32
    %c0_i32_237 = arith.constant 0 : i32
    %c0_i32_238 = arith.constant 0 : i32
    %385 = tpu.memref_slice %arg3[%c3_i32, %c0_i32_237, %c0_i32_238] : memref<8x296x128xf32, #tpu.memory_space<vmem>> -> memref<1x296x128xf32, #tpu.memory_space<vmem>>
    %386 = tpu.memref_squeeze %385 : memref<1x296x128xf32, #tpu.memory_space<vmem>> -> memref<296x128xf32, #tpu.memory_space<vmem>>
    %c0_239 = arith.constant 0 : index
    %c0_240 = arith.constant 0 : index
    %387 = vector.load %386[%c0_239, %c0_240] : memref<296x128xf32, #tpu.memory_space<vmem>>, vector<64x128xf32>
    %cst_241 = arith.constant dense<0.000000e+00> : vector<2x128xf32>
    %388 = tpu.matmul %382, %387, %cst_241 {dimension_numbers = #tpu.dot_dimension_numbers<[1], [0], [0], [1], [0, 0, 1, 1], [], []>} : vector<2x64xf32>, vector<64x128xf32>, vector<2x128xf32> -> vector<2x128xf32>
    %c3_i32_242 = arith.constant 3 : i32
    %c0_i32_243 = arith.constant 0 : i32
    %c0_i32_244 = arith.constant 0 : i32
    %389 = tpu.memref_slice %arg3[%c3_i32_242, %c0_i32_243, %c0_i32_244] : memref<8x296x128xf32, #tpu.memory_space<vmem>> -> memref<1x296x128xf32, #tpu.memory_space<vmem>>
    %390 = tpu.memref_squeeze %389 : memref<1x296x128xf32, #tpu.memory_space<vmem>> -> memref<296x128xf32, #tpu.memory_space<vmem>>
    %c64_245 = arith.constant 64 : index
    %c0_246 = arith.constant 0 : index
    %391 = vector.load %390[%c64_245, %c0_246] : memref<296x128xf32, #tpu.memory_space<vmem>>, vector<64x128xf32>
    %cst_247 = arith.constant dense<0.000000e+00> : vector<2x128xf32>
    %392 = tpu.matmul %384, %391, %cst_247 {dimension_numbers = #tpu.dot_dimension_numbers<[1], [0], [0], [1], [0, 0, 1, 1], [], []>} : vector<2x64xf32>, vector<64x128xf32>, vector<2x128xf32> -> vector<2x128xf32>
    %393 = arith.addf %388, %392 : vector<2x128xf32>
    %c3_i32_248 = arith.constant 3 : i32
    %c0_i32_249 = arith.constant 0 : i32
    %c0_i32_250 = arith.constant 0 : i32
    %394 = tpu.memref_slice %arg3[%c3_i32_248, %c0_i32_249, %c0_i32_250] : memref<8x296x128xf32, #tpu.memory_space<vmem>> -> memref<1x296x128xf32, #tpu.memory_space<vmem>>
    %395 = tpu.memref_squeeze %394 : memref<1x296x128xf32, #tpu.memory_space<vmem>> -> memref<296x128xf32, #tpu.memory_space<vmem>>
    %c288_251 = arith.constant 288 : index
    %c0_252 = arith.constant 0 : index
    %396 = vector.load %395[%c288_251, %c0_252] : memref<296x128xf32, #tpu.memory_space<vmem>>, vector<1x128xf32>
    %397 = vector.broadcast %396 : vector<1x128xf32> to vector<2x128xf32>
    %398 = arith.addf %393, %397 : vector<2x128xf32>
    %399 = vector.extract_strided_slice %398 {offsets = [0, 0], sizes = [2, 64], strides = [1, 1]} : vector<2x128xf32> to vector<2x64xf32>
    %cst_253 = arith.constant 0.000000e+00 : f32
    %400 = vector.broadcast %cst_253 : f32 to vector<2x64xf32>
    %401 = arith.maximumf %399, %400 : vector<2x64xf32>
    %402 = vector.extract_strided_slice %398 {offsets = [0, 64], sizes = [2, 64], strides = [1, 1]} : vector<2x128xf32> to vector<2x64xf32>
    %c3_i32_254 = arith.constant 3 : i32
    %c0_i32_255 = arith.constant 0 : i32
    %c0_i32_256 = arith.constant 0 : i32
    %403 = tpu.memref_slice %arg3[%c3_i32_254, %c0_i32_255, %c0_i32_256] : memref<8x296x128xf32, #tpu.memory_space<vmem>> -> memref<1x296x128xf32, #tpu.memory_space<vmem>>
    %404 = tpu.memref_squeeze %403 : memref<1x296x128xf32, #tpu.memory_space<vmem>> -> memref<296x128xf32, #tpu.memory_space<vmem>>
    %c128_257 = arith.constant 128 : index
    %c0_258 = arith.constant 0 : index
    %405 = vector.load %404[%c128_257, %c0_258] : memref<296x128xf32, #tpu.memory_space<vmem>>, vector<64x128xf32>
    %cst_259 = arith.constant dense<0.000000e+00> : vector<2x128xf32>
    %406 = tpu.matmul %401, %405, %cst_259 {dimension_numbers = #tpu.dot_dimension_numbers<[1], [0], [0], [1], [0, 0, 1, 1], [], []>} : vector<2x64xf32>, vector<64x128xf32>, vector<2x128xf32> -> vector<2x128xf32>
    %c3_i32_260 = arith.constant 3 : i32
    %c0_i32_261 = arith.constant 0 : i32
    %c0_i32_262 = arith.constant 0 : i32
    %407 = tpu.memref_slice %arg3[%c3_i32_260, %c0_i32_261, %c0_i32_262] : memref<8x296x128xf32, #tpu.memory_space<vmem>> -> memref<1x296x128xf32, #tpu.memory_space<vmem>>
    %408 = tpu.memref_squeeze %407 : memref<1x296x128xf32, #tpu.memory_space<vmem>> -> memref<296x128xf32, #tpu.memory_space<vmem>>
    %c289_263 = arith.constant 289 : index
    %c0_264 = arith.constant 0 : index
    %409 = vector.load %408[%c289_263, %c0_264] : memref<296x128xf32, #tpu.memory_space<vmem>>, vector<1x128xf32>
    %410 = vector.broadcast %409 : vector<1x128xf32> to vector<2x128xf32>
    %411 = arith.addf %406, %410 : vector<2x128xf32>
    %412 = vector.extract_strided_slice %411 {offsets = [0, 0], sizes = [2, 64], strides = [1, 1]} : vector<2x128xf32> to vector<2x64xf32>
    %cst_265 = arith.constant 0.000000e+00 : f32
    %413 = vector.broadcast %cst_265 : f32 to vector<2x64xf32>
    %414 = arith.maximumf %412, %413 : vector<2x64xf32>
    %c3_i32_266 = arith.constant 3 : i32
    %c0_i32_267 = arith.constant 0 : i32
    %c0_i32_268 = arith.constant 0 : i32
    %415 = tpu.memref_slice %arg3[%c3_i32_266, %c0_i32_267, %c0_i32_268] : memref<8x296x128xf32, #tpu.memory_space<vmem>> -> memref<1x296x128xf32, #tpu.memory_space<vmem>>
    %416 = tpu.memref_squeeze %415 : memref<1x296x128xf32, #tpu.memory_space<vmem>> -> memref<296x128xf32, #tpu.memory_space<vmem>>
    %c192_269 = arith.constant 192 : index
    %c0_270 = arith.constant 0 : index
    %417 = vector.load %416[%c192_269, %c0_270] : memref<296x128xf32, #tpu.memory_space<vmem>>, vector<64x128xf32>
    %cst_271 = arith.constant dense<0.000000e+00> : vector<2x128xf32>
    %418 = tpu.matmul %414, %417, %cst_271 {dimension_numbers = #tpu.dot_dimension_numbers<[1], [0], [0], [1], [0, 0, 1, 1], [], []>} : vector<2x64xf32>, vector<64x128xf32>, vector<2x128xf32> -> vector<2x128xf32>
    %c3_i32_272 = arith.constant 3 : i32
    %c0_i32_273 = arith.constant 0 : i32
    %c0_i32_274 = arith.constant 0 : i32
    %419 = tpu.memref_slice %arg3[%c3_i32_272, %c0_i32_273, %c0_i32_274] : memref<8x296x128xf32, #tpu.memory_space<vmem>> -> memref<1x296x128xf32, #tpu.memory_space<vmem>>
    %420 = tpu.memref_squeeze %419 : memref<1x296x128xf32, #tpu.memory_space<vmem>> -> memref<296x128xf32, #tpu.memory_space<vmem>>
    %c290_275 = arith.constant 290 : index
    %c0_276 = arith.constant 0 : index
    %421 = vector.load %420[%c290_275, %c0_276] : memref<296x128xf32, #tpu.memory_space<vmem>>, vector<1x128xf32>
    %422 = vector.broadcast %421 : vector<1x128xf32> to vector<2x128xf32>
    %423 = arith.addf %418, %422 : vector<2x128xf32>
    %424 = vector.extract_strided_slice %423 {offsets = [0, 0], sizes = [2, 64], strides = [1, 1]} : vector<2x128xf32> to vector<2x64xf32>
    %425 = arith.addf %424, %402 : vector<2x64xf32>
    %426 = vector.extract_strided_slice %425 {offsets = [0, 0], sizes = [2, 32], strides = [1, 1]} : vector<2x64xf32> to vector<2x32xf32>
    %cst_277 = arith.constant dense<0.000000e+00> : vector<2xf32>
    %427 = vector.multi_reduction <add>, %426, %cst_277 [1] : vector<2x32xf32> to vector<2xf32>
    %428 = vector.shape_cast %427 : vector<2xf32> to vector<2x1xf32>
    %cst_278 = arith.constant 3.200000e+01 : f32
    %429 = vector.broadcast %cst_278 : f32 to vector<2x1xf32>
    %430 = arith.divf %428, %429 : vector<2x1xf32>
    %431 = arith.mulf %426, %426 : vector<2x32xf32>
    %cst_279 = arith.constant dense<0.000000e+00> : vector<2xf32>
    %432 = vector.multi_reduction <add>, %431, %cst_279 [1] : vector<2x32xf32> to vector<2xf32>
    %433 = vector.shape_cast %432 : vector<2xf32> to vector<2x1xf32>
    %cst_280 = arith.constant 3.200000e+01 : f32
    %434 = vector.broadcast %cst_280 : f32 to vector<2x1xf32>
    %435 = arith.divf %433, %434 : vector<2x1xf32>
    %436 = arith.mulf %430, %430 : vector<2x1xf32>
    %437 = arith.subf %435, %436 : vector<2x1xf32>
    %438 = vector.broadcast %430 : vector<2x1xf32> to vector<2x32xf32>
    %439 = arith.subf %426, %438 : vector<2x32xf32>
    %cst_281 = arith.constant 9.99999974E-6 : f32
    %440 = vector.broadcast %cst_281 : f32 to vector<2x1xf32>
    %441 = arith.addf %437, %440 : vector<2x1xf32>
    %442 = math.rsqrt %441 : vector<2x1xf32>
    %443 = vector.broadcast %442 : vector<2x1xf32> to vector<2x32xf32>
    %444 = arith.mulf %439, %443 : vector<2x32xf32>
    %445 = vector.extract_strided_slice %425 {offsets = [0, 32], sizes = [2, 32], strides = [1, 1]} : vector<2x64xf32> to vector<2x32xf32>
    %cst_282 = arith.constant dense<0.000000e+00> : vector<2xf32>
    %446 = vector.multi_reduction <add>, %445, %cst_282 [1] : vector<2x32xf32> to vector<2xf32>
    %447 = vector.shape_cast %446 : vector<2xf32> to vector<2x1xf32>
    %cst_283 = arith.constant 3.200000e+01 : f32
    %448 = vector.broadcast %cst_283 : f32 to vector<2x1xf32>
    %449 = arith.divf %447, %448 : vector<2x1xf32>
    %450 = arith.mulf %445, %445 : vector<2x32xf32>
    %cst_284 = arith.constant dense<0.000000e+00> : vector<2xf32>
    %451 = vector.multi_reduction <add>, %450, %cst_284 [1] : vector<2x32xf32> to vector<2xf32>
    %452 = vector.shape_cast %451 : vector<2xf32> to vector<2x1xf32>
    %cst_285 = arith.constant 3.200000e+01 : f32
    %453 = vector.broadcast %cst_285 : f32 to vector<2x1xf32>
    %454 = arith.divf %452, %453 : vector<2x1xf32>
    %455 = arith.mulf %449, %449 : vector<2x1xf32>
    %456 = arith.subf %454, %455 : vector<2x1xf32>
    %457 = vector.broadcast %449 : vector<2x1xf32> to vector<2x32xf32>
    %458 = arith.subf %445, %457 : vector<2x32xf32>
    %cst_286 = arith.constant 9.99999974E-6 : f32
    %459 = vector.broadcast %cst_286 : f32 to vector<2x1xf32>
    %460 = arith.addf %456, %459 : vector<2x1xf32>
    %461 = math.rsqrt %460 : vector<2x1xf32>
    %462 = vector.broadcast %461 : vector<2x1xf32> to vector<2x32xf32>
    %463 = arith.mulf %458, %462 : vector<2x32xf32>
    %c3_i32_287 = arith.constant 3 : i32
    %c0_i32_288 = arith.constant 0 : i32
    %c0_i32_289 = arith.constant 0 : i32
    %464 = tpu.memref_slice %arg3[%c3_i32_287, %c0_i32_288, %c0_i32_289] : memref<8x296x128xf32, #tpu.memory_space<vmem>> -> memref<1x296x128xf32, #tpu.memory_space<vmem>>
    %465 = tpu.memref_squeeze %464 : memref<1x296x128xf32, #tpu.memory_space<vmem>> -> memref<296x128xf32, #tpu.memory_space<vmem>>
    %c293_290 = arith.constant 293 : index
    %c0_291 = arith.constant 0 : index
    %466 = vector.load %465[%c293_290, %c0_291] : memref<296x128xf32, #tpu.memory_space<vmem>>, vector<1x32xf32>
    %467 = vector.broadcast %466 : vector<1x32xf32> to vector<2x32xf32>
    %468 = arith.mulf %463, %467 : vector<2x32xf32>
    %c3_i32_292 = arith.constant 3 : i32
    %c0_i32_293 = arith.constant 0 : i32
    %c0_i32_294 = arith.constant 0 : i32
    %469 = tpu.memref_slice %arg3[%c3_i32_292, %c0_i32_293, %c0_i32_294] : memref<8x296x128xf32, #tpu.memory_space<vmem>> -> memref<1x296x128xf32, #tpu.memory_space<vmem>>
    %470 = tpu.memref_squeeze %469 : memref<1x296x128xf32, #tpu.memory_space<vmem>> -> memref<296x128xf32, #tpu.memory_space<vmem>>
    %c294_295 = arith.constant 294 : index
    %c0_296 = arith.constant 0 : index
    %471 = vector.load %470[%c294_295, %c0_296] : memref<296x128xf32, #tpu.memory_space<vmem>>, vector<1x32xf32>
    %472 = vector.broadcast %471 : vector<1x32xf32> to vector<2x32xf32>
    %473 = arith.addf %468, %472 : vector<2x32xf32>
    %474 = vector.extract_strided_slice %1 {offsets = [0, 3], sizes = [2, 1], strides = [1, 1]} : vector<2x8xf32> to vector<2x1xf32>
    %c3_i32_297 = arith.constant 3 : i32
    %c0_i32_298 = arith.constant 0 : i32
    %c0_i32_299 = arith.constant 0 : i32
    %475 = tpu.memref_slice %arg3[%c3_i32_297, %c0_i32_298, %c0_i32_299] : memref<8x296x128xf32, #tpu.memory_space<vmem>> -> memref<1x296x128xf32, #tpu.memory_space<vmem>>
    %476 = tpu.memref_squeeze %475 : memref<1x296x128xf32, #tpu.memory_space<vmem>> -> memref<296x128xf32, #tpu.memory_space<vmem>>
    %c291_300 = arith.constant 291 : index
    %c0_301 = arith.constant 0 : index
    %477 = vector.load %476[%c291_300, %c0_301] : memref<296x128xf32, #tpu.memory_space<vmem>>, vector<1x128xf32>
    %478 = vector.broadcast %474 : vector<2x1xf32> to vector<2x128xf32>
    %479 = vector.broadcast %477 : vector<1x128xf32> to vector<2x128xf32>
    %480 = arith.mulf %478, %479 : vector<2x128xf32>
    %c3_i32_302 = arith.constant 3 : i32
    %c0_i32_303 = arith.constant 0 : i32
    %c0_i32_304 = arith.constant 0 : i32
    %481 = tpu.memref_slice %arg3[%c3_i32_302, %c0_i32_303, %c0_i32_304] : memref<8x296x128xf32, #tpu.memory_space<vmem>> -> memref<1x296x128xf32, #tpu.memory_space<vmem>>
    %482 = tpu.memref_squeeze %481 : memref<1x296x128xf32, #tpu.memory_space<vmem>> -> memref<296x128xf32, #tpu.memory_space<vmem>>
    %c256_305 = arith.constant 256 : index
    %c0_306 = arith.constant 0 : index
    %483 = vector.load %482[%c256_305, %c0_306] : memref<296x128xf32, #tpu.memory_space<vmem>>, vector<32x128xf32>
    %cst_307 = arith.constant dense<0.000000e+00> : vector<2x128xf32>
    %484 = tpu.matmul %444, %483, %cst_307 {dimension_numbers = #tpu.dot_dimension_numbers<[1], [0], [0], [1], [0, 0, 1, 1], [], []>} : vector<2x32xf32>, vector<32x128xf32>, vector<2x128xf32> -> vector<2x128xf32>
    %485 = arith.addf %480, %484 : vector<2x128xf32>
    %c3_i32_308 = arith.constant 3 : i32
    %c0_i32_309 = arith.constant 0 : i32
    %c0_i32_310 = arith.constant 0 : i32
    %486 = tpu.memref_slice %arg3[%c3_i32_308, %c0_i32_309, %c0_i32_310] : memref<8x296x128xf32, #tpu.memory_space<vmem>> -> memref<1x296x128xf32, #tpu.memory_space<vmem>>
    %487 = tpu.memref_squeeze %486 : memref<1x296x128xf32, #tpu.memory_space<vmem>> -> memref<296x128xf32, #tpu.memory_space<vmem>>
    %c292_311 = arith.constant 292 : index
    %c0_312 = arith.constant 0 : index
    %488 = vector.load %487[%c292_311, %c0_312] : memref<296x128xf32, #tpu.memory_space<vmem>>, vector<1x128xf32>
    %489 = vector.broadcast %488 : vector<1x128xf32> to vector<2x128xf32>
    %490 = arith.addf %485, %489 : vector<2x128xf32>
    %491 = arith.negf %490 : vector<2x128xf32>
    %492 = math.exp %491 : vector<2x128xf32>
    %cst_313 = arith.constant 1.000000e+00 : f32
    %493 = vector.broadcast %cst_313 : f32 to vector<2x128xf32>
    %494 = arith.addf %493, %492 : vector<2x128xf32>
    %495 = arith.divf %493, %494 : vector<2x128xf32>
    %496 = vector.extract_strided_slice %495 {offsets = [0, 0], sizes = [2, 32], strides = [1, 1]} : vector<2x128xf32> to vector<2x32xf32>
    %497 = vector.extract_strided_slice %495 {offsets = [0, 32], sizes = [2, 32], strides = [1, 1]} : vector<2x128xf32> to vector<2x32xf32>
    %498 = vector.extract_strided_slice %495 {offsets = [0, 64], sizes = [2, 32], strides = [1, 1]} : vector<2x128xf32> to vector<2x32xf32>
    %cst_314 = arith.constant 2.000000e+00 : f32
    %499 = vector.broadcast %cst_314 : f32 to vector<2x32xf32>
    %500 = arith.mulf %499, %498 : vector<2x32xf32>
    %cst_315 = arith.constant 1.000000e+00 : f32
    %501 = vector.broadcast %cst_315 : f32 to vector<2x32xf32>
    %502 = arith.subf %500, %501 : vector<2x32xf32>
    %503 = vector.extract_strided_slice %495 {offsets = [0, 96], sizes = [2, 32], strides = [1, 1]} : vector<2x128xf32> to vector<2x32xf32>
    %504 = arith.mulf %497, %473 : vector<2x32xf32>
    %505 = arith.mulf %496, %502 : vector<2x32xf32>
    %506 = arith.addf %504, %505 : vector<2x32xf32>
    %507 = math.tanh %506 : vector<2x32xf32>
    %508 = arith.mulf %503, %507 : vector<2x32xf32>
    %509 = tpu.concatenate %508, %506 in 1 : vector<2x32xf32>, vector<2x32xf32> -> vector<2x64xf32>
    %c4 = arith.constant 4 : index
    %c0_316 = arith.constant 0 : index
    %c0_317 = arith.constant 0 : index
    %510 = vector.load %arg2[%c4, %c0_316, %c0_317] : memref<8x2x64xf32, #tpu.memory_space<vmem>>, vector<1x2x64xf32>
    %511 = vector.shape_cast %510 : vector<1x2x64xf32> to vector<2x64xf32>
    %c4_i32 = arith.constant 4 : i32
    %c0_i32_318 = arith.constant 0 : i32
    %c0_i32_319 = arith.constant 0 : i32
    %512 = tpu.memref_slice %arg3[%c4_i32, %c0_i32_318, %c0_i32_319] : memref<8x296x128xf32, #tpu.memory_space<vmem>> -> memref<1x296x128xf32, #tpu.memory_space<vmem>>
    %513 = tpu.memref_squeeze %512 : memref<1x296x128xf32, #tpu.memory_space<vmem>> -> memref<296x128xf32, #tpu.memory_space<vmem>>
    %c0_320 = arith.constant 0 : index
    %c0_321 = arith.constant 0 : index
    %514 = vector.load %513[%c0_320, %c0_321] : memref<296x128xf32, #tpu.memory_space<vmem>>, vector<64x128xf32>
    %cst_322 = arith.constant dense<0.000000e+00> : vector<2x128xf32>
    %515 = tpu.matmul %509, %514, %cst_322 {dimension_numbers = #tpu.dot_dimension_numbers<[1], [0], [0], [1], [0, 0, 1, 1], [], []>} : vector<2x64xf32>, vector<64x128xf32>, vector<2x128xf32> -> vector<2x128xf32>
    %c4_i32_323 = arith.constant 4 : i32
    %c0_i32_324 = arith.constant 0 : i32
    %c0_i32_325 = arith.constant 0 : i32
    %516 = tpu.memref_slice %arg3[%c4_i32_323, %c0_i32_324, %c0_i32_325] : memref<8x296x128xf32, #tpu.memory_space<vmem>> -> memref<1x296x128xf32, #tpu.memory_space<vmem>>
    %517 = tpu.memref_squeeze %516 : memref<1x296x128xf32, #tpu.memory_space<vmem>> -> memref<296x128xf32, #tpu.memory_space<vmem>>
    %c64_326 = arith.constant 64 : index
    %c0_327 = arith.constant 0 : index
    %518 = vector.load %517[%c64_326, %c0_327] : memref<296x128xf32, #tpu.memory_space<vmem>>, vector<64x128xf32>
    %cst_328 = arith.constant dense<0.000000e+00> : vector<2x128xf32>
    %519 = tpu.matmul %511, %518, %cst_328 {dimension_numbers = #tpu.dot_dimension_numbers<[1], [0], [0], [1], [0, 0, 1, 1], [], []>} : vector<2x64xf32>, vector<64x128xf32>, vector<2x128xf32> -> vector<2x128xf32>
    %520 = arith.addf %515, %519 : vector<2x128xf32>
    %c4_i32_329 = arith.constant 4 : i32
    %c0_i32_330 = arith.constant 0 : i32
    %c0_i32_331 = arith.constant 0 : i32
    %521 = tpu.memref_slice %arg3[%c4_i32_329, %c0_i32_330, %c0_i32_331] : memref<8x296x128xf32, #tpu.memory_space<vmem>> -> memref<1x296x128xf32, #tpu.memory_space<vmem>>
    %522 = tpu.memref_squeeze %521 : memref<1x296x128xf32, #tpu.memory_space<vmem>> -> memref<296x128xf32, #tpu.memory_space<vmem>>
    %c288_332 = arith.constant 288 : index
    %c0_333 = arith.constant 0 : index
    %523 = vector.load %522[%c288_332, %c0_333] : memref<296x128xf32, #tpu.memory_space<vmem>>, vector<1x128xf32>
    %524 = vector.broadcast %523 : vector<1x128xf32> to vector<2x128xf32>
    %525 = arith.addf %520, %524 : vector<2x128xf32>
    %526 = vector.extract_strided_slice %525 {offsets = [0, 0], sizes = [2, 64], strides = [1, 1]} : vector<2x128xf32> to vector<2x64xf32>
    %cst_334 = arith.constant 0.000000e+00 : f32
    %527 = vector.broadcast %cst_334 : f32 to vector<2x64xf32>
    %528 = arith.maximumf %526, %527 : vector<2x64xf32>
    %529 = vector.extract_strided_slice %525 {offsets = [0, 64], sizes = [2, 64], strides = [1, 1]} : vector<2x128xf32> to vector<2x64xf32>
    %c4_i32_335 = arith.constant 4 : i32
    %c0_i32_336 = arith.constant 0 : i32
    %c0_i32_337 = arith.constant 0 : i32
    %530 = tpu.memref_slice %arg3[%c4_i32_335, %c0_i32_336, %c0_i32_337] : memref<8x296x128xf32, #tpu.memory_space<vmem>> -> memref<1x296x128xf32, #tpu.memory_space<vmem>>
    %531 = tpu.memref_squeeze %530 : memref<1x296x128xf32, #tpu.memory_space<vmem>> -> memref<296x128xf32, #tpu.memory_space<vmem>>
    %c128_338 = arith.constant 128 : index
    %c0_339 = arith.constant 0 : index
    %532 = vector.load %531[%c128_338, %c0_339] : memref<296x128xf32, #tpu.memory_space<vmem>>, vector<64x128xf32>
    %cst_340 = arith.constant dense<0.000000e+00> : vector<2x128xf32>
    %533 = tpu.matmul %528, %532, %cst_340 {dimension_numbers = #tpu.dot_dimension_numbers<[1], [0], [0], [1], [0, 0, 1, 1], [], []>} : vector<2x64xf32>, vector<64x128xf32>, vector<2x128xf32> -> vector<2x128xf32>
    %c4_i32_341 = arith.constant 4 : i32
    %c0_i32_342 = arith.constant 0 : i32
    %c0_i32_343 = arith.constant 0 : i32
    %534 = tpu.memref_slice %arg3[%c4_i32_341, %c0_i32_342, %c0_i32_343] : memref<8x296x128xf32, #tpu.memory_space<vmem>> -> memref<1x296x128xf32, #tpu.memory_space<vmem>>
    %535 = tpu.memref_squeeze %534 : memref<1x296x128xf32, #tpu.memory_space<vmem>> -> memref<296x128xf32, #tpu.memory_space<vmem>>
    %c289_344 = arith.constant 289 : index
    %c0_345 = arith.constant 0 : index
    %536 = vector.load %535[%c289_344, %c0_345] : memref<296x128xf32, #tpu.memory_space<vmem>>, vector<1x128xf32>
    %537 = vector.broadcast %536 : vector<1x128xf32> to vector<2x128xf32>
    %538 = arith.addf %533, %537 : vector<2x128xf32>
    %539 = vector.extract_strided_slice %538 {offsets = [0, 0], sizes = [2, 64], strides = [1, 1]} : vector<2x128xf32> to vector<2x64xf32>
    %cst_346 = arith.constant 0.000000e+00 : f32
    %540 = vector.broadcast %cst_346 : f32 to vector<2x64xf32>
    %541 = arith.maximumf %539, %540 : vector<2x64xf32>
    %c4_i32_347 = arith.constant 4 : i32
    %c0_i32_348 = arith.constant 0 : i32
    %c0_i32_349 = arith.constant 0 : i32
    %542 = tpu.memref_slice %arg3[%c4_i32_347, %c0_i32_348, %c0_i32_349] : memref<8x296x128xf32, #tpu.memory_space<vmem>> -> memref<1x296x128xf32, #tpu.memory_space<vmem>>
    %543 = tpu.memref_squeeze %542 : memref<1x296x128xf32, #tpu.memory_space<vmem>> -> memref<296x128xf32, #tpu.memory_space<vmem>>
    %c192_350 = arith.constant 192 : index
    %c0_351 = arith.constant 0 : index
    %544 = vector.load %543[%c192_350, %c0_351] : memref<296x128xf32, #tpu.memory_space<vmem>>, vector<64x128xf32>
    %cst_352 = arith.constant dense<0.000000e+00> : vector<2x128xf32>
    %545 = tpu.matmul %541, %544, %cst_352 {dimension_numbers = #tpu.dot_dimension_numbers<[1], [0], [0], [1], [0, 0, 1, 1], [], []>} : vector<2x64xf32>, vector<64x128xf32>, vector<2x128xf32> -> vector<2x128xf32>
    %c4_i32_353 = arith.constant 4 : i32
    %c0_i32_354 = arith.constant 0 : i32
    %c0_i32_355 = arith.constant 0 : i32
    %546 = tpu.memref_slice %arg3[%c4_i32_353, %c0_i32_354, %c0_i32_355] : memref<8x296x128xf32, #tpu.memory_space<vmem>> -> memref<1x296x128xf32, #tpu.memory_space<vmem>>
    %547 = tpu.memref_squeeze %546 : memref<1x296x128xf32, #tpu.memory_space<vmem>> -> memref<296x128xf32, #tpu.memory_space<vmem>>
    %c290_356 = arith.constant 290 : index
    %c0_357 = arith.constant 0 : index
    %548 = vector.load %547[%c290_356, %c0_357] : memref<296x128xf32, #tpu.memory_space<vmem>>, vector<1x128xf32>
    %549 = vector.broadcast %548 : vector<1x128xf32> to vector<2x128xf32>
    %550 = arith.addf %545, %549 : vector<2x128xf32>
    %551 = vector.extract_strided_slice %550 {offsets = [0, 0], sizes = [2, 64], strides = [1, 1]} : vector<2x128xf32> to vector<2x64xf32>
    %552 = arith.addf %551, %529 : vector<2x64xf32>
    %553 = vector.extract_strided_slice %552 {offsets = [0, 0], sizes = [2, 32], strides = [1, 1]} : vector<2x64xf32> to vector<2x32xf32>
    %cst_358 = arith.constant dense<0.000000e+00> : vector<2xf32>
    %554 = vector.multi_reduction <add>, %553, %cst_358 [1] : vector<2x32xf32> to vector<2xf32>
    %555 = vector.shape_cast %554 : vector<2xf32> to vector<2x1xf32>
    %cst_359 = arith.constant 3.200000e+01 : f32
    %556 = vector.broadcast %cst_359 : f32 to vector<2x1xf32>
    %557 = arith.divf %555, %556 : vector<2x1xf32>
    %558 = arith.mulf %553, %553 : vector<2x32xf32>
    %cst_360 = arith.constant dense<0.000000e+00> : vector<2xf32>
    %559 = vector.multi_reduction <add>, %558, %cst_360 [1] : vector<2x32xf32> to vector<2xf32>
    %560 = vector.shape_cast %559 : vector<2xf32> to vector<2x1xf32>
    %cst_361 = arith.constant 3.200000e+01 : f32
    %561 = vector.broadcast %cst_361 : f32 to vector<2x1xf32>
    %562 = arith.divf %560, %561 : vector<2x1xf32>
    %563 = arith.mulf %557, %557 : vector<2x1xf32>
    %564 = arith.subf %562, %563 : vector<2x1xf32>
    %565 = vector.broadcast %557 : vector<2x1xf32> to vector<2x32xf32>
    %566 = arith.subf %553, %565 : vector<2x32xf32>
    %cst_362 = arith.constant 9.99999974E-6 : f32
    %567 = vector.broadcast %cst_362 : f32 to vector<2x1xf32>
    %568 = arith.addf %564, %567 : vector<2x1xf32>
    %569 = math.rsqrt %568 : vector<2x1xf32>
    %570 = vector.broadcast %569 : vector<2x1xf32> to vector<2x32xf32>
    %571 = arith.mulf %566, %570 : vector<2x32xf32>
    %572 = vector.extract_strided_slice %552 {offsets = [0, 32], sizes = [2, 32], strides = [1, 1]} : vector<2x64xf32> to vector<2x32xf32>
    %cst_363 = arith.constant dense<0.000000e+00> : vector<2xf32>
    %573 = vector.multi_reduction <add>, %572, %cst_363 [1] : vector<2x32xf32> to vector<2xf32>
    %574 = vector.shape_cast %573 : vector<2xf32> to vector<2x1xf32>
    %cst_364 = arith.constant 3.200000e+01 : f32
    %575 = vector.broadcast %cst_364 : f32 to vector<2x1xf32>
    %576 = arith.divf %574, %575 : vector<2x1xf32>
    %577 = arith.mulf %572, %572 : vector<2x32xf32>
    %cst_365 = arith.constant dense<0.000000e+00> : vector<2xf32>
    %578 = vector.multi_reduction <add>, %577, %cst_365 [1] : vector<2x32xf32> to vector<2xf32>
    %579 = vector.shape_cast %578 : vector<2xf32> to vector<2x1xf32>
    %cst_366 = arith.constant 3.200000e+01 : f32
    %580 = vector.broadcast %cst_366 : f32 to vector<2x1xf32>
    %581 = arith.divf %579, %580 : vector<2x1xf32>
    %582 = arith.mulf %576, %576 : vector<2x1xf32>
    %583 = arith.subf %581, %582 : vector<2x1xf32>
    %584 = vector.broadcast %576 : vector<2x1xf32> to vector<2x32xf32>
    %585 = arith.subf %572, %584 : vector<2x32xf32>
    %cst_367 = arith.constant 9.99999974E-6 : f32
    %586 = vector.broadcast %cst_367 : f32 to vector<2x1xf32>
    %587 = arith.addf %583, %586 : vector<2x1xf32>
    %588 = math.rsqrt %587 : vector<2x1xf32>
    %589 = vector.broadcast %588 : vector<2x1xf32> to vector<2x32xf32>
    %590 = arith.mulf %585, %589 : vector<2x32xf32>
    %c4_i32_368 = arith.constant 4 : i32
    %c0_i32_369 = arith.constant 0 : i32
    %c0_i32_370 = arith.constant 0 : i32
    %591 = tpu.memref_slice %arg3[%c4_i32_368, %c0_i32_369, %c0_i32_370] : memref<8x296x128xf32, #tpu.memory_space<vmem>> -> memref<1x296x128xf32, #tpu.memory_space<vmem>>
    %592 = tpu.memref_squeeze %591 : memref<1x296x128xf32, #tpu.memory_space<vmem>> -> memref<296x128xf32, #tpu.memory_space<vmem>>
    %c293_371 = arith.constant 293 : index
    %c0_372 = arith.constant 0 : index
    %593 = vector.load %592[%c293_371, %c0_372] : memref<296x128xf32, #tpu.memory_space<vmem>>, vector<1x32xf32>
    %594 = vector.broadcast %593 : vector<1x32xf32> to vector<2x32xf32>
    %595 = arith.mulf %590, %594 : vector<2x32xf32>
    %c4_i32_373 = arith.constant 4 : i32
    %c0_i32_374 = arith.constant 0 : i32
    %c0_i32_375 = arith.constant 0 : i32
    %596 = tpu.memref_slice %arg3[%c4_i32_373, %c0_i32_374, %c0_i32_375] : memref<8x296x128xf32, #tpu.memory_space<vmem>> -> memref<1x296x128xf32, #tpu.memory_space<vmem>>
    %597 = tpu.memref_squeeze %596 : memref<1x296x128xf32, #tpu.memory_space<vmem>> -> memref<296x128xf32, #tpu.memory_space<vmem>>
    %c294_376 = arith.constant 294 : index
    %c0_377 = arith.constant 0 : index
    %598 = vector.load %597[%c294_376, %c0_377] : memref<296x128xf32, #tpu.memory_space<vmem>>, vector<1x32xf32>
    %599 = vector.broadcast %598 : vector<1x32xf32> to vector<2x32xf32>
    %600 = arith.addf %595, %599 : vector<2x32xf32>
    %601 = vector.extract_strided_slice %1 {offsets = [0, 4], sizes = [2, 1], strides = [1, 1]} : vector<2x8xf32> to vector<2x1xf32>
    %c4_i32_378 = arith.constant 4 : i32
    %c0_i32_379 = arith.constant 0 : i32
    %c0_i32_380 = arith.constant 0 : i32
    %602 = tpu.memref_slice %arg3[%c4_i32_378, %c0_i32_379, %c0_i32_380] : memref<8x296x128xf32, #tpu.memory_space<vmem>> -> memref<1x296x128xf32, #tpu.memory_space<vmem>>
    %603 = tpu.memref_squeeze %602 : memref<1x296x128xf32, #tpu.memory_space<vmem>> -> memref<296x128xf32, #tpu.memory_space<vmem>>
    %c291_381 = arith.constant 291 : index
    %c0_382 = arith.constant 0 : index
    %604 = vector.load %603[%c291_381, %c0_382] : memref<296x128xf32, #tpu.memory_space<vmem>>, vector<1x128xf32>
    %605 = vector.broadcast %601 : vector<2x1xf32> to vector<2x128xf32>
    %606 = vector.broadcast %604 : vector<1x128xf32> to vector<2x128xf32>
    %607 = arith.mulf %605, %606 : vector<2x128xf32>
    %c4_i32_383 = arith.constant 4 : i32
    %c0_i32_384 = arith.constant 0 : i32
    %c0_i32_385 = arith.constant 0 : i32
    %608 = tpu.memref_slice %arg3[%c4_i32_383, %c0_i32_384, %c0_i32_385] : memref<8x296x128xf32, #tpu.memory_space<vmem>> -> memref<1x296x128xf32, #tpu.memory_space<vmem>>
    %609 = tpu.memref_squeeze %608 : memref<1x296x128xf32, #tpu.memory_space<vmem>> -> memref<296x128xf32, #tpu.memory_space<vmem>>
    %c256_386 = arith.constant 256 : index
    %c0_387 = arith.constant 0 : index
    %610 = vector.load %609[%c256_386, %c0_387] : memref<296x128xf32, #tpu.memory_space<vmem>>, vector<32x128xf32>
    %cst_388 = arith.constant dense<0.000000e+00> : vector<2x128xf32>
    %611 = tpu.matmul %571, %610, %cst_388 {dimension_numbers = #tpu.dot_dimension_numbers<[1], [0], [0], [1], [0, 0, 1, 1], [], []>} : vector<2x32xf32>, vector<32x128xf32>, vector<2x128xf32> -> vector<2x128xf32>
    %612 = arith.addf %607, %611 : vector<2x128xf32>
    %c4_i32_389 = arith.constant 4 : i32
    %c0_i32_390 = arith.constant 0 : i32
    %c0_i32_391 = arith.constant 0 : i32
    %613 = tpu.memref_slice %arg3[%c4_i32_389, %c0_i32_390, %c0_i32_391] : memref<8x296x128xf32, #tpu.memory_space<vmem>> -> memref<1x296x128xf32, #tpu.memory_space<vmem>>
    %614 = tpu.memref_squeeze %613 : memref<1x296x128xf32, #tpu.memory_space<vmem>> -> memref<296x128xf32, #tpu.memory_space<vmem>>
    %c292_392 = arith.constant 292 : index
    %c0_393 = arith.constant 0 : index
    %615 = vector.load %614[%c292_392, %c0_393] : memref<296x128xf32, #tpu.memory_space<vmem>>, vector<1x128xf32>
    %616 = vector.broadcast %615 : vector<1x128xf32> to vector<2x128xf32>
    %617 = arith.addf %612, %616 : vector<2x128xf32>
    %618 = arith.negf %617 : vector<2x128xf32>
    %619 = math.exp %618 : vector<2x128xf32>
    %cst_394 = arith.constant 1.000000e+00 : f32
    %620 = vector.broadcast %cst_394 : f32 to vector<2x128xf32>
    %621 = arith.addf %620, %619 : vector<2x128xf32>
    %622 = arith.divf %620, %621 : vector<2x128xf32>
    %623 = vector.extract_strided_slice %622 {offsets = [0, 0], sizes = [2, 32], strides = [1, 1]} : vector<2x128xf32> to vector<2x32xf32>
    %624 = vector.extract_strided_slice %622 {offsets = [0, 32], sizes = [2, 32], strides = [1, 1]} : vector<2x128xf32> to vector<2x32xf32>
    %625 = vector.extract_strided_slice %622 {offsets = [0, 64], sizes = [2, 32], strides = [1, 1]} : vector<2x128xf32> to vector<2x32xf32>
    %cst_395 = arith.constant 2.000000e+00 : f32
    %626 = vector.broadcast %cst_395 : f32 to vector<2x32xf32>
    %627 = arith.mulf %626, %625 : vector<2x32xf32>
    %cst_396 = arith.constant 1.000000e+00 : f32
    %628 = vector.broadcast %cst_396 : f32 to vector<2x32xf32>
    %629 = arith.subf %627, %628 : vector<2x32xf32>
    %630 = vector.extract_strided_slice %622 {offsets = [0, 96], sizes = [2, 32], strides = [1, 1]} : vector<2x128xf32> to vector<2x32xf32>
    %631 = arith.mulf %624, %600 : vector<2x32xf32>
    %632 = arith.mulf %623, %629 : vector<2x32xf32>
    %633 = arith.addf %631, %632 : vector<2x32xf32>
    %634 = math.tanh %633 : vector<2x32xf32>
    %635 = arith.mulf %630, %634 : vector<2x32xf32>
    %636 = tpu.concatenate %635, %633 in 1 : vector<2x32xf32>, vector<2x32xf32> -> vector<2x64xf32>
    %c5 = arith.constant 5 : index
    %c0_397 = arith.constant 0 : index
    %c0_398 = arith.constant 0 : index
    %637 = vector.load %arg2[%c5, %c0_397, %c0_398] : memref<8x2x64xf32, #tpu.memory_space<vmem>>, vector<1x2x64xf32>
    %638 = vector.shape_cast %637 : vector<1x2x64xf32> to vector<2x64xf32>
    %c5_i32 = arith.constant 5 : i32
    %c0_i32_399 = arith.constant 0 : i32
    %c0_i32_400 = arith.constant 0 : i32
    %639 = tpu.memref_slice %arg3[%c5_i32, %c0_i32_399, %c0_i32_400] : memref<8x296x128xf32, #tpu.memory_space<vmem>> -> memref<1x296x128xf32, #tpu.memory_space<vmem>>
    %640 = tpu.memref_squeeze %639 : memref<1x296x128xf32, #tpu.memory_space<vmem>> -> memref<296x128xf32, #tpu.memory_space<vmem>>
    %c0_401 = arith.constant 0 : index
    %c0_402 = arith.constant 0 : index
    %641 = vector.load %640[%c0_401, %c0_402] : memref<296x128xf32, #tpu.memory_space<vmem>>, vector<64x128xf32>
    %cst_403 = arith.constant dense<0.000000e+00> : vector<2x128xf32>
    %642 = tpu.matmul %636, %641, %cst_403 {dimension_numbers = #tpu.dot_dimension_numbers<[1], [0], [0], [1], [0, 0, 1, 1], [], []>} : vector<2x64xf32>, vector<64x128xf32>, vector<2x128xf32> -> vector<2x128xf32>
    %c5_i32_404 = arith.constant 5 : i32
    %c0_i32_405 = arith.constant 0 : i32
    %c0_i32_406 = arith.constant 0 : i32
    %643 = tpu.memref_slice %arg3[%c5_i32_404, %c0_i32_405, %c0_i32_406] : memref<8x296x128xf32, #tpu.memory_space<vmem>> -> memref<1x296x128xf32, #tpu.memory_space<vmem>>
    %644 = tpu.memref_squeeze %643 : memref<1x296x128xf32, #tpu.memory_space<vmem>> -> memref<296x128xf32, #tpu.memory_space<vmem>>
    %c64_407 = arith.constant 64 : index
    %c0_408 = arith.constant 0 : index
    %645 = vector.load %644[%c64_407, %c0_408] : memref<296x128xf32, #tpu.memory_space<vmem>>, vector<64x128xf32>
    %cst_409 = arith.constant dense<0.000000e+00> : vector<2x128xf32>
    %646 = tpu.matmul %638, %645, %cst_409 {dimension_numbers = #tpu.dot_dimension_numbers<[1], [0], [0], [1], [0, 0, 1, 1], [], []>} : vector<2x64xf32>, vector<64x128xf32>, vector<2x128xf32> -> vector<2x128xf32>
    %647 = arith.addf %642, %646 : vector<2x128xf32>
    %c5_i32_410 = arith.constant 5 : i32
    %c0_i32_411 = arith.constant 0 : i32
    %c0_i32_412 = arith.constant 0 : i32
    %648 = tpu.memref_slice %arg3[%c5_i32_410, %c0_i32_411, %c0_i32_412] : memref<8x296x128xf32, #tpu.memory_space<vmem>> -> memref<1x296x128xf32, #tpu.memory_space<vmem>>
    %649 = tpu.memref_squeeze %648 : memref<1x296x128xf32, #tpu.memory_space<vmem>> -> memref<296x128xf32, #tpu.memory_space<vmem>>
    %c288_413 = arith.constant 288 : index
    %c0_414 = arith.constant 0 : index
    %650 = vector.load %649[%c288_413, %c0_414] : memref<296x128xf32, #tpu.memory_space<vmem>>, vector<1x128xf32>
    %651 = vector.broadcast %650 : vector<1x128xf32> to vector<2x128xf32>
    %652 = arith.addf %647, %651 : vector<2x128xf32>
    %653 = vector.extract_strided_slice %652 {offsets = [0, 0], sizes = [2, 64], strides = [1, 1]} : vector<2x128xf32> to vector<2x64xf32>
    %cst_415 = arith.constant 0.000000e+00 : f32
    %654 = vector.broadcast %cst_415 : f32 to vector<2x64xf32>
    %655 = arith.maximumf %653, %654 : vector<2x64xf32>
    %656 = vector.extract_strided_slice %652 {offsets = [0, 64], sizes = [2, 64], strides = [1, 1]} : vector<2x128xf32> to vector<2x64xf32>
    %c5_i32_416 = arith.constant 5 : i32
    %c0_i32_417 = arith.constant 0 : i32
    %c0_i32_418 = arith.constant 0 : i32
    %657 = tpu.memref_slice %arg3[%c5_i32_416, %c0_i32_417, %c0_i32_418] : memref<8x296x128xf32, #tpu.memory_space<vmem>> -> memref<1x296x128xf32, #tpu.memory_space<vmem>>
    %658 = tpu.memref_squeeze %657 : memref<1x296x128xf32, #tpu.memory_space<vmem>> -> memref<296x128xf32, #tpu.memory_space<vmem>>
    %c128_419 = arith.constant 128 : index
    %c0_420 = arith.constant 0 : index
    %659 = vector.load %658[%c128_419, %c0_420] : memref<296x128xf32, #tpu.memory_space<vmem>>, vector<64x128xf32>
    %cst_421 = arith.constant dense<0.000000e+00> : vector<2x128xf32>
    %660 = tpu.matmul %655, %659, %cst_421 {dimension_numbers = #tpu.dot_dimension_numbers<[1], [0], [0], [1], [0, 0, 1, 1], [], []>} : vector<2x64xf32>, vector<64x128xf32>, vector<2x128xf32> -> vector<2x128xf32>
    %c5_i32_422 = arith.constant 5 : i32
    %c0_i32_423 = arith.constant 0 : i32
    %c0_i32_424 = arith.constant 0 : i32
    %661 = tpu.memref_slice %arg3[%c5_i32_422, %c0_i32_423, %c0_i32_424] : memref<8x296x128xf32, #tpu.memory_space<vmem>> -> memref<1x296x128xf32, #tpu.memory_space<vmem>>
    %662 = tpu.memref_squeeze %661 : memref<1x296x128xf32, #tpu.memory_space<vmem>> -> memref<296x128xf32, #tpu.memory_space<vmem>>
    %c289_425 = arith.constant 289 : index
    %c0_426 = arith.constant 0 : index
    %663 = vector.load %662[%c289_425, %c0_426] : memref<296x128xf32, #tpu.memory_space<vmem>>, vector<1x128xf32>
    %664 = vector.broadcast %663 : vector<1x128xf32> to vector<2x128xf32>
    %665 = arith.addf %660, %664 : vector<2x128xf32>
    %666 = vector.extract_strided_slice %665 {offsets = [0, 0], sizes = [2, 64], strides = [1, 1]} : vector<2x128xf32> to vector<2x64xf32>
    %cst_427 = arith.constant 0.000000e+00 : f32
    %667 = vector.broadcast %cst_427 : f32 to vector<2x64xf32>
    %668 = arith.maximumf %666, %667 : vector<2x64xf32>
    %c5_i32_428 = arith.constant 5 : i32
    %c0_i32_429 = arith.constant 0 : i32
    %c0_i32_430 = arith.constant 0 : i32
    %669 = tpu.memref_slice %arg3[%c5_i32_428, %c0_i32_429, %c0_i32_430] : memref<8x296x128xf32, #tpu.memory_space<vmem>> -> memref<1x296x128xf32, #tpu.memory_space<vmem>>
    %670 = tpu.memref_squeeze %669 : memref<1x296x128xf32, #tpu.memory_space<vmem>> -> memref<296x128xf32, #tpu.memory_space<vmem>>
    %c192_431 = arith.constant 192 : index
    %c0_432 = arith.constant 0 : index
    %671 = vector.load %670[%c192_431, %c0_432] : memref<296x128xf32, #tpu.memory_space<vmem>>, vector<64x128xf32>
    %cst_433 = arith.constant dense<0.000000e+00> : vector<2x128xf32>
    %672 = tpu.matmul %668, %671, %cst_433 {dimension_numbers = #tpu.dot_dimension_numbers<[1], [0], [0], [1], [0, 0, 1, 1], [], []>} : vector<2x64xf32>, vector<64x128xf32>, vector<2x128xf32> -> vector<2x128xf32>
    %c5_i32_434 = arith.constant 5 : i32
    %c0_i32_435 = arith.constant 0 : i32
    %c0_i32_436 = arith.constant 0 : i32
    %673 = tpu.memref_slice %arg3[%c5_i32_434, %c0_i32_435, %c0_i32_436] : memref<8x296x128xf32, #tpu.memory_space<vmem>> -> memref<1x296x128xf32, #tpu.memory_space<vmem>>
    %674 = tpu.memref_squeeze %673 : memref<1x296x128xf32, #tpu.memory_space<vmem>> -> memref<296x128xf32, #tpu.memory_space<vmem>>
    %c290_437 = arith.constant 290 : index
    %c0_438 = arith.constant 0 : index
    %675 = vector.load %674[%c290_437, %c0_438] : memref<296x128xf32, #tpu.memory_space<vmem>>, vector<1x128xf32>
    %676 = vector.broadcast %675 : vector<1x128xf32> to vector<2x128xf32>
    %677 = arith.addf %672, %676 : vector<2x128xf32>
    %678 = vector.extract_strided_slice %677 {offsets = [0, 0], sizes = [2, 64], strides = [1, 1]} : vector<2x128xf32> to vector<2x64xf32>
    %679 = arith.addf %678, %656 : vector<2x64xf32>
    %680 = vector.extract_strided_slice %679 {offsets = [0, 0], sizes = [2, 32], strides = [1, 1]} : vector<2x64xf32> to vector<2x32xf32>
    %cst_439 = arith.constant dense<0.000000e+00> : vector<2xf32>
    %681 = vector.multi_reduction <add>, %680, %cst_439 [1] : vector<2x32xf32> to vector<2xf32>
    %682 = vector.shape_cast %681 : vector<2xf32> to vector<2x1xf32>
    %cst_440 = arith.constant 3.200000e+01 : f32
    %683 = vector.broadcast %cst_440 : f32 to vector<2x1xf32>
    %684 = arith.divf %682, %683 : vector<2x1xf32>
    %685 = arith.mulf %680, %680 : vector<2x32xf32>
    %cst_441 = arith.constant dense<0.000000e+00> : vector<2xf32>
    %686 = vector.multi_reduction <add>, %685, %cst_441 [1] : vector<2x32xf32> to vector<2xf32>
    %687 = vector.shape_cast %686 : vector<2xf32> to vector<2x1xf32>
    %cst_442 = arith.constant 3.200000e+01 : f32
    %688 = vector.broadcast %cst_442 : f32 to vector<2x1xf32>
    %689 = arith.divf %687, %688 : vector<2x1xf32>
    %690 = arith.mulf %684, %684 : vector<2x1xf32>
    %691 = arith.subf %689, %690 : vector<2x1xf32>
    %692 = vector.broadcast %684 : vector<2x1xf32> to vector<2x32xf32>
    %693 = arith.subf %680, %692 : vector<2x32xf32>
    %cst_443 = arith.constant 9.99999974E-6 : f32
    %694 = vector.broadcast %cst_443 : f32 to vector<2x1xf32>
    %695 = arith.addf %691, %694 : vector<2x1xf32>
    %696 = math.rsqrt %695 : vector<2x1xf32>
    %697 = vector.broadcast %696 : vector<2x1xf32> to vector<2x32xf32>
    %698 = arith.mulf %693, %697 : vector<2x32xf32>
    %699 = vector.extract_strided_slice %679 {offsets = [0, 32], sizes = [2, 32], strides = [1, 1]} : vector<2x64xf32> to vector<2x32xf32>
    %cst_444 = arith.constant dense<0.000000e+00> : vector<2xf32>
    %700 = vector.multi_reduction <add>, %699, %cst_444 [1] : vector<2x32xf32> to vector<2xf32>
    %701 = vector.shape_cast %700 : vector<2xf32> to vector<2x1xf32>
    %cst_445 = arith.constant 3.200000e+01 : f32
    %702 = vector.broadcast %cst_445 : f32 to vector<2x1xf32>
    %703 = arith.divf %701, %702 : vector<2x1xf32>
    %704 = arith.mulf %699, %699 : vector<2x32xf32>
    %cst_446 = arith.constant dense<0.000000e+00> : vector<2xf32>
    %705 = vector.multi_reduction <add>, %704, %cst_446 [1] : vector<2x32xf32> to vector<2xf32>
    %706 = vector.shape_cast %705 : vector<2xf32> to vector<2x1xf32>
    %cst_447 = arith.constant 3.200000e+01 : f32
    %707 = vector.broadcast %cst_447 : f32 to vector<2x1xf32>
    %708 = arith.divf %706, %707 : vector<2x1xf32>
    %709 = arith.mulf %703, %703 : vector<2x1xf32>
    %710 = arith.subf %708, %709 : vector<2x1xf32>
    %711 = vector.broadcast %703 : vector<2x1xf32> to vector<2x32xf32>
    %712 = arith.subf %699, %711 : vector<2x32xf32>
    %cst_448 = arith.constant 9.99999974E-6 : f32
    %713 = vector.broadcast %cst_448 : f32 to vector<2x1xf32>
    %714 = arith.addf %710, %713 : vector<2x1xf32>
    %715 = math.rsqrt %714 : vector<2x1xf32>
    %716 = vector.broadcast %715 : vector<2x1xf32> to vector<2x32xf32>
    %717 = arith.mulf %712, %716 : vector<2x32xf32>
    %c5_i32_449 = arith.constant 5 : i32
    %c0_i32_450 = arith.constant 0 : i32
    %c0_i32_451 = arith.constant 0 : i32
    %718 = tpu.memref_slice %arg3[%c5_i32_449, %c0_i32_450, %c0_i32_451] : memref<8x296x128xf32, #tpu.memory_space<vmem>> -> memref<1x296x128xf32, #tpu.memory_space<vmem>>
    %719 = tpu.memref_squeeze %718 : memref<1x296x128xf32, #tpu.memory_space<vmem>> -> memref<296x128xf32, #tpu.memory_space<vmem>>
    %c293_452 = arith.constant 293 : index
    %c0_453 = arith.constant 0 : index
    %720 = vector.load %719[%c293_452, %c0_453] : memref<296x128xf32, #tpu.memory_space<vmem>>, vector<1x32xf32>
    %721 = vector.broadcast %720 : vector<1x32xf32> to vector<2x32xf32>
    %722 = arith.mulf %717, %721 : vector<2x32xf32>
    %c5_i32_454 = arith.constant 5 : i32
    %c0_i32_455 = arith.constant 0 : i32
    %c0_i32_456 = arith.constant 0 : i32
    %723 = tpu.memref_slice %arg3[%c5_i32_454, %c0_i32_455, %c0_i32_456] : memref<8x296x128xf32, #tpu.memory_space<vmem>> -> memref<1x296x128xf32, #tpu.memory_space<vmem>>
    %724 = tpu.memref_squeeze %723 : memref<1x296x128xf32, #tpu.memory_space<vmem>> -> memref<296x128xf32, #tpu.memory_space<vmem>>
    %c294_457 = arith.constant 294 : index
    %c0_458 = arith.constant 0 : index
    %725 = vector.load %724[%c294_457, %c0_458] : memref<296x128xf32, #tpu.memory_space<vmem>>, vector<1x32xf32>
    %726 = vector.broadcast %725 : vector<1x32xf32> to vector<2x32xf32>
    %727 = arith.addf %722, %726 : vector<2x32xf32>
    %728 = vector.extract_strided_slice %1 {offsets = [0, 5], sizes = [2, 1], strides = [1, 1]} : vector<2x8xf32> to vector<2x1xf32>
    %c5_i32_459 = arith.constant 5 : i32
    %c0_i32_460 = arith.constant 0 : i32
    %c0_i32_461 = arith.constant 0 : i32
    %729 = tpu.memref_slice %arg3[%c5_i32_459, %c0_i32_460, %c0_i32_461] : memref<8x296x128xf32, #tpu.memory_space<vmem>> -> memref<1x296x128xf32, #tpu.memory_space<vmem>>
    %730 = tpu.memref_squeeze %729 : memref<1x296x128xf32, #tpu.memory_space<vmem>> -> memref<296x128xf32, #tpu.memory_space<vmem>>
    %c291_462 = arith.constant 291 : index
    %c0_463 = arith.constant 0 : index
    %731 = vector.load %730[%c291_462, %c0_463] : memref<296x128xf32, #tpu.memory_space<vmem>>, vector<1x128xf32>
    %732 = vector.broadcast %728 : vector<2x1xf32> to vector<2x128xf32>
    %733 = vector.broadcast %731 : vector<1x128xf32> to vector<2x128xf32>
    %734 = arith.mulf %732, %733 : vector<2x128xf32>
    %c5_i32_464 = arith.constant 5 : i32
    %c0_i32_465 = arith.constant 0 : i32
    %c0_i32_466 = arith.constant 0 : i32
    %735 = tpu.memref_slice %arg3[%c5_i32_464, %c0_i32_465, %c0_i32_466] : memref<8x296x128xf32, #tpu.memory_space<vmem>> -> memref<1x296x128xf32, #tpu.memory_space<vmem>>
    %736 = tpu.memref_squeeze %735 : memref<1x296x128xf32, #tpu.memory_space<vmem>> -> memref<296x128xf32, #tpu.memory_space<vmem>>
    %c256_467 = arith.constant 256 : index
    %c0_468 = arith.constant 0 : index
    %737 = vector.load %736[%c256_467, %c0_468] : memref<296x128xf32, #tpu.memory_space<vmem>>, vector<32x128xf32>
    %cst_469 = arith.constant dense<0.000000e+00> : vector<2x128xf32>
    %738 = tpu.matmul %698, %737, %cst_469 {dimension_numbers = #tpu.dot_dimension_numbers<[1], [0], [0], [1], [0, 0, 1, 1], [], []>} : vector<2x32xf32>, vector<32x128xf32>, vector<2x128xf32> -> vector<2x128xf32>
    %739 = arith.addf %734, %738 : vector<2x128xf32>
    %c5_i32_470 = arith.constant 5 : i32
    %c0_i32_471 = arith.constant 0 : i32
    %c0_i32_472 = arith.constant 0 : i32
    %740 = tpu.memref_slice %arg3[%c5_i32_470, %c0_i32_471, %c0_i32_472] : memref<8x296x128xf32, #tpu.memory_space<vmem>> -> memref<1x296x128xf32, #tpu.memory_space<vmem>>
    %741 = tpu.memref_squeeze %740 : memref<1x296x128xf32, #tpu.memory_space<vmem>> -> memref<296x128xf32, #tpu.memory_space<vmem>>
    %c292_473 = arith.constant 292 : index
    %c0_474 = arith.constant 0 : index
    %742 = vector.load %741[%c292_473, %c0_474] : memref<296x128xf32, #tpu.memory_space<vmem>>, vector<1x128xf32>
    %743 = vector.broadcast %742 : vector<1x128xf32> to vector<2x128xf32>
    %744 = arith.addf %739, %743 : vector<2x128xf32>
    %745 = arith.negf %744 : vector<2x128xf32>
    %746 = math.exp %745 : vector<2x128xf32>
    %cst_475 = arith.constant 1.000000e+00 : f32
    %747 = vector.broadcast %cst_475 : f32 to vector<2x128xf32>
    %748 = arith.addf %747, %746 : vector<2x128xf32>
    %749 = arith.divf %747, %748 : vector<2x128xf32>
    %750 = vector.extract_strided_slice %749 {offsets = [0, 0], sizes = [2, 32], strides = [1, 1]} : vector<2x128xf32> to vector<2x32xf32>
    %751 = vector.extract_strided_slice %749 {offsets = [0, 32], sizes = [2, 32], strides = [1, 1]} : vector<2x128xf32> to vector<2x32xf32>
    %752 = vector.extract_strided_slice %749 {offsets = [0, 64], sizes = [2, 32], strides = [1, 1]} : vector<2x128xf32> to vector<2x32xf32>
    %cst_476 = arith.constant 2.000000e+00 : f32
    %753 = vector.broadcast %cst_476 : f32 to vector<2x32xf32>
    %754 = arith.mulf %753, %752 : vector<2x32xf32>
    %cst_477 = arith.constant 1.000000e+00 : f32
    %755 = vector.broadcast %cst_477 : f32 to vector<2x32xf32>
    %756 = arith.subf %754, %755 : vector<2x32xf32>
    %757 = vector.extract_strided_slice %749 {offsets = [0, 96], sizes = [2, 32], strides = [1, 1]} : vector<2x128xf32> to vector<2x32xf32>
    %758 = arith.mulf %751, %727 : vector<2x32xf32>
    %759 = arith.mulf %750, %756 : vector<2x32xf32>
    %760 = arith.addf %758, %759 : vector<2x32xf32>
    %761 = math.tanh %760 : vector<2x32xf32>
    %762 = arith.mulf %757, %761 : vector<2x32xf32>
    %763 = tpu.concatenate %762, %760 in 1 : vector<2x32xf32>, vector<2x32xf32> -> vector<2x64xf32>
    %c6 = arith.constant 6 : index
    %c0_478 = arith.constant 0 : index
    %c0_479 = arith.constant 0 : index
    %764 = vector.load %arg2[%c6, %c0_478, %c0_479] : memref<8x2x64xf32, #tpu.memory_space<vmem>>, vector<1x2x64xf32>
    %765 = vector.shape_cast %764 : vector<1x2x64xf32> to vector<2x64xf32>
    %c6_i32 = arith.constant 6 : i32
    %c0_i32_480 = arith.constant 0 : i32
    %c0_i32_481 = arith.constant 0 : i32
    %766 = tpu.memref_slice %arg3[%c6_i32, %c0_i32_480, %c0_i32_481] : memref<8x296x128xf32, #tpu.memory_space<vmem>> -> memref<1x296x128xf32, #tpu.memory_space<vmem>>
    %767 = tpu.memref_squeeze %766 : memref<1x296x128xf32, #tpu.memory_space<vmem>> -> memref<296x128xf32, #tpu.memory_space<vmem>>
    %c0_482 = arith.constant 0 : index
    %c0_483 = arith.constant 0 : index
    %768 = vector.load %767[%c0_482, %c0_483] : memref<296x128xf32, #tpu.memory_space<vmem>>, vector<64x128xf32>
    %cst_484 = arith.constant dense<0.000000e+00> : vector<2x128xf32>
    %769 = tpu.matmul %763, %768, %cst_484 {dimension_numbers = #tpu.dot_dimension_numbers<[1], [0], [0], [1], [0, 0, 1, 1], [], []>} : vector<2x64xf32>, vector<64x128xf32>, vector<2x128xf32> -> vector<2x128xf32>
    %c6_i32_485 = arith.constant 6 : i32
    %c0_i32_486 = arith.constant 0 : i32
    %c0_i32_487 = arith.constant 0 : i32
    %770 = tpu.memref_slice %arg3[%c6_i32_485, %c0_i32_486, %c0_i32_487] : memref<8x296x128xf32, #tpu.memory_space<vmem>> -> memref<1x296x128xf32, #tpu.memory_space<vmem>>
    %771 = tpu.memref_squeeze %770 : memref<1x296x128xf32, #tpu.memory_space<vmem>> -> memref<296x128xf32, #tpu.memory_space<vmem>>
    %c64_488 = arith.constant 64 : index
    %c0_489 = arith.constant 0 : index
    %772 = vector.load %771[%c64_488, %c0_489] : memref<296x128xf32, #tpu.memory_space<vmem>>, vector<64x128xf32>
    %cst_490 = arith.constant dense<0.000000e+00> : vector<2x128xf32>
    %773 = tpu.matmul %765, %772, %cst_490 {dimension_numbers = #tpu.dot_dimension_numbers<[1], [0], [0], [1], [0, 0, 1, 1], [], []>} : vector<2x64xf32>, vector<64x128xf32>, vector<2x128xf32> -> vector<2x128xf32>
    %774 = arith.addf %769, %773 : vector<2x128xf32>
    %c6_i32_491 = arith.constant 6 : i32
    %c0_i32_492 = arith.constant 0 : i32
    %c0_i32_493 = arith.constant 0 : i32
    %775 = tpu.memref_slice %arg3[%c6_i32_491, %c0_i32_492, %c0_i32_493] : memref<8x296x128xf32, #tpu.memory_space<vmem>> -> memref<1x296x128xf32, #tpu.memory_space<vmem>>
    %776 = tpu.memref_squeeze %775 : memref<1x296x128xf32, #tpu.memory_space<vmem>> -> memref<296x128xf32, #tpu.memory_space<vmem>>
    %c288_494 = arith.constant 288 : index
    %c0_495 = arith.constant 0 : index
    %777 = vector.load %776[%c288_494, %c0_495] : memref<296x128xf32, #tpu.memory_space<vmem>>, vector<1x128xf32>
    %778 = vector.broadcast %777 : vector<1x128xf32> to vector<2x128xf32>
    %779 = arith.addf %774, %778 : vector<2x128xf32>
    %780 = vector.extract_strided_slice %779 {offsets = [0, 0], sizes = [2, 64], strides = [1, 1]} : vector<2x128xf32> to vector<2x64xf32>
    %cst_496 = arith.constant 0.000000e+00 : f32
    %781 = vector.broadcast %cst_496 : f32 to vector<2x64xf32>
    %782 = arith.maximumf %780, %781 : vector<2x64xf32>
    %783 = vector.extract_strided_slice %779 {offsets = [0, 64], sizes = [2, 64], strides = [1, 1]} : vector<2x128xf32> to vector<2x64xf32>
    %c6_i32_497 = arith.constant 6 : i32
    %c0_i32_498 = arith.constant 0 : i32
    %c0_i32_499 = arith.constant 0 : i32
    %784 = tpu.memref_slice %arg3[%c6_i32_497, %c0_i32_498, %c0_i32_499] : memref<8x296x128xf32, #tpu.memory_space<vmem>> -> memref<1x296x128xf32, #tpu.memory_space<vmem>>
    %785 = tpu.memref_squeeze %784 : memref<1x296x128xf32, #tpu.memory_space<vmem>> -> memref<296x128xf32, #tpu.memory_space<vmem>>
    %c128_500 = arith.constant 128 : index
    %c0_501 = arith.constant 0 : index
    %786 = vector.load %785[%c128_500, %c0_501] : memref<296x128xf32, #tpu.memory_space<vmem>>, vector<64x128xf32>
    %cst_502 = arith.constant dense<0.000000e+00> : vector<2x128xf32>
    %787 = tpu.matmul %782, %786, %cst_502 {dimension_numbers = #tpu.dot_dimension_numbers<[1], [0], [0], [1], [0, 0, 1, 1], [], []>} : vector<2x64xf32>, vector<64x128xf32>, vector<2x128xf32> -> vector<2x128xf32>
    %c6_i32_503 = arith.constant 6 : i32
    %c0_i32_504 = arith.constant 0 : i32
    %c0_i32_505 = arith.constant 0 : i32
    %788 = tpu.memref_slice %arg3[%c6_i32_503, %c0_i32_504, %c0_i32_505] : memref<8x296x128xf32, #tpu.memory_space<vmem>> -> memref<1x296x128xf32, #tpu.memory_space<vmem>>
    %789 = tpu.memref_squeeze %788 : memref<1x296x128xf32, #tpu.memory_space<vmem>> -> memref<296x128xf32, #tpu.memory_space<vmem>>
    %c289_506 = arith.constant 289 : index
    %c0_507 = arith.constant 0 : index
    %790 = vector.load %789[%c289_506, %c0_507] : memref<296x128xf32, #tpu.memory_space<vmem>>, vector<1x128xf32>
    %791 = vector.broadcast %790 : vector<1x128xf32> to vector<2x128xf32>
    %792 = arith.addf %787, %791 : vector<2x128xf32>
    %793 = vector.extract_strided_slice %792 {offsets = [0, 0], sizes = [2, 64], strides = [1, 1]} : vector<2x128xf32> to vector<2x64xf32>
    %cst_508 = arith.constant 0.000000e+00 : f32
    %794 = vector.broadcast %cst_508 : f32 to vector<2x64xf32>
    %795 = arith.maximumf %793, %794 : vector<2x64xf32>
    %c6_i32_509 = arith.constant 6 : i32
    %c0_i32_510 = arith.constant 0 : i32
    %c0_i32_511 = arith.constant 0 : i32
    %796 = tpu.memref_slice %arg3[%c6_i32_509, %c0_i32_510, %c0_i32_511] : memref<8x296x128xf32, #tpu.memory_space<vmem>> -> memref<1x296x128xf32, #tpu.memory_space<vmem>>
    %797 = tpu.memref_squeeze %796 : memref<1x296x128xf32, #tpu.memory_space<vmem>> -> memref<296x128xf32, #tpu.memory_space<vmem>>
    %c192_512 = arith.constant 192 : index
    %c0_513 = arith.constant 0 : index
    %798 = vector.load %797[%c192_512, %c0_513] : memref<296x128xf32, #tpu.memory_space<vmem>>, vector<64x128xf32>
    %cst_514 = arith.constant dense<0.000000e+00> : vector<2x128xf32>
    %799 = tpu.matmul %795, %798, %cst_514 {dimension_numbers = #tpu.dot_dimension_numbers<[1], [0], [0], [1], [0, 0, 1, 1], [], []>} : vector<2x64xf32>, vector<64x128xf32>, vector<2x128xf32> -> vector<2x128xf32>
    %c6_i32_515 = arith.constant 6 : i32
    %c0_i32_516 = arith.constant 0 : i32
    %c0_i32_517 = arith.constant 0 : i32
    %800 = tpu.memref_slice %arg3[%c6_i32_515, %c0_i32_516, %c0_i32_517] : memref<8x296x128xf32, #tpu.memory_space<vmem>> -> memref<1x296x128xf32, #tpu.memory_space<vmem>>
    %801 = tpu.memref_squeeze %800 : memref<1x296x128xf32, #tpu.memory_space<vmem>> -> memref<296x128xf32, #tpu.memory_space<vmem>>
    %c290_518 = arith.constant 290 : index
    %c0_519 = arith.constant 0 : index
    %802 = vector.load %801[%c290_518, %c0_519] : memref<296x128xf32, #tpu.memory_space<vmem>>, vector<1x128xf32>
    %803 = vector.broadcast %802 : vector<1x128xf32> to vector<2x128xf32>
    %804 = arith.addf %799, %803 : vector<2x128xf32>
    %805 = vector.extract_strided_slice %804 {offsets = [0, 0], sizes = [2, 64], strides = [1, 1]} : vector<2x128xf32> to vector<2x64xf32>
    %806 = arith.addf %805, %783 : vector<2x64xf32>
    %807 = vector.extract_strided_slice %806 {offsets = [0, 0], sizes = [2, 32], strides = [1, 1]} : vector<2x64xf32> to vector<2x32xf32>
    %cst_520 = arith.constant dense<0.000000e+00> : vector<2xf32>
    %808 = vector.multi_reduction <add>, %807, %cst_520 [1] : vector<2x32xf32> to vector<2xf32>
    %809 = vector.shape_cast %808 : vector<2xf32> to vector<2x1xf32>
    %cst_521 = arith.constant 3.200000e+01 : f32
    %810 = vector.broadcast %cst_521 : f32 to vector<2x1xf32>
    %811 = arith.divf %809, %810 : vector<2x1xf32>
    %812 = arith.mulf %807, %807 : vector<2x32xf32>
    %cst_522 = arith.constant dense<0.000000e+00> : vector<2xf32>
    %813 = vector.multi_reduction <add>, %812, %cst_522 [1] : vector<2x32xf32> to vector<2xf32>
    %814 = vector.shape_cast %813 : vector<2xf32> to vector<2x1xf32>
    %cst_523 = arith.constant 3.200000e+01 : f32
    %815 = vector.broadcast %cst_523 : f32 to vector<2x1xf32>
    %816 = arith.divf %814, %815 : vector<2x1xf32>
    %817 = arith.mulf %811, %811 : vector<2x1xf32>
    %818 = arith.subf %816, %817 : vector<2x1xf32>
    %819 = vector.broadcast %811 : vector<2x1xf32> to vector<2x32xf32>
    %820 = arith.subf %807, %819 : vector<2x32xf32>
    %cst_524 = arith.constant 9.99999974E-6 : f32
    %821 = vector.broadcast %cst_524 : f32 to vector<2x1xf32>
    %822 = arith.addf %818, %821 : vector<2x1xf32>
    %823 = math.rsqrt %822 : vector<2x1xf32>
    %824 = vector.broadcast %823 : vector<2x1xf32> to vector<2x32xf32>
    %825 = arith.mulf %820, %824 : vector<2x32xf32>
    %826 = vector.extract_strided_slice %806 {offsets = [0, 32], sizes = [2, 32], strides = [1, 1]} : vector<2x64xf32> to vector<2x32xf32>
    %cst_525 = arith.constant dense<0.000000e+00> : vector<2xf32>
    %827 = vector.multi_reduction <add>, %826, %cst_525 [1] : vector<2x32xf32> to vector<2xf32>
    %828 = vector.shape_cast %827 : vector<2xf32> to vector<2x1xf32>
    %cst_526 = arith.constant 3.200000e+01 : f32
    %829 = vector.broadcast %cst_526 : f32 to vector<2x1xf32>
    %830 = arith.divf %828, %829 : vector<2x1xf32>
    %831 = arith.mulf %826, %826 : vector<2x32xf32>
    %cst_527 = arith.constant dense<0.000000e+00> : vector<2xf32>
    %832 = vector.multi_reduction <add>, %831, %cst_527 [1] : vector<2x32xf32> to vector<2xf32>
    %833 = vector.shape_cast %832 : vector<2xf32> to vector<2x1xf32>
    %cst_528 = arith.constant 3.200000e+01 : f32
    %834 = vector.broadcast %cst_528 : f32 to vector<2x1xf32>
    %835 = arith.divf %833, %834 : vector<2x1xf32>
    %836 = arith.mulf %830, %830 : vector<2x1xf32>
    %837 = arith.subf %835, %836 : vector<2x1xf32>
    %838 = vector.broadcast %830 : vector<2x1xf32> to vector<2x32xf32>
    %839 = arith.subf %826, %838 : vector<2x32xf32>
    %cst_529 = arith.constant 9.99999974E-6 : f32
    %840 = vector.broadcast %cst_529 : f32 to vector<2x1xf32>
    %841 = arith.addf %837, %840 : vector<2x1xf32>
    %842 = math.rsqrt %841 : vector<2x1xf32>
    %843 = vector.broadcast %842 : vector<2x1xf32> to vector<2x32xf32>
    %844 = arith.mulf %839, %843 : vector<2x32xf32>
    %c6_i32_530 = arith.constant 6 : i32
    %c0_i32_531 = arith.constant 0 : i32
    %c0_i32_532 = arith.constant 0 : i32
    %845 = tpu.memref_slice %arg3[%c6_i32_530, %c0_i32_531, %c0_i32_532] : memref<8x296x128xf32, #tpu.memory_space<vmem>> -> memref<1x296x128xf32, #tpu.memory_space<vmem>>
    %846 = tpu.memref_squeeze %845 : memref<1x296x128xf32, #tpu.memory_space<vmem>> -> memref<296x128xf32, #tpu.memory_space<vmem>>
    %c293_533 = arith.constant 293 : index
    %c0_534 = arith.constant 0 : index
    %847 = vector.load %846[%c293_533, %c0_534] : memref<296x128xf32, #tpu.memory_space<vmem>>, vector<1x32xf32>
    %848 = vector.broadcast %847 : vector<1x32xf32> to vector<2x32xf32>
    %849 = arith.mulf %844, %848 : vector<2x32xf32>
    %c6_i32_535 = arith.constant 6 : i32
    %c0_i32_536 = arith.constant 0 : i32
    %c0_i32_537 = arith.constant 0 : i32
    %850 = tpu.memref_slice %arg3[%c6_i32_535, %c0_i32_536, %c0_i32_537] : memref<8x296x128xf32, #tpu.memory_space<vmem>> -> memref<1x296x128xf32, #tpu.memory_space<vmem>>
    %851 = tpu.memref_squeeze %850 : memref<1x296x128xf32, #tpu.memory_space<vmem>> -> memref<296x128xf32, #tpu.memory_space<vmem>>
    %c294_538 = arith.constant 294 : index
    %c0_539 = arith.constant 0 : index
    %852 = vector.load %851[%c294_538, %c0_539] : memref<296x128xf32, #tpu.memory_space<vmem>>, vector<1x32xf32>
    %853 = vector.broadcast %852 : vector<1x32xf32> to vector<2x32xf32>
    %854 = arith.addf %849, %853 : vector<2x32xf32>
    %855 = vector.extract_strided_slice %1 {offsets = [0, 6], sizes = [2, 1], strides = [1, 1]} : vector<2x8xf32> to vector<2x1xf32>
    %c6_i32_540 = arith.constant 6 : i32
    %c0_i32_541 = arith.constant 0 : i32
    %c0_i32_542 = arith.constant 0 : i32
    %856 = tpu.memref_slice %arg3[%c6_i32_540, %c0_i32_541, %c0_i32_542] : memref<8x296x128xf32, #tpu.memory_space<vmem>> -> memref<1x296x128xf32, #tpu.memory_space<vmem>>
    %857 = tpu.memref_squeeze %856 : memref<1x296x128xf32, #tpu.memory_space<vmem>> -> memref<296x128xf32, #tpu.memory_space<vmem>>
    %c291_543 = arith.constant 291 : index
    %c0_544 = arith.constant 0 : index
    %858 = vector.load %857[%c291_543, %c0_544] : memref<296x128xf32, #tpu.memory_space<vmem>>, vector<1x128xf32>
    %859 = vector.broadcast %855 : vector<2x1xf32> to vector<2x128xf32>
    %860 = vector.broadcast %858 : vector<1x128xf32> to vector<2x128xf32>
    %861 = arith.mulf %859, %860 : vector<2x128xf32>
    %c6_i32_545 = arith.constant 6 : i32
    %c0_i32_546 = arith.constant 0 : i32
    %c0_i32_547 = arith.constant 0 : i32
    %862 = tpu.memref_slice %arg3[%c6_i32_545, %c0_i32_546, %c0_i32_547] : memref<8x296x128xf32, #tpu.memory_space<vmem>> -> memref<1x296x128xf32, #tpu.memory_space<vmem>>
    %863 = tpu.memref_squeeze %862 : memref<1x296x128xf32, #tpu.memory_space<vmem>> -> memref<296x128xf32, #tpu.memory_space<vmem>>
    %c256_548 = arith.constant 256 : index
    %c0_549 = arith.constant 0 : index
    %864 = vector.load %863[%c256_548, %c0_549] : memref<296x128xf32, #tpu.memory_space<vmem>>, vector<32x128xf32>
    %cst_550 = arith.constant dense<0.000000e+00> : vector<2x128xf32>
    %865 = tpu.matmul %825, %864, %cst_550 {dimension_numbers = #tpu.dot_dimension_numbers<[1], [0], [0], [1], [0, 0, 1, 1], [], []>} : vector<2x32xf32>, vector<32x128xf32>, vector<2x128xf32> -> vector<2x128xf32>
    %866 = arith.addf %861, %865 : vector<2x128xf32>
    %c6_i32_551 = arith.constant 6 : i32
    %c0_i32_552 = arith.constant 0 : i32
    %c0_i32_553 = arith.constant 0 : i32
    %867 = tpu.memref_slice %arg3[%c6_i32_551, %c0_i32_552, %c0_i32_553] : memref<8x296x128xf32, #tpu.memory_space<vmem>> -> memref<1x296x128xf32, #tpu.memory_space<vmem>>
    %868 = tpu.memref_squeeze %867 : memref<1x296x128xf32, #tpu.memory_space<vmem>> -> memref<296x128xf32, #tpu.memory_space<vmem>>
    %c292_554 = arith.constant 292 : index
    %c0_555 = arith.constant 0 : index
    %869 = vector.load %868[%c292_554, %c0_555] : memref<296x128xf32, #tpu.memory_space<vmem>>, vector<1x128xf32>
    %870 = vector.broadcast %869 : vector<1x128xf32> to vector<2x128xf32>
    %871 = arith.addf %866, %870 : vector<2x128xf32>
    %872 = arith.negf %871 : vector<2x128xf32>
    %873 = math.exp %872 : vector<2x128xf32>
    %cst_556 = arith.constant 1.000000e+00 : f32
    %874 = vector.broadcast %cst_556 : f32 to vector<2x128xf32>
    %875 = arith.addf %874, %873 : vector<2x128xf32>
    %876 = arith.divf %874, %875 : vector<2x128xf32>
    %877 = vector.extract_strided_slice %876 {offsets = [0, 0], sizes = [2, 32], strides = [1, 1]} : vector<2x128xf32> to vector<2x32xf32>
    %878 = vector.extract_strided_slice %876 {offsets = [0, 32], sizes = [2, 32], strides = [1, 1]} : vector<2x128xf32> to vector<2x32xf32>
    %879 = vector.extract_strided_slice %876 {offsets = [0, 64], sizes = [2, 32], strides = [1, 1]} : vector<2x128xf32> to vector<2x32xf32>
    %cst_557 = arith.constant 2.000000e+00 : f32
    %880 = vector.broadcast %cst_557 : f32 to vector<2x32xf32>
    %881 = arith.mulf %880, %879 : vector<2x32xf32>
    %cst_558 = arith.constant 1.000000e+00 : f32
    %882 = vector.broadcast %cst_558 : f32 to vector<2x32xf32>
    %883 = arith.subf %881, %882 : vector<2x32xf32>
    %884 = vector.extract_strided_slice %876 {offsets = [0, 96], sizes = [2, 32], strides = [1, 1]} : vector<2x128xf32> to vector<2x32xf32>
    %885 = arith.mulf %878, %854 : vector<2x32xf32>
    %886 = arith.mulf %877, %883 : vector<2x32xf32>
    %887 = arith.addf %885, %886 : vector<2x32xf32>
    %888 = math.tanh %887 : vector<2x32xf32>
    %889 = arith.mulf %884, %888 : vector<2x32xf32>
    %890 = tpu.concatenate %889, %887 in 1 : vector<2x32xf32>, vector<2x32xf32> -> vector<2x64xf32>
    %c7 = arith.constant 7 : index
    %c0_559 = arith.constant 0 : index
    %c0_560 = arith.constant 0 : index
    %891 = vector.load %arg2[%c7, %c0_559, %c0_560] : memref<8x2x64xf32, #tpu.memory_space<vmem>>, vector<1x2x64xf32>
    %892 = vector.shape_cast %891 : vector<1x2x64xf32> to vector<2x64xf32>
    %c7_i32 = arith.constant 7 : i32
    %c0_i32_561 = arith.constant 0 : i32
    %c0_i32_562 = arith.constant 0 : i32
    %893 = tpu.memref_slice %arg3[%c7_i32, %c0_i32_561, %c0_i32_562] : memref<8x296x128xf32, #tpu.memory_space<vmem>> -> memref<1x296x128xf32, #tpu.memory_space<vmem>>
    %894 = tpu.memref_squeeze %893 : memref<1x296x128xf32, #tpu.memory_space<vmem>> -> memref<296x128xf32, #tpu.memory_space<vmem>>
    %c0_563 = arith.constant 0 : index
    %c0_564 = arith.constant 0 : index
    %895 = vector.load %894[%c0_563, %c0_564] : memref<296x128xf32, #tpu.memory_space<vmem>>, vector<64x128xf32>
    %cst_565 = arith.constant dense<0.000000e+00> : vector<2x128xf32>
    %896 = tpu.matmul %890, %895, %cst_565 {dimension_numbers = #tpu.dot_dimension_numbers<[1], [0], [0], [1], [0, 0, 1, 1], [], []>} : vector<2x64xf32>, vector<64x128xf32>, vector<2x128xf32> -> vector<2x128xf32>
    %c7_i32_566 = arith.constant 7 : i32
    %c0_i32_567 = arith.constant 0 : i32
    %c0_i32_568 = arith.constant 0 : i32
    %897 = tpu.memref_slice %arg3[%c7_i32_566, %c0_i32_567, %c0_i32_568] : memref<8x296x128xf32, #tpu.memory_space<vmem>> -> memref<1x296x128xf32, #tpu.memory_space<vmem>>
    %898 = tpu.memref_squeeze %897 : memref<1x296x128xf32, #tpu.memory_space<vmem>> -> memref<296x128xf32, #tpu.memory_space<vmem>>
    %c64_569 = arith.constant 64 : index
    %c0_570 = arith.constant 0 : index
    %899 = vector.load %898[%c64_569, %c0_570] : memref<296x128xf32, #tpu.memory_space<vmem>>, vector<64x128xf32>
    %cst_571 = arith.constant dense<0.000000e+00> : vector<2x128xf32>
    %900 = tpu.matmul %892, %899, %cst_571 {dimension_numbers = #tpu.dot_dimension_numbers<[1], [0], [0], [1], [0, 0, 1, 1], [], []>} : vector<2x64xf32>, vector<64x128xf32>, vector<2x128xf32> -> vector<2x128xf32>
    %901 = arith.addf %896, %900 : vector<2x128xf32>
    %c7_i32_572 = arith.constant 7 : i32
    %c0_i32_573 = arith.constant 0 : i32
    %c0_i32_574 = arith.constant 0 : i32
    %902 = tpu.memref_slice %arg3[%c7_i32_572, %c0_i32_573, %c0_i32_574] : memref<8x296x128xf32, #tpu.memory_space<vmem>> -> memref<1x296x128xf32, #tpu.memory_space<vmem>>
    %903 = tpu.memref_squeeze %902 : memref<1x296x128xf32, #tpu.memory_space<vmem>> -> memref<296x128xf32, #tpu.memory_space<vmem>>
    %c288_575 = arith.constant 288 : index
    %c0_576 = arith.constant 0 : index
    %904 = vector.load %903[%c288_575, %c0_576] : memref<296x128xf32, #tpu.memory_space<vmem>>, vector<1x128xf32>
    %905 = vector.broadcast %904 : vector<1x128xf32> to vector<2x128xf32>
    %906 = arith.addf %901, %905 : vector<2x128xf32>
    %907 = vector.extract_strided_slice %906 {offsets = [0, 0], sizes = [2, 64], strides = [1, 1]} : vector<2x128xf32> to vector<2x64xf32>
    %cst_577 = arith.constant 0.000000e+00 : f32
    %908 = vector.broadcast %cst_577 : f32 to vector<2x64xf32>
    %909 = arith.maximumf %907, %908 : vector<2x64xf32>
    %910 = vector.extract_strided_slice %906 {offsets = [0, 64], sizes = [2, 64], strides = [1, 1]} : vector<2x128xf32> to vector<2x64xf32>
    %c7_i32_578 = arith.constant 7 : i32
    %c0_i32_579 = arith.constant 0 : i32
    %c0_i32_580 = arith.constant 0 : i32
    %911 = tpu.memref_slice %arg3[%c7_i32_578, %c0_i32_579, %c0_i32_580] : memref<8x296x128xf32, #tpu.memory_space<vmem>> -> memref<1x296x128xf32, #tpu.memory_space<vmem>>
    %912 = tpu.memref_squeeze %911 : memref<1x296x128xf32, #tpu.memory_space<vmem>> -> memref<296x128xf32, #tpu.memory_space<vmem>>
    %c128_581 = arith.constant 128 : index
    %c0_582 = arith.constant 0 : index
    %913 = vector.load %912[%c128_581, %c0_582] : memref<296x128xf32, #tpu.memory_space<vmem>>, vector<64x128xf32>
    %cst_583 = arith.constant dense<0.000000e+00> : vector<2x128xf32>
    %914 = tpu.matmul %909, %913, %cst_583 {dimension_numbers = #tpu.dot_dimension_numbers<[1], [0], [0], [1], [0, 0, 1, 1], [], []>} : vector<2x64xf32>, vector<64x128xf32>, vector<2x128xf32> -> vector<2x128xf32>
    %c7_i32_584 = arith.constant 7 : i32
    %c0_i32_585 = arith.constant 0 : i32
    %c0_i32_586 = arith.constant 0 : i32
    %915 = tpu.memref_slice %arg3[%c7_i32_584, %c0_i32_585, %c0_i32_586] : memref<8x296x128xf32, #tpu.memory_space<vmem>> -> memref<1x296x128xf32, #tpu.memory_space<vmem>>
    %916 = tpu.memref_squeeze %915 : memref<1x296x128xf32, #tpu.memory_space<vmem>> -> memref<296x128xf32, #tpu.memory_space<vmem>>
    %c289_587 = arith.constant 289 : index
    %c0_588 = arith.constant 0 : index
    %917 = vector.load %916[%c289_587, %c0_588] : memref<296x128xf32, #tpu.memory_space<vmem>>, vector<1x128xf32>
    %918 = vector.broadcast %917 : vector<1x128xf32> to vector<2x128xf32>
    %919 = arith.addf %914, %918 : vector<2x128xf32>
    %920 = vector.extract_strided_slice %919 {offsets = [0, 0], sizes = [2, 64], strides = [1, 1]} : vector<2x128xf32> to vector<2x64xf32>
    %cst_589 = arith.constant 0.000000e+00 : f32
    %921 = vector.broadcast %cst_589 : f32 to vector<2x64xf32>
    %922 = arith.maximumf %920, %921 : vector<2x64xf32>
    %c7_i32_590 = arith.constant 7 : i32
    %c0_i32_591 = arith.constant 0 : i32
    %c0_i32_592 = arith.constant 0 : i32
    %923 = tpu.memref_slice %arg3[%c7_i32_590, %c0_i32_591, %c0_i32_592] : memref<8x296x128xf32, #tpu.memory_space<vmem>> -> memref<1x296x128xf32, #tpu.memory_space<vmem>>
    %924 = tpu.memref_squeeze %923 : memref<1x296x128xf32, #tpu.memory_space<vmem>> -> memref<296x128xf32, #tpu.memory_space<vmem>>
    %c192_593 = arith.constant 192 : index
    %c0_594 = arith.constant 0 : index
    %925 = vector.load %924[%c192_593, %c0_594] : memref<296x128xf32, #tpu.memory_space<vmem>>, vector<64x128xf32>
    %cst_595 = arith.constant dense<0.000000e+00> : vector<2x128xf32>
    %926 = tpu.matmul %922, %925, %cst_595 {dimension_numbers = #tpu.dot_dimension_numbers<[1], [0], [0], [1], [0, 0, 1, 1], [], []>} : vector<2x64xf32>, vector<64x128xf32>, vector<2x128xf32> -> vector<2x128xf32>
    %c7_i32_596 = arith.constant 7 : i32
    %c0_i32_597 = arith.constant 0 : i32
    %c0_i32_598 = arith.constant 0 : i32
    %927 = tpu.memref_slice %arg3[%c7_i32_596, %c0_i32_597, %c0_i32_598] : memref<8x296x128xf32, #tpu.memory_space<vmem>> -> memref<1x296x128xf32, #tpu.memory_space<vmem>>
    %928 = tpu.memref_squeeze %927 : memref<1x296x128xf32, #tpu.memory_space<vmem>> -> memref<296x128xf32, #tpu.memory_space<vmem>>
    %c290_599 = arith.constant 290 : index
    %c0_600 = arith.constant 0 : index
    %929 = vector.load %928[%c290_599, %c0_600] : memref<296x128xf32, #tpu.memory_space<vmem>>, vector<1x128xf32>
    %930 = vector.broadcast %929 : vector<1x128xf32> to vector<2x128xf32>
    %931 = arith.addf %926, %930 : vector<2x128xf32>
    %932 = vector.extract_strided_slice %931 {offsets = [0, 0], sizes = [2, 64], strides = [1, 1]} : vector<2x128xf32> to vector<2x64xf32>
    %933 = arith.addf %932, %910 : vector<2x64xf32>
    %934 = vector.extract_strided_slice %933 {offsets = [0, 0], sizes = [2, 32], strides = [1, 1]} : vector<2x64xf32> to vector<2x32xf32>
    %cst_601 = arith.constant dense<0.000000e+00> : vector<2xf32>
    %935 = vector.multi_reduction <add>, %934, %cst_601 [1] : vector<2x32xf32> to vector<2xf32>
    %936 = vector.shape_cast %935 : vector<2xf32> to vector<2x1xf32>
    %cst_602 = arith.constant 3.200000e+01 : f32
    %937 = vector.broadcast %cst_602 : f32 to vector<2x1xf32>
    %938 = arith.divf %936, %937 : vector<2x1xf32>
    %939 = arith.mulf %934, %934 : vector<2x32xf32>
    %cst_603 = arith.constant dense<0.000000e+00> : vector<2xf32>
    %940 = vector.multi_reduction <add>, %939, %cst_603 [1] : vector<2x32xf32> to vector<2xf32>
    %941 = vector.shape_cast %940 : vector<2xf32> to vector<2x1xf32>
    %cst_604 = arith.constant 3.200000e+01 : f32
    %942 = vector.broadcast %cst_604 : f32 to vector<2x1xf32>
    %943 = arith.divf %941, %942 : vector<2x1xf32>
    %944 = arith.mulf %938, %938 : vector<2x1xf32>
    %945 = arith.subf %943, %944 : vector<2x1xf32>
    %946 = vector.broadcast %938 : vector<2x1xf32> to vector<2x32xf32>
    %947 = arith.subf %934, %946 : vector<2x32xf32>
    %cst_605 = arith.constant 9.99999974E-6 : f32
    %948 = vector.broadcast %cst_605 : f32 to vector<2x1xf32>
    %949 = arith.addf %945, %948 : vector<2x1xf32>
    %950 = math.rsqrt %949 : vector<2x1xf32>
    %951 = vector.broadcast %950 : vector<2x1xf32> to vector<2x32xf32>
    %952 = arith.mulf %947, %951 : vector<2x32xf32>
    %953 = vector.extract_strided_slice %933 {offsets = [0, 32], sizes = [2, 32], strides = [1, 1]} : vector<2x64xf32> to vector<2x32xf32>
    %cst_606 = arith.constant dense<0.000000e+00> : vector<2xf32>
    %954 = vector.multi_reduction <add>, %953, %cst_606 [1] : vector<2x32xf32> to vector<2xf32>
    %955 = vector.shape_cast %954 : vector<2xf32> to vector<2x1xf32>
    %cst_607 = arith.constant 3.200000e+01 : f32
    %956 = vector.broadcast %cst_607 : f32 to vector<2x1xf32>
    %957 = arith.divf %955, %956 : vector<2x1xf32>
    %958 = arith.mulf %953, %953 : vector<2x32xf32>
    %cst_608 = arith.constant dense<0.000000e+00> : vector<2xf32>
    %959 = vector.multi_reduction <add>, %958, %cst_608 [1] : vector<2x32xf32> to vector<2xf32>
    %960 = vector.shape_cast %959 : vector<2xf32> to vector<2x1xf32>
    %cst_609 = arith.constant 3.200000e+01 : f32
    %961 = vector.broadcast %cst_609 : f32 to vector<2x1xf32>
    %962 = arith.divf %960, %961 : vector<2x1xf32>
    %963 = arith.mulf %957, %957 : vector<2x1xf32>
    %964 = arith.subf %962, %963 : vector<2x1xf32>
    %965 = vector.broadcast %957 : vector<2x1xf32> to vector<2x32xf32>
    %966 = arith.subf %953, %965 : vector<2x32xf32>
    %cst_610 = arith.constant 9.99999974E-6 : f32
    %967 = vector.broadcast %cst_610 : f32 to vector<2x1xf32>
    %968 = arith.addf %964, %967 : vector<2x1xf32>
    %969 = math.rsqrt %968 : vector<2x1xf32>
    %970 = vector.broadcast %969 : vector<2x1xf32> to vector<2x32xf32>
    %971 = arith.mulf %966, %970 : vector<2x32xf32>
    %c7_i32_611 = arith.constant 7 : i32
    %c0_i32_612 = arith.constant 0 : i32
    %c0_i32_613 = arith.constant 0 : i32
    %972 = tpu.memref_slice %arg3[%c7_i32_611, %c0_i32_612, %c0_i32_613] : memref<8x296x128xf32, #tpu.memory_space<vmem>> -> memref<1x296x128xf32, #tpu.memory_space<vmem>>
    %973 = tpu.memref_squeeze %972 : memref<1x296x128xf32, #tpu.memory_space<vmem>> -> memref<296x128xf32, #tpu.memory_space<vmem>>
    %c293_614 = arith.constant 293 : index
    %c0_615 = arith.constant 0 : index
    %974 = vector.load %973[%c293_614, %c0_615] : memref<296x128xf32, #tpu.memory_space<vmem>>, vector<1x32xf32>
    %975 = vector.broadcast %974 : vector<1x32xf32> to vector<2x32xf32>
    %976 = arith.mulf %971, %975 : vector<2x32xf32>
    %c7_i32_616 = arith.constant 7 : i32
    %c0_i32_617 = arith.constant 0 : i32
    %c0_i32_618 = arith.constant 0 : i32
    %977 = tpu.memref_slice %arg3[%c7_i32_616, %c0_i32_617, %c0_i32_618] : memref<8x296x128xf32, #tpu.memory_space<vmem>> -> memref<1x296x128xf32, #tpu.memory_space<vmem>>
    %978 = tpu.memref_squeeze %977 : memref<1x296x128xf32, #tpu.memory_space<vmem>> -> memref<296x128xf32, #tpu.memory_space<vmem>>
    %c294_619 = arith.constant 294 : index
    %c0_620 = arith.constant 0 : index
    %979 = vector.load %978[%c294_619, %c0_620] : memref<296x128xf32, #tpu.memory_space<vmem>>, vector<1x32xf32>
    %980 = vector.broadcast %979 : vector<1x32xf32> to vector<2x32xf32>
    %981 = arith.addf %976, %980 : vector<2x32xf32>
    %982 = vector.extract_strided_slice %1 {offsets = [0, 7], sizes = [2, 1], strides = [1, 1]} : vector<2x8xf32> to vector<2x1xf32>
    %c7_i32_621 = arith.constant 7 : i32
    %c0_i32_622 = arith.constant 0 : i32
    %c0_i32_623 = arith.constant 0 : i32
    %983 = tpu.memref_slice %arg3[%c7_i32_621, %c0_i32_622, %c0_i32_623] : memref<8x296x128xf32, #tpu.memory_space<vmem>> -> memref<1x296x128xf32, #tpu.memory_space<vmem>>
    %984 = tpu.memref_squeeze %983 : memref<1x296x128xf32, #tpu.memory_space<vmem>> -> memref<296x128xf32, #tpu.memory_space<vmem>>
    %c291_624 = arith.constant 291 : index
    %c0_625 = arith.constant 0 : index
    %985 = vector.load %984[%c291_624, %c0_625] : memref<296x128xf32, #tpu.memory_space<vmem>>, vector<1x128xf32>
    %986 = vector.broadcast %982 : vector<2x1xf32> to vector<2x128xf32>
    %987 = vector.broadcast %985 : vector<1x128xf32> to vector<2x128xf32>
    %988 = arith.mulf %986, %987 : vector<2x128xf32>
    %c7_i32_626 = arith.constant 7 : i32
    %c0_i32_627 = arith.constant 0 : i32
    %c0_i32_628 = arith.constant 0 : i32
    %989 = tpu.memref_slice %arg3[%c7_i32_626, %c0_i32_627, %c0_i32_628] : memref<8x296x128xf32, #tpu.memory_space<vmem>> -> memref<1x296x128xf32, #tpu.memory_space<vmem>>
    %990 = tpu.memref_squeeze %989 : memref<1x296x128xf32, #tpu.memory_space<vmem>> -> memref<296x128xf32, #tpu.memory_space<vmem>>
    %c256_629 = arith.constant 256 : index
    %c0_630 = arith.constant 0 : index
    %991 = vector.load %990[%c256_629, %c0_630] : memref<296x128xf32, #tpu.memory_space<vmem>>, vector<32x128xf32>
    %cst_631 = arith.constant dense<0.000000e+00> : vector<2x128xf32>
    %992 = tpu.matmul %952, %991, %cst_631 {dimension_numbers = #tpu.dot_dimension_numbers<[1], [0], [0], [1], [0, 0, 1, 1], [], []>} : vector<2x32xf32>, vector<32x128xf32>, vector<2x128xf32> -> vector<2x128xf32>
    %993 = arith.addf %988, %992 : vector<2x128xf32>
    %c7_i32_632 = arith.constant 7 : i32
    %c0_i32_633 = arith.constant 0 : i32
    %c0_i32_634 = arith.constant 0 : i32
    %994 = tpu.memref_slice %arg3[%c7_i32_632, %c0_i32_633, %c0_i32_634] : memref<8x296x128xf32, #tpu.memory_space<vmem>> -> memref<1x296x128xf32, #tpu.memory_space<vmem>>
    %995 = tpu.memref_squeeze %994 : memref<1x296x128xf32, #tpu.memory_space<vmem>> -> memref<296x128xf32, #tpu.memory_space<vmem>>
    %c292_635 = arith.constant 292 : index
    %c0_636 = arith.constant 0 : index
    %996 = vector.load %995[%c292_635, %c0_636] : memref<296x128xf32, #tpu.memory_space<vmem>>, vector<1x128xf32>
    %997 = vector.broadcast %996 : vector<1x128xf32> to vector<2x128xf32>
    %998 = arith.addf %993, %997 : vector<2x128xf32>
    %999 = arith.negf %998 : vector<2x128xf32>
    %1000 = math.exp %999 : vector<2x128xf32>
    %cst_637 = arith.constant 1.000000e+00 : f32
    %1001 = vector.broadcast %cst_637 : f32 to vector<2x128xf32>
    %1002 = arith.addf %1001, %1000 : vector<2x128xf32>
    %1003 = arith.divf %1001, %1002 : vector<2x128xf32>
    %1004 = vector.extract_strided_slice %1003 {offsets = [0, 0], sizes = [2, 32], strides = [1, 1]} : vector<2x128xf32> to vector<2x32xf32>
    %1005 = vector.extract_strided_slice %1003 {offsets = [0, 32], sizes = [2, 32], strides = [1, 1]} : vector<2x128xf32> to vector<2x32xf32>
    %1006 = vector.extract_strided_slice %1003 {offsets = [0, 64], sizes = [2, 32], strides = [1, 1]} : vector<2x128xf32> to vector<2x32xf32>
    %cst_638 = arith.constant 2.000000e+00 : f32
    %1007 = vector.broadcast %cst_638 : f32 to vector<2x32xf32>
    %1008 = arith.mulf %1007, %1006 : vector<2x32xf32>
    %cst_639 = arith.constant 1.000000e+00 : f32
    %1009 = vector.broadcast %cst_639 : f32 to vector<2x32xf32>
    %1010 = arith.subf %1008, %1009 : vector<2x32xf32>
    %1011 = vector.extract_strided_slice %1003 {offsets = [0, 96], sizes = [2, 32], strides = [1, 1]} : vector<2x128xf32> to vector<2x32xf32>
    %1012 = arith.mulf %1005, %981 : vector<2x32xf32>
    %1013 = arith.mulf %1004, %1010 : vector<2x32xf32>
    %1014 = arith.addf %1012, %1013 : vector<2x32xf32>
    %1015 = math.tanh %1014 : vector<2x32xf32>
    %1016 = arith.mulf %1011, %1015 : vector<2x32xf32>
    %1017 = tpu.concatenate %1016, %1014 in 1 : vector<2x32xf32>, vector<2x32xf32> -> vector<2x64xf32>
    %c0_640 = arith.constant 0 : index
    %c0_641 = arith.constant 0 : index
    %1018 = vector.load %arg4[%c0_640, %c0_641] : memref<168x128xf32, #tpu.memory_space<vmem>>, vector<64x128xf32>
    %cst_642 = arith.constant dense<0.000000e+00> : vector<2x128xf32>
    %1019 = tpu.matmul %1017, %1018, %cst_642 {dimension_numbers = #tpu.dot_dimension_numbers<[1], [0], [0], [1], [0, 0, 1, 1], [], []>} : vector<2x64xf32>, vector<64x128xf32>, vector<2x128xf32> -> vector<2x128xf32>
    %c160 = arith.constant 160 : index
    %c0_643 = arith.constant 0 : index
    %1020 = vector.load %arg4[%c160, %c0_643] : memref<168x128xf32, #tpu.memory_space<vmem>>, vector<1x128xf32>
    %1021 = vector.broadcast %1020 : vector<1x128xf32> to vector<2x128xf32>
    %1022 = arith.addf %1019, %1021 : vector<2x128xf32>
    %1023 = vector.extract_strided_slice %1022 {offsets = [0, 0], sizes = [2, 32], strides = [1, 1]} : vector<2x128xf32> to vector<2x32xf32>
    %cst_644 = arith.constant 0.000000e+00 : f32
    %1024 = vector.broadcast %cst_644 : f32 to vector<2x32xf32>
    %1025 = arith.maximumf %1023, %1024 : vector<2x32xf32>
    %1026 = vector.extract_strided_slice %1022 {offsets = [0, 32], sizes = [2, 32], strides = [1, 1]} : vector<2x128xf32> to vector<2x32xf32>
    %c64_645 = arith.constant 64 : index
    %c0_646 = arith.constant 0 : index
    %1027 = vector.load %arg4[%c64_645, %c0_646] : memref<168x128xf32, #tpu.memory_space<vmem>>, vector<32x128xf32>
    %cst_647 = arith.constant dense<0.000000e+00> : vector<2x128xf32>
    %1028 = tpu.matmul %1025, %1027, %cst_647 {dimension_numbers = #tpu.dot_dimension_numbers<[1], [0], [0], [1], [0, 0, 1, 1], [], []>} : vector<2x32xf32>, vector<32x128xf32>, vector<2x128xf32> -> vector<2x128xf32>
    %c161 = arith.constant 161 : index
    %c0_648 = arith.constant 0 : index
    %1029 = vector.load %arg4[%c161, %c0_648] : memref<168x128xf32, #tpu.memory_space<vmem>>, vector<1x128xf32>
    %1030 = vector.broadcast %1029 : vector<1x128xf32> to vector<2x128xf32>
    %1031 = arith.addf %1028, %1030 : vector<2x128xf32>
    %1032 = vector.extract_strided_slice %1031 {offsets = [0, 0], sizes = [2, 32], strides = [1, 1]} : vector<2x128xf32> to vector<2x32xf32>
    %cst_649 = arith.constant 0.000000e+00 : f32
    %1033 = vector.broadcast %cst_649 : f32 to vector<2x32xf32>
    %1034 = arith.maximumf %1032, %1033 : vector<2x32xf32>
    %c96 = arith.constant 96 : index
    %c0_650 = arith.constant 0 : index
    %1035 = vector.load %arg4[%c96, %c0_650] : memref<168x128xf32, #tpu.memory_space<vmem>>, vector<32x128xf32>
    %cst_651 = arith.constant dense<0.000000e+00> : vector<2x128xf32>
    %1036 = tpu.matmul %1034, %1035, %cst_651 {dimension_numbers = #tpu.dot_dimension_numbers<[1], [0], [0], [1], [0, 0, 1, 1], [], []>} : vector<2x32xf32>, vector<32x128xf32>, vector<2x128xf32> -> vector<2x128xf32>
    %c162 = arith.constant 162 : index
    %c0_652 = arith.constant 0 : index
    %1037 = vector.load %arg4[%c162, %c0_652] : memref<168x128xf32, #tpu.memory_space<vmem>>, vector<1x128xf32>
    %1038 = vector.broadcast %1037 : vector<1x128xf32> to vector<2x128xf32>
    %1039 = arith.addf %1036, %1038 : vector<2x128xf32>
    %1040 = vector.extract_strided_slice %1039 {offsets = [0, 0], sizes = [2, 32], strides = [1, 1]} : vector<2x128xf32> to vector<2x32xf32>
    %1041 = arith.addf %1040, %1026 : vector<2x32xf32>
    %cst_653 = arith.constant dense<0.000000e+00> : vector<2xf32>
    %1042 = vector.multi_reduction <add>, %1041, %cst_653 [1] : vector<2x32xf32> to vector<2xf32>
    %1043 = vector.shape_cast %1042 : vector<2xf32> to vector<2x1xf32>
    %cst_654 = arith.constant 3.200000e+01 : f32
    %1044 = vector.broadcast %cst_654 : f32 to vector<2x1xf32>
    %1045 = arith.divf %1043, %1044 : vector<2x1xf32>
    %1046 = arith.mulf %1041, %1041 : vector<2x32xf32>
    %cst_655 = arith.constant dense<0.000000e+00> : vector<2xf32>
    %1047 = vector.multi_reduction <add>, %1046, %cst_655 [1] : vector<2x32xf32> to vector<2xf32>
    %1048 = vector.shape_cast %1047 : vector<2xf32> to vector<2x1xf32>
    %cst_656 = arith.constant 3.200000e+01 : f32
    %1049 = vector.broadcast %cst_656 : f32 to vector<2x1xf32>
    %1050 = arith.divf %1048, %1049 : vector<2x1xf32>
    %1051 = arith.mulf %1045, %1045 : vector<2x1xf32>
    %1052 = arith.subf %1050, %1051 : vector<2x1xf32>
    %1053 = vector.broadcast %1045 : vector<2x1xf32> to vector<2x32xf32>
    %1054 = arith.subf %1041, %1053 : vector<2x32xf32>
    %cst_657 = arith.constant 9.99999974E-6 : f32
    %1055 = vector.broadcast %cst_657 : f32 to vector<2x1xf32>
    %1056 = arith.addf %1052, %1055 : vector<2x1xf32>
    %1057 = math.rsqrt %1056 : vector<2x1xf32>
    %1058 = vector.broadcast %1057 : vector<2x1xf32> to vector<2x32xf32>
    %1059 = arith.mulf %1054, %1058 : vector<2x32xf32>
    %c163 = arith.constant 163 : index
    %c0_658 = arith.constant 0 : index
    %1060 = vector.load %arg4[%c163, %c0_658] : memref<168x128xf32, #tpu.memory_space<vmem>>, vector<1x32xf32>
    %1061 = vector.broadcast %1060 : vector<1x32xf32> to vector<2x32xf32>
    %1062 = arith.mulf %1059, %1061 : vector<2x32xf32>
    %c164 = arith.constant 164 : index
    %c0_659 = arith.constant 0 : index
    %1063 = vector.load %arg4[%c164, %c0_659] : memref<168x128xf32, #tpu.memory_space<vmem>>, vector<1x32xf32>
    %1064 = vector.broadcast %1063 : vector<1x32xf32> to vector<2x32xf32>
    %1065 = arith.addf %1062, %1064 : vector<2x32xf32>
    %c128_660 = arith.constant 128 : index
    %c0_661 = arith.constant 0 : index
    %1066 = vector.load %arg4[%c128_660, %c0_661] : memref<168x128xf32, #tpu.memory_space<vmem>>, vector<32x128xf32>
    %cst_662 = arith.constant dense<0.000000e+00> : vector<2x128xf32>
    %1067 = tpu.matmul %1065, %1066, %cst_662 {dimension_numbers = #tpu.dot_dimension_numbers<[1], [0], [0], [1], [0, 0, 1, 1], [], []>} : vector<2x32xf32>, vector<32x128xf32>, vector<2x128xf32> -> vector<2x128xf32>
    %c165 = arith.constant 165 : index
    %c0_663 = arith.constant 0 : index
    %1068 = vector.load %arg4[%c165, %c0_663] : memref<168x128xf32, #tpu.memory_space<vmem>>, vector<1x128xf32>
    %1069 = vector.broadcast %1068 : vector<1x128xf32> to vector<2x128xf32>
    %1070 = arith.addf %1067, %1069 : vector<2x128xf32>
    %1071 = arith.negf %1070 : vector<2x128xf32>
    %1072 = math.exp %1071 : vector<2x128xf32>
    %cst_664 = arith.constant 1.000000e+00 : f32
    %1073 = vector.broadcast %cst_664 : f32 to vector<2x128xf32>
    %1074 = arith.addf %1073, %1072 : vector<2x128xf32>
    %1075 = arith.divf %1073, %1074 : vector<2x128xf32>
    %c0_665 = arith.constant 0 : index
    %c0_666 = arith.constant 0 : index
    %1076 = vector.load %arg5[%c0_665, %c0_666] : memref<2x128xf32, #tpu.memory_space<vmem>>, vector<2x128xf32>
    tpu.vector_store %arg5[%c0_665, %c0_666], %1075 {strides = array<i32>} : memref<2x128xf32, #tpu.memory_space<vmem>>, vector<2x128xf32>,
    %1077 = tpu.concatenate %128, %255, %382, %509, %636, %763, %890, %1017 in 1 : vector<2x64xf32>, vector<2x64xf32>, vector<2x64xf32>, vector<2x64xf32>, vector<2x64xf32>, vector<2x64xf32>, vector<2x64xf32>, vector<2x64xf32> -> vector<2x512xf32>
    %c0_667 = arith.constant 0 : index
    %c0_668 = arith.constant 0 : index
    %1078 = vector.load %arg6[%c0_667, %c0_668] : memref<2x512xf32, #tpu.memory_space<vmem>>, vector<2x512xf32>
    tpu.vector_store %arg6[%c0_667, %c0_668], %1077 {strides = array<i32>} : memref<2x512xf32, #tpu.memory_space<vmem>>, vector<2x512xf32>,
    return
  }
}

</mosaic_0001>

<bundles_post_ra>
// kernel: lattice_rnn_forward.1
= control target key start
LH: loop header
LB: loop body
LE: loop exit
PB: predicated region body
PF: predicated region fallthrough
CT: control target
= control target key end

     0   :  { %12 = vsyncpa [#allocation3], 0  ;;  %s7347_s0 = inlined_call_operand.hbm [shape: f32[2,8], index: 0, kind: input, shape index: {}]   ;;  %s7348_s1 = inlined_call_operand.vmem [shape: f32[2,64], index: 1, kind: input, shape index: {}]   ;;  %s7349_s2 = inlined_call_operand.vmem [shape: f32[8,2,64], index: 2, kind: input, shape index: {}]   ;;  %s7350_s3 = inlined_call_operand.hbm [shape: f32[8,296,128], index: 3, kind: input, shape index: {}]   ;;  %s7351_s4 = inlined_call_operand.hbm [shape: f32[168,128], index: 4, kind: input, shape index: {}]   ;;  %s7352_s5 = inlined_call_operand.hbm [shape: f32[2,128], index: 5, kind: output, shape index: {0}]   ;;  %s7353_s6 = inlined_call_operand.vmem [shape: f32[2,512], index: 6, kind: output, shape index: {1}]  }
   0x1   :  { %13 = vsyncpa [#allocation6], 0 }
   0x2   :  { %14 = vsyncpa [#allocation4], 0  ;;  %s6650_s21 = smov [#allocation5]   ;;  %s6556_s25 = scalar_lea.hbm %s7350_s3, 37888 }
   0x3   :  { %s34_s22 = sshll.u32 %s6650_s21, 4  ;;  %p6557_p0 = scmp.ne.s32.totalorder %s7350_s3, %s6556_s25  ;;  %s35_s22 = int_to_ptr.vmem [resolvable:$true] %s34_s22 }
   0x4   :  { %p6560_p1 = scmp.lt.u32.totalorder %s6556_s25, %s7350_s3 }
   0x6   :  { %p6562_p2 = pnand %p6560_p1, %p6557_p0 }
   0x8   :  { %6565 = shalt.err (!%p6562_p2)
}
   0x9   :  { %s6566_s30 = scalar_lea.vmem %s35_s22, 37888  ;;  %p6571_p4 = scmp.lt.s32.totalorder %s35_s22, %s35_s22 }
   0xa   :  { %p6567_p3 = scmp.ne.s32.totalorder %s35_s22, %s6566_s30  ;;  %p6572_p5 = scmp.lt.s32.totalorder %s6566_s30, %s6566_s30 }
   0xc   :  { %p6573_p6 = por %p6572_p5, %p6571_p4 }
   0xe   :  { %p6574_p7 = pnand %p6573_p6, %p6567_p3 }
  0x10   :  { %6577 = shalt.err (!%p6574_p7)
}
  0x11   :  { %s6651_s7 = smov 128   ;;  %s6652_s8 = smov 8  }
  0x12   :  { %40 = dma.hbm_to_vmem [thread:$0]  %s7350_s3, 37888, %s35_s22, [#allocation6], %s6651_s7, %s6651_s7, %s6652_s8  }
  0x13   :  { %s6653_s11 = smov [#allocation2]   ;;  %s6654_s13 = smov [#allocation7]  }
  0x14   :  { %s21_s12 = sshll.u32 %s6653_s11, 4  ;;  %s46_s14 = sshll.u32 %s6654_s13, 4  ;;  %s22_s12 = int_to_ptr.vmem [resolvable:$true] %s21_s12  ;;  %s47_s14 = int_to_ptr.vmem [resolvable:$true] %s46_s14 }
  0x15   :  { %s6578_s17 = scalar_lea.hbm %s7347_s0, 32 }
  0x16   :  { %p6579_p8 = scmp.ne.s32.totalorder %s7347_s0, %s6578_s17  ;;  %p6582_p9 = scmp.lt.u32.totalorder %s6578_s17, %s7347_s0 }
  0x18   :  { %p6584_p10 = pnand %p6582_p9, %p6579_p8 }
  0x1a   :  { %6587 = shalt.err (!%p6584_p10)
}
  0x1b   :  { %s6588_s3 = scalar_lea.vmem %s22_s12, 32  ;;  %p6593_p12 = scmp.lt.s32.totalorder %s22_s12, %s22_s12 }
  0x1c   :  { %p6589_p11 = scmp.ne.s32.totalorder %s22_s12, %s6588_s3  ;;  %p6594_p13 = scmp.lt.s32.totalorder %s6588_s3, %s6588_s3 }
  0x1e   :  { %p6595_p0 = por %p6594_p13, %p6593_p12 }
  0x20   :  { %p6596_p1 = pnand %p6595_p0, %p6589_p11 }
  0x22   :  { %6599 = shalt.err (!%p6596_p1)
}
  0x23   :  { %24 = dma.hbm_to_vmem [thread:$0]  %s7347_s0, 32, %s22_s12, [#allocation3]  }
  0x24   :  { %s6600_s26 = scalar_lea.hbm %s7351_s4, 2688 }
  0x25   :  { %p6601_p2 = scmp.ne.s32.totalorder %s7351_s4, %s6600_s26  ;;  %p6604_p3 = scmp.lt.u32.totalorder %s6600_s26, %s7351_s4 }
  0x27   :  { %p6606_p4 = pnand %p6604_p3, %p6601_p2 }
  0x29   :  { %6609 = shalt.err (!%p6606_p4)
}
  0x2a   :  { %s6610_s9 = scalar_lea.vmem %s47_s14, 2688  ;;  %p6615_p6 = scmp.lt.s32.totalorder %s47_s14, %s47_s14 }
  0x2b   :  { %p6611_p5 = scmp.ne.s32.totalorder %s47_s14, %s6610_s9  ;;  %p6616_p7 = scmp.lt.s32.totalorder %s6610_s9, %s6610_s9 }
  0x2d   :  { %p6617_p8 = por %p6616_p7, %p6615_p6 }
  0x2f   :  { %p6618_p9 = pnand %p6617_p8, %p6611_p5 }
  0x31   :  { %6621 = shalt.err (!%p6618_p9)
}
  0x32   :  { %52 = dma.hbm_to_vmem [thread:$0]  %s7351_s4, 2688, %s47_s14, [#allocation6], %s6651_s7, %s6651_s7, %s6652_s8  }
  0x33   :  { %6644 = dma.done.wait [#allocation3], 32  }
  0x34   :  { %6645 = vsyncadd [#allocation3], 4294967264 }
  0x35   :  { %6646 = dma.done.wait [#allocation6], 40576  }
  0x36   :  { %6647 = vsyncadd [#allocation6], 4294926720  ;;  %v6655_v0 = vmov 0.0|0.0   ;;  %vm6656_vm0 = vmmov 0   ;;  %v6657_v1 = vmov 0.0   ;;  %v73_v2 = vld [vmem:[#allocation5 + $0x40] sm:$0xff] }
  0x37   :  { %5977 = vmatprep.subr.bf16.mxu0 %v6655_v0  ;;  %5989 = vmatprep.subr.bf16.mxu1 %v6655_v0  ;;  %v74_v3 = vld [vmem:[#allocation5 + $0x48] sm:$0xff]  ;;  %v65_v4 = vld [vmem:[#allocation5] sm:$0xff]  ;;  %v75_v7 = vld [vmem:[#allocation5 + $0x50] sm:$0xff]  ;;  %vm81_vm1 = vcmask 523264   ;;  %vm413_vm2 = vcmask 254976   ;;  %s6660_s12 = smov 96  }
  0x38   :  { %5245 = vmatprep.mubr.msk.f32.mxu0 %vm6656_vm0, %v6657_v1  ;;  %5264 = vmatprep.mubr.msk.f32.mxu1 %vm6656_vm0, %v6657_v1  ;;  %v5978_v5 = vpack.c.bf16 %v74_v3, %v73_v2  ;;  %v66_v6 = vld [vmem:[#allocation5 + $0x8] sm:$0xff]  ;;  %v76_v8 = vld [vmem:[#allocation5 + $0x58] sm:$0xff]  ;;  %v67_v10 = vld [vmem:[#allocation5 + $0x10] sm:$0xff]  ;;  %v6659_v3 = vmov 0   ;;  %vm487_vm3 = vcmask 261120   ;;  %s6661_s13 = smov 32  }
  0x39   :  { %v5990_v9 = vpack.c.bf16 %v66_v6, %v65_v4  ;;  %v68_v11 = vld [vmem:[#allocation5 + $0x18] sm:$0xff]  ;;  %v5981_v12 = vpack.c.bf16 %v76_v8, %v75_v7  ;;  %v77_v14 = vld [vmem:[#allocation5 + $0x60] sm:$0xff]  ;;  %v78_v15 = vld [vmem:[#allocation5 + $0x68] sm:$0xff]  ;;  %6460 = vset.pattern.permute.xlu1 %v6659_v3  ;;  %s6670_s28 = smov [#allocation8]  }
  0x3a   :  { %5979 = vmatpush3.bf16.msra.mxu0 %v5978_v5  ;;  %v5993_v13 = vpack.c.bf16 %v68_v11, %v67_v10  ;;  %v69_v16 = vld [vmem:[#allocation5 + $0x20] sm:$0xff]  ;;  %v70_v17 = vld [vmem:[#allocation5 + $0x28] sm:$0xff]  ;;  %v5984_v18 = vpack.c.bf16 %v78_v15, %v77_v14  ;;  %v79_v20 = vld [vmem:[#allocation5 + $0x70] sm:$0xff]  ;;  %s4733_s29 = sshll.u32 %s6670_s28, 4  ;;  %s4734_s29 = int_to_ptr.vmem [resolvable:$true] %s4733_s29 }
  0x3b   :  { %5991 = vmatpush3.bf16.msra.mxu1 %v5990_v9  ;;  %5980 = vmatprep.subr.bf16.mxu0 %v6655_v0  ;;  %v5996_v19 = vpack.c.bf16 %v70_v17, %v69_v16  ;;  %v80_v21 = vld [vmem:[#allocation5 + $0x78] sm:$0xff]  ;;  %v71_v22 = vld [vmem:[#allocation5 + $0x30] sm:$0xff]  ;;  %v235_v26 = vld [vmem:[#allocation5 + $0x80] sm:$0xff]  ;;  %p6627_p11 = scmp.lt.s32.totalorder %s4734_s29, %s4734_s29 }
  0x3c   :  { %5992 = vmatprep.subr.bf16.mxu1 %v6655_v0  ;;  %v72_v23 = vld [vmem:[#allocation5 + $0x38] sm:$0xff]  ;;  %v5987_v24 = vpack.c.bf16 %v80_v21, %v79_v20  ;;  %v236_v27 = vld [vmem:[#allocation5 + $0x88] sm:$0xff]  ;;  %v237_v31 = vld [vmem:[#allocation5 + $0x90] sm:$0xff] }
  0x3d   :  { %v5999_v25 = vpack.c.bf16 %v72_v23, %v71_v22  ;;  %v64_v28 = vld [vmem:[%s7349_s2] sm:$0x3]  ;;  %v6002_v29 = vpack.c.bf16 %v236_v27, %v235_v26  ;;  %v239_v34 = vld [vmem:[#allocation5 + $0xa0] sm:$0xff]  ;;  %v240_v35 = vld [vmem:[#allocation5 + $0xa8] sm:$0xff] }
  0x3e   :  { %5982 = vmatpush3.bf16.msra.mxu0 %v5981_v12  ;;  %v62_v30 = vld [vmem:[%s7348_s1] sm:$0x3]  ;;  %v6008_v36 = vpack.c.bf16 %v240_v35, %v239_v34  ;;  %v241_v37 = vld [vmem:[#allocation5 + $0xb0] sm:$0xff]  ;;  %v322_v40 = vld [vmem:[#allocation5 + $0xc0] sm:$0xff]  ;;  %s6658_s1 = smov 64  }
  0x3f   :  { %5994 = vmatpush3.bf16.msra.mxu1 %v5993_v13  ;;  %5983 = vmatprep.subr.bf16.mxu0 %v6655_v0  ;;  %v238_v32 = vld [vmem:[#allocation5 + $0x98] sm:$0xff]  ;;  %v323_v41 = vld [vmem:[#allocation5 + $0xc8] sm:$0xff]  ;;  %v324_v42 = vld [vmem:[#allocation5 + $0xd0] sm:$0xff] }
  0x40   :  { %5995 = vmatprep.subr.bf16.mxu1 %v6655_v0  ;;  %v6005_v33 = vpack.c.bf16 %v238_v32, %v237_v31  ;;  %v242_v38 = vld [vmem:[#allocation5 + $0xb8] sm:$0xff]  ;;  %v6014_v43 = vpack.c.bf16 %v323_v41, %v322_v40  ;;  %v326_v46 = vld [vmem:[#allocation5 + $0xe0] sm:$0xff]  ;;  %v327_v47 = vld [vmem:[#allocation5 + $0xe8] sm:$0xff] }
  0x41   :  { %v6011_v39 = vpack.c.bf16 %v242_v38, %v241_v37  ;;  %v325_v44 = vld [vmem:[#allocation5 + $0xd8] sm:$0xff]  ;;  %v6020_v48 = vpack.c.bf16 %v327_v47, %v326_v46  ;;  %v4749_v52 = vld [vmem:[#allocation5 + $0x120] ss:$0 sm:$0xff]  ;;  %v328_v57 = vld [vmem:[#allocation5 + $0xf0] sm:$0xff] }
  0x42   :  { %5985 = vmatpush3.bf16.msra.mxu0 %v5984_v18  ;;  %v6017_v45 = vpack.c.bf16 %v325_v44, %v324_v42  ;;  %v329_v58 = vld [vmem:[#allocation5 + $0xf8] sm:$0xff]  ;;  %v4750_v60 = vld [vmem:[#allocation5 + $0x121] ss:$0 sm:$0xff]  ;;  %v4752_v4 = vld [vmem:[#allocation5 + $0x122] ss:$0 sm:$0xff] }
  0x43   :  { %5997 = vmatpush3.bf16.msra.mxu1 %v5996_v19  ;;  %5986 = vmatprep.subr.bf16.mxu0 %v6655_v0  ;;  %v6023_v59 = vpack.c.bf16 %v329_v58, %v328_v57  ;;  %v6796_v13 = vld [vmem:[#allocation2] sm:$0x3]  ;;  %v483_v14 = vld [vmem:[#allocation5 + $0x100] sm:$0xff]  ;;  %v484_v15 = vld [vmem:[#allocation5 + $0x108] sm:$0xff] }
  0x44   :  { %5998 = vmatprep.subr.bf16.mxu1 %v6655_v0  ;;  %v6026_v16 = vpack.c.bf16 %v484_v15, %v483_v14  ;;  %v485_v17 = vld [vmem:[#allocation5 + $0x110] sm:$0xff]  ;;  %v486_v18 = vld [vmem:[#allocation5 + $0x118] sm:$0xff]  ;;  %v4754_v34 = vld [vmem:[#allocation5 + $0x125] ss:$0 sm:$0xff] }
  0x45   :  { %v6029_v19 = vpack.c.bf16 %v486_v18, %v485_v17  ;;  %v4755_v35 = vld [vmem:[#allocation5 + $0x126] ss:$0 sm:$0xff]  ;;  %v611_v14 = vld [vmem:[#allocation5 + $0x178] sm:$0xff] }
  0x46   :  { %5988 = vmatpush3.bf16.msra.mxu0 %v5987_v24  ;;  %v612_v15 = vld [vmem:[#allocation5 + $0x180] sm:$0xff]  ;;  %v603_v17 = vld [vmem:[#allocation5 + $0x138] sm:$0xff] }
  0x47   :  { %6000 = vmatpush3.bf16.msra.mxu1 %v5999_v25  ;;  %6001 = vmatprep.subr.bf16.mxu0 %v6655_v0  ;;  %v6035_v18 = vpack.c.bf16 %v612_v15, %v611_v14  ;;  %v6662_v15 = vmov 1  }
  0x48   :  { %6013 = vmatprep.subr.bf16.mxu1 %v6655_v0  ;;  %6461 = vset.pattern.permute.xlu0 %v6662_v15 }
  0x49   :  { %5246 = vmatmul.mubr.msk.f32.vlgmr.msra.gmra.mrb[0].mxu0 %vm81_vm1, %v64_v28 }
  0x4a   :  { %5265 = vmatmul.mubr.msk.f32.vlgmr.msra.gmra.mrb[0].mxu1 %vm81_vm1, %v62_v30  ;;  %6003 = vmatpush3.bf16.msra.mxu0 %v6002_v29 }
  0x4b   :  { %6004 = vmatprep.subr.bf16.mxu0 %v6655_v0  ;;  %5283 = vmatprep.mubr.msk.f32.mxu0 %vm6656_vm0, %v6657_v1 }
  0x4c   :  { %5302 = vmatprep.mubr.msk.f32.mxu1 %vm6656_vm0, %v6657_v1  ;;  %6015 = vmatpush3.bf16.msra.mxu1 %v6014_v43 }
  0x4d   :  { %6016 = vmatprep.subr.bf16.mxu1 %v6655_v0 }
  0x4e   :  { %6006 = vmatpush3.bf16.msra.mxu0 %v6005_v33 }
  0x4f   :  { %6007 = vmatprep.subr.bf16.mxu0 %v6655_v0 }
  0x50   :  { %6018 = vmatpush3.bf16.msra.mxu1 %v6017_v45 }
  0x51   :  { %6019 = vmatprep.subr.bf16.mxu1 %v6655_v0 }
  0x52   :  { %6009 = vmatpush3.bf16.msra.mxu0 %v6008_v36  ;;  %v4756_v36 = vld [vmem:[#allocation5 + $0x123] ss:$0 sm:$0xff] }
  0x53   :  { %6010 = vmatprep.subr.bf16.mxu0 %v6655_v0 }
  0x54   :  { %6021 = vmatpush3.bf16.msra.mxu1 %v6020_v48 }
  0x55   :  { %6022 = vmatprep.subr.bf16.mxu1 %v6655_v0 }
  0x56   :  { %6012 = vmatpush3.bf16.msra.mxu0 %v6011_v39  ;;  %v4758_v39 = vld [vmem:[#allocation5 + $0x124] ss:$0 sm:$0xff] }
  0x57   :  { %6025 = vmatprep.subr.bf16.mxu0 %v6655_v0 }
  0x58   :  { %6024 = vmatpush3.bf16.msra.mxu1 %v6023_v59 }
  0x59   :  { %6031 = vmatprep.subr.bf16.mxu1 %v6655_v0 }
 0x11c   :  { %v151_v49 = vpop.f32.mrb[0].mxu0 }
 0x11d   :  { %v224_v50 = vpop.f32.mrb[0].mxu1  ;;  %v5247_v51 = vpop.f32.mrb[1].mxu0 }
 0x11e   :  { %v225_v53 = vadd.f32 %v224_v50, %v151_v49  ;;  %v5266_v54 = vpop.f32.mrb[1].mxu1 }
 0x120   :  { %v233_v55 = vadd.f32 %v4749_v52, %v225_v53 }
 0x122   :  { %409 = vrot.lane.b32.xlu0 %v233_v55, %s6658_s1  ;;  %v234_v56 = vmax.f32 %v233_v55, 0.0 }
 0x124   :  { %5284 = vmatmul.mubr.msk.f32.vlgmr.msra.gmra.mrb[2].mxu0 %vm81_vm1, %v234_v56 }
 0x125   :  { %5313 = vmatprep.mubr.msk.f32.mxu0 %vm6656_vm0, %v6657_v1  ;;  %6027 = vmatpush3.bf16.msra.mxu0 %v6026_v16 }
 0x126   :  { %6028 = vmatprep.subr.bf16.mxu0 %v6655_v0 }
 0x129   :  { %6030 = vmatpush3.bf16.msra.mxu0 %v6029_v19 }
 0x12a   :  { %6043 = vmatprep.subr.bf16.mxu0 %v6655_v0 }
 0x194   :  { %v410_v8 = vpop.permute.xlu0 %409 }
 0x1f7   :  { %v317_v61 = vpop.f32.mrb[2].mxu0 }
 0x1f8   :  { %v318_v62 = vadd.f32 %v4750_v60, %v317_v61  ;;  %v5285_v63 = vpop.f32.mrb[3].mxu0 }
 0x1fa   :  { %v321_v2 = vmax.f32 %v318_v62, 0.0 }
 0x1fc   :  { %5303 = vmatmul.mubr.msk.f32.vlgmr.msra.gmra.mrb[2].mxu1 %vm81_vm1, %v321_v2 }
 0x1fd   :  { %5332 = vmatprep.mubr.msk.f32.mxu1 %vm6656_vm0, %v6657_v1 }
 0x2cf   :  { %v404_v5 = vpop.f32.mrb[2].mxu1 }
 0x2d0   :  { %v405_v6 = vadd.f32 %v4752_v4, %v404_v5  ;;  %v5304_v7 = vpop.f32.mrb[3].mxu1 }
 0x2d1   :  { %v609_v7 = vld [vmem:[#allocation5 + $0x168] sm:$0xff] }
 0x2d2   :  { %v6789_v9 = vadd.f32 %v410_v8, %v405_v6  ;;  %v610_v8 = vld [vmem:[#allocation5 + $0x170] sm:$0xff] }
 0x2d4   :  { %v414_v10 = vsel %vm413_vm2, %v6789_v9, 0.0  ;;  %v419_v11 = vmul.f32 %v6789_v9, %v6789_v9 }
 0x2d5   :  { %415 = vadd.xlane.f32.xlu0 %v414_v10  ;;  %v601_v10 = vld [vmem:[#allocation5 + $0x128] sm:$0xff] }
 0x2d6   :  { %v420_v12 = vsel %vm413_vm2, %v419_v11, 0.0 }
 0x2d7   :  { %421 = vadd.xlane.f32.xlu1 %v420_v12  ;;  %v602_v12 = vld [vmem:[#allocation5 + $0x130] sm:$0xff] }
 0x2d8   :  { %v6044_v16 = vpack.c.bf16 %v602_v12, %v601_v10 }
 0x2e8   :  { %475 = vperm.xlu1 %6460, %v6796_v13  }
 0x2ec   :  { %431 = vrot.lane.b32.xlu1 %v6789_v9, %s6660_s12 }
 0x2f0   :  { %439 = vrot.lane.b32.xlu1 %v419_v11, %s6660_s12  ;;  %v6032_v11 = vpack.c.bf16 %v610_v8, %v609_v7  ;;  %v4765_v8 = vld [vmem:[#allocation5 + $0x249] ss:$0 sm:$0xff] }
 0x2f2   :  { %6033 = vmatpush3.bf16.msra.mxu1 %v6032_v11 }
 0x2f3   :  { %6034 = vmatprep.subr.bf16.mxu1 %v6655_v0 }
 0x2f6   :  { %6036 = vmatpush3.bf16.msra.mxu1 %v6035_v18 }
 0x2f7   :  { %6037 = vmatprep.subr.bf16.mxu1 %v6655_v0 }
 0x362   :  { %v416_v20 = vpop.xlane.xlu0 %415 }
 0x363   :  { %v418_v21 = vmul.f32 0.03125, %v416_v20  ;;  %v613_v20 = vld [vmem:[#allocation5 + $0x188] sm:$0xff] }
 0x364   :  { %v422_v22 = vpop.xlane.xlu1 %421 }
 0x365   :  { %v424_v23 = vmul.f32 %v418_v21, %v418_v21  ;;  %v423_v24 = vmul.f32 0.03125, %v422_v22  ;;  %v426_v31 = vsub.f32 %v6789_v9, %v418_v21  ;;  %v614_v21 = vld [vmem:[#allocation5 + $0x190] sm:$0xff]  ;;  %v605_v22 = vld [vmem:[#allocation5 + $0x148] sm:$0xff] }
 0x367   :  { %v425_v25 = vsub.f32 %v423_v24, %v424_v23  ;;  %v606_v23 = vld [vmem:[#allocation5 + $0x150] sm:$0xff]  ;;  %v6038_v24 = vpack.c.bf16 %v614_v21, %v613_v20 }
 0x368   :  { %v476_v26 = vpop.permute.xlu1 %475 }
 0x369   :  { %v427_v27 = vadd.f32 1e-05, %v425_v25  ;;  %v482_v37 = vmul.f32 %v4756_v36, %v476_v26  ;;  %v6050_v25 = vpack.c.bf16 %v606_v23, %v605_v22  ;;  %v615_v26 = vld [vmem:[#allocation5 + $0x198] sm:$0xff]  ;;  %6039 = vmatpush3.bf16.msra.mxu1 %v6038_v24  ;;  %v1015_v24 = vld [vmem:[#allocation5 + $0x228] sm:$0xff] }
 0x36a   :  { %6040 = vmatprep.subr.bf16.mxu1 %v6655_v0  ;;  %v772_v36 = vld [vmem:[#allocation5 + $0x1b8] sm:$0xff] }
 0x36b   :  { %6468 = vrsqrt.f32 %v427_v27  ;;  %v616_v27 = vld [vmem:[#allocation5 + $0x1a0] sm:$0xff] }
 0x36c   :  { %v432_v28 = vpop.permute.xlu1 %431 }
 0x36d   :  { %v434_v49 = vsel %vm413_vm2, %v432_v28, 0.0  ;;  %v607_v28 = vld [vmem:[#allocation5 + $0x158] sm:$0xff] }
 0x370   :  { %v440_v29 = vpop.permute.xlu1 %439 }
 0x371   :  { %v442_v30 = vsel %vm413_vm2, %v440_v29, 0.0  ;;  %v608_v29 = vld [vmem:[#allocation5 + $0x160] sm:$0xff] }
 0x372   :  { %443 = vadd.xlane.f32.xlu0 %v442_v30 }
 0x375   :  { %v6469_v32 = vpop.eup %6468 }
 0x376   :  { %v429_v33 = vmul.f32 %v6469_v32, %v426_v31  ;;  %v6041_v31 = vpack.c.bf16 %v616_v27, %v615_v26  ;;  %v6053_v32 = vpack.c.bf16 %v608_v29, %v607_v28  ;;  %v1017_v26 = vld [vmem:[#allocation5 + $0x238] sm:$0xff]  ;;  %v1018_v28 = vld [vmem:[#allocation5 + $0x240] sm:$0xff] }
 0x377   :  { %v6083_v29 = vpack.c.bf16 %v1018_v28, %v1017_v26  ;;  %v1143_v26 = vld [vmem:[#allocation5 + $0x2a8] sm:$0xff]  ;;  %v1134_v28 = vld [vmem:[#allocation5 + $0x260] sm:$0xff] }
 0x378   :  { %5314 = vmatmul.mubr.msk.f32.vlgmr.msra.gmra.mrb[4].mxu0 %vm487_vm3, %v429_v33  ;;  %6042 = vmatpush3.bf16.msra.mxu1 %v6041_v31  ;;  %v4761_v33 = vld [vmem:[%s7349_s2 + $0x2] sm:$0x3] }
 0x379   :  { %5351 = vmatprep.mubr.msk.f32.mxu0 %vm6656_vm0, %v6657_v1  ;;  %6045 = vmatpush3.bf16.msra.mxu0 %v6044_v16  ;;  %v4767_v16 = vld [vmem:[#allocation5 + $0x24a] ss:$0 sm:$0xff] }
 0x37a   :  { %6046 = vmatprep.subr.bf16.mxu0 %v6655_v0  ;;  %6055 = vmatprep.subr.bf16.mxu1 %v6655_v0 }
 0x37b   :  { %5333 = vmatmul.mubr.msk.f32.vlgmr.msra.gmra.mrb[4].mxu1 %vm81_vm1, %v4761_v33 }
 0x37c   :  { %5370 = vmatprep.mubr.msk.f32.mxu1 %vm6656_vm0, %v6657_v1 }
 0x388   :  { %458 = vrot.lane.b32.xlu0 %v4754_v34, %s6661_s13  ;;  %v770_v34 = vld [vmem:[#allocation5 + $0x1a8] sm:$0xff] }
 0x38c   :  { %468 = vrot.lane.b32.xlu0 %v4755_v35, %s6661_s13  ;;  %v771_v35 = vld [vmem:[#allocation5 + $0x1b0] sm:$0xff] }
 0x3ff   :  { %v444_v54 = vpop.xlane.xlu0 %443 }
 0x400   :  { %v445_v56 = vmul.f32 0.03125, %v444_v54  ;;  %v859_v54 = vld [vmem:[#allocation5 + $0x1f8] sm:$0xff] }
 0x403   :  { %v459_v61 = vpop.permute.xlu0 %458 }
 0x407   :  { %v469_v2 = vpop.permute.xlu0 %468 }
 0x44b   :  { %v557_v38 = vpop.f32.mrb[4].mxu0 }
 0x44c   :  { %v561_v40 = vadd.f32 %v557_v38, %v482_v37  ;;  %v5315_v41 = vpop.f32.mrb[5].mxu0  ;;  %v6056_v37 = vpack.c.bf16 %v771_v35, %v770_v34  ;;  %v773_v38 = vld [vmem:[#allocation5 + $0x1c0] sm:$0xff] }
 0x44e   :  { %v567_v42 = vadd.f32 %v4758_v39, %v561_v40  ;;  %6057 = vmatpush3.bf16.msra.mxu1 %v6056_v37  ;;  %v6059_v39 = vpack.c.bf16 %v773_v38, %v772_v36 }
 0x44f   :  { %6058 = vmatprep.subr.bf16.mxu1 %v6655_v0 }
 0x450   :  { %v4759_v43 = vmul.f32 -1.442695, %v567_v42 }
 0x452   :  { %6470 = vpow2.f32 %v4759_v43  ;;  %6060 = vmatpush3.bf16.msra.mxu1 %v6059_v39 }
 0x453   :  { %6061 = vmatprep.subr.bf16.mxu1 %v6655_v0 }
 0x45c   :  { %v6471_v44 = vpop.eup %6470 }
 0x45d   :  { %v571_v45 = vadd.f32 1.0, %v6471_v44  ;;  %v774_v44 = vld [vmem:[#allocation5 + $0x1c8] sm:$0xff] }
 0x45f   :  { %6472 = vrcp.f32 %v571_v45  ;;  %v775_v45 = vld [vmem:[#allocation5 + $0x1d0] sm:$0xff] }
 0x469   :  { %v6811_v46 = vpop.eup %6472 }
 0x46a   :  { %v574_v47 = vmul.f32 2.0, %v6811_v46 }
 0x46c   :  { %v4760_v48 = vadd.f32 -1.0, %v574_v47  ;;  %v6062_v47 = vpack.c.bf16 %v775_v45, %v774_v44  ;;  %v4769_v44 = vld [vmem:[#allocation5 + $0x24d] ss:$0 sm:$0xff]  ;;  %v4771_v45 = vld [vmem:[#allocation5 + $0x24b] ss:$0 sm:$0xff] }
 0x46e   :  { %578 = vrot.lane.b32.xlu1 %v4760_v48, %s6658_s1  ;;  %v686_v48 = vpop.f32.mrb[4].mxu1  ;;  %6063 = vmatpush3.bf16.msra.mxu1 %v6062_v47 }
 0x46f   :  { %6064 = vmatprep.subr.bf16.mxu1 %v6655_v0 }
 0x492   :  { %435 = vadd.xlane.f32.xlu1 %v434_v49  ;;  %v5334_v49 = vpop.f32.mrb[5].mxu1 }
 0x4e0   :  { %v579_v50 = vpop.permute.xlu1 %578 }
 0x4e1   :  { %v581_v51 = vmul.f32 %v6811_v46, %v579_v50  ;;  %v777_v50 = vld [vmem:[#allocation5 + $0x1e0] sm:$0xff] }
 0x4e3   :  { %583 = vrot.lane.b32.xlu0 %v581_v51, %s6661_s13 }
 0x51f   :  { %v436_v52 = vpop.xlane.xlu1 %435 }
 0x520   :  { %v437_v53 = vmul.f32 0.03125, %v436_v52  ;;  %v857_v52 = vld [vmem:[#allocation5 + $0x1e8] sm:$0xff] }
 0x522   :  { %v446_v55 = vmul.f32 %v437_v53, %v437_v53  ;;  %v448_v60 = vsub.f32 %v6789_v9, %v437_v53  ;;  %v604_v9 = vld [vmem:[#allocation5 + $0x140] sm:$0xff]  ;;  %v858_v53 = vld [vmem:[#allocation5 + $0x1f0] sm:$0xff] }
 0x523   :  { %v6047_v19 = vpack.c.bf16 %v604_v9, %v603_v17 }
 0x524   :  { %v447_v57 = vsub.f32 %v445_v56, %v446_v55  ;;  %v6068_v55 = vpack.c.bf16 %v858_v53, %v857_v52  ;;  %v860_v56 = vld [vmem:[#allocation5 + $0x200] sm:$0xff] }
 0x525   :  { %6048 = vmatpush3.bf16.msra.mxu0 %v6047_v19 }
 0x526   :  { %v449_v58 = vadd.f32 1e-05, %v447_v57  ;;  %6049 = vmatprep.subr.bf16.mxu0 %v6655_v0  ;;  %v6071_v57 = vpack.c.bf16 %v860_v56, %v859_v54 }
 0x528   :  { %6474 = vrsqrt.f32 %v449_v58  ;;  %v861_v58 = vld [vmem:[#allocation5 + $0x208] sm:$0xff] }
 0x529   :  { %6051 = vmatpush3.bf16.msra.mxu0 %v6050_v25  ;;  %v1016_v25 = vld [vmem:[#allocation5 + $0x230] sm:$0xff] }
 0x52a   :  { %6052 = vmatprep.subr.bf16.mxu0 %v6655_v0  ;;  %v6080_v27 = vpack.c.bf16 %v1016_v25, %v1015_v24  ;;  %v1133_v24 = vld [vmem:[#allocation5 + $0x258] sm:$0xff]  ;;  %v1142_v25 = vld [vmem:[#allocation5 + $0x2a0] sm:$0xff] }
 0x52d   :  { %6054 = vmatpush3.bf16.msra.mxu0 %v6053_v32 }
 0x52e   :  { %6067 = vmatprep.subr.bf16.mxu0 %v6655_v0 }
 0x532   :  { %v6475_v59 = vpop.eup %6474 }
 0x533   :  { %v451_v62 = vmul.f32 %v6475_v59, %v448_v60  ;;  %v862_v59 = vld [vmem:[#allocation5 + $0x210] sm:$0xff] }
 0x534   :  { %v6074_v60 = vpack.c.bf16 %v862_v59, %v861_v58 }
 0x535   :  { %v461_v63 = vmul.f32 %v459_v61, %v451_v62  ;;  %v4764_v62 = vld [vmem:[#allocation5 + $0x248] ss:$0 sm:$0xff] }
 0x537   :  { %v471_v3 = vadd.f32 %v469_v2, %v461_v63 }
 0x539   :  { %v576_v4 = vmul.f32 %v6811_v46, %v471_v3 }
 0x555   :  { %v584_v5 = vpop.permute.xlu0 %583 }
 0x556   :  { %v586_v6 = vadd.f32 %v584_v5, %v576_v4  ;;  %v863_v5 = vld [vmem:[#allocation5 + $0x218] sm:$0xff] }
 0x558   :  { %6476 = vtanh.f32 %v586_v6 }
 0x562   :  { %v6477_v30 = vpop.eup %6476 }
 0x563   :  { %589 = vrot.lane.b32.xlu0 %v6477_v30, %s6658_s1 }
 0x5d5   :  { %v590_v40 = vpop.permute.xlu0 %589 }
 0x5d6   :  { %v592_v41 = vmul.f32 %v6811_v46, %v590_v40  ;;  %v776_v46 = vld [vmem:[#allocation5 + $0x1d8] sm:$0xff] }
 0x5d7   :  { %v6065_v51 = vpack.c.bf16 %v777_v50, %v776_v46  ;;  %v4773_v46 = vld [vmem:[#allocation5 + $0x24c] ss:$0 sm:$0xff] }
 0x5d8   :  { %594 = vrot.lane.b32.xlu1 %v592_v41, %s6661_s13 }
 0x5d9   :  { %6066 = vmatpush3.bf16.msra.mxu1 %v6065_v51 }
 0x5da   :  { %6079 = vmatprep.subr.bf16.mxu1 %v6655_v0 }
 0x64a   :  { %v595_v42 = vpop.permute.xlu1 %594 }
 0x64b   :  { %v6840_v43 = vsel %vm487_vm3, %v595_v42, %v586_v6  ;;  %v864_v6 = vld [vmem:[#allocation5 + $0x220] sm:$0xff] }
 0x64c   :  { %5352 = vmatmul.mubr.msk.f32.vlgmr.msra.gmra.mrb[6].mxu0 %vm81_vm1, %v6840_v43  ;;  %v6077_v7 = vpack.c.bf16 %v864_v6, %v863_v5 }
 0x64d   :  { %5389 = vmatprep.mubr.msk.f32.mxu0 %vm6656_vm0, %v6657_v1  ;;  %6069 = vmatpush3.bf16.msra.mxu0 %v6068_v55 }
 0x64e   :  { %6070 = vmatprep.subr.bf16.mxu0 %v6655_v0 }
 0x651   :  { %6072 = vmatpush3.bf16.msra.mxu0 %v6071_v57 }
 0x652   :  { %6073 = vmatprep.subr.bf16.mxu0 %v6655_v0 }
 0x655   :  { %6075 = vmatpush3.bf16.msra.mxu0 %v6074_v60  ;;  %v4770_v60 = vld [vmem:[#allocation5 + $0x24e] ss:$0 sm:$0xff] }
 0x656   :  { %6076 = vmatprep.subr.bf16.mxu0 %v6655_v0 }
 0x659   :  { %6078 = vmatpush3.bf16.msra.mxu0 %v6077_v7 }
 0x65a   :  { %6085 = vmatprep.subr.bf16.mxu0 %v6655_v0 }
 0x71f   :  { %v759_v61 = vpop.f32.mrb[6].mxu0 }
 0x720   :  { %v760_v63 = vadd.f32 %v759_v61, %v686_v48  ;;  %v5353_v2 = vpop.f32.mrb[7].mxu0 }
 0x722   :  { %v768_v3 = vadd.f32 %v4764_v62, %v760_v63 }
 0x724   :  { %v769_v4 = vmax.f32 %v768_v3, 0.0  ;;  %944 = vrot.lane.b32.xlu0 %v768_v3, %s6658_s1 }
 0x726   :  { %5371 = vmatmul.mubr.msk.f32.vlgmr.msra.gmra.mrb[6].mxu1 %vm81_vm1, %v769_v4 }
 0x727   :  { %5400 = vmatprep.mubr.msk.f32.mxu1 %vm6656_vm0, %v6657_v1  ;;  %6081 = vmatpush3.bf16.msra.mxu1 %v6080_v27 }
 0x728   :  { %6082 = vmatprep.subr.bf16.mxu1 %v6655_v0 }
 0x72b   :  { %6084 = vmatpush3.bf16.msra.mxu1 %v6083_v29  ;;  %v6089_v29 = vpack.c.bf16 %v1143_v26, %v1142_v25 }
 0x72c   :  { %6097 = vmatprep.subr.bf16.mxu1 %v6655_v0 }
 0x796   :  { %v945_v19 = vpop.permute.xlu0 %944 }
 0x7f9   :  { %v852_v10 = vpop.f32.mrb[6].mxu1 }
 0x7fa   :  { %v853_v11 = vadd.f32 %v4765_v8, %v852_v10  ;;  %v5372_v12 = vpop.f32.mrb[7].mxu1 }
 0x7fc   :  { %v856_v14 = vmax.f32 %v853_v11, 0.0 }
 0x7fe   :  { %5390 = vmatmul.mubr.msk.f32.vlgmr.msra.gmra.mrb[8].mxu0 %vm81_vm1, %v856_v14 }
 0x7ff   :  { %5419 = vmatprep.mubr.msk.f32.mxu0 %vm6656_vm0, %v6657_v1 }
 0x8d1   :  { %v939_v17 = vpop.f32.mrb[8].mxu0 }
 0x8d2   :  { %v940_v9 = vadd.f32 %v4767_v16, %v939_v17  ;;  %v5391_v18 = vpop.f32.mrb[9].mxu0 }
 0x8d4   :  { %v6859_v20 = vadd.f32 %v945_v19, %v940_v9  ;;  %v1140_v19 = vld [vmem:[#allocation5 + $0x290] sm:$0xff] }
 0x8d6   :  { %v948_v21 = vsel %vm413_vm2, %v6859_v20, 0.0  ;;  %v952_v22 = vmul.f32 %v6859_v20, %v6859_v20 }
 0x8d7   :  { %949 = vadd.xlane.f32.xlu0 %v948_v21  ;;  %v1141_v21 = vld [vmem:[#allocation5 + $0x298] sm:$0xff] }
 0x8d8   :  { %v953_v23 = vsel %vm413_vm2, %v952_v22, 0.0 }
 0x8d9   :  { %954 = vadd.xlane.f32.xlu1 %v953_v23  ;;  %v6086_v23 = vpack.c.bf16 %v1141_v21, %v1140_v19  ;;  %v1395_v19 = vld [vmem:[#allocation5 + $0x348] sm:$0xff] }
 0x8db   :  { %6087 = vmatpush3.bf16.msra.mxu0 %v6086_v23 }
 0x8dc   :  { %6088 = vmatprep.subr.bf16.mxu0 %v6655_v0 }
 0x8df   :  { %6090 = vmatpush3.bf16.msra.mxu0 %v6089_v29 }
 0x8e0   :  { %6091 = vmatprep.subr.bf16.mxu0 %v6655_v0 }
 0x8ea   :  { %964 = vrot.lane.b32.xlu1 %v6859_v20, %s6660_s12 }
 0x8ed   :  { %1007 = vperm.xlu0 %6461, %v6796_v13  }
 0x8ee   :  { %972 = vrot.lane.b32.xlu1 %v952_v22, %s6660_s12  ;;  %v1132_v22 = vld [vmem:[#allocation5 + $0x250] sm:$0xff] }
 0x8ef   :  { %v6098_v27 = vpack.c.bf16 %v1133_v24, %v1132_v22  ;;  %v4780_v22 = vld [vmem:[#allocation5 + $0x371] ss:$0 sm:$0xff] }
 0x964   :  { %v950_v30 = vpop.xlane.xlu0 %949 }
 0x965   :  { %v951_v31 = vmul.f32 0.03125, %v950_v30 }
 0x966   :  { %v955_v32 = vpop.xlane.xlu1 %954 }
 0x967   :  { %v957_v33 = vmul.f32 %v951_v31, %v951_v31  ;;  %v956_v34 = vmul.f32 0.03125, %v955_v32  ;;  %v959_v40 = vsub.f32 %v6859_v20, %v951_v31  ;;  %v1144_v31 = vld [vmem:[#allocation5 + $0x2b0] sm:$0xff]  ;;  %v1145_v32 = vld [vmem:[#allocation5 + $0x2b8] sm:$0xff] }
 0x969   :  { %v958_v35 = vsub.f32 %v956_v34, %v957_v33  ;;  %v1136_v33 = vld [vmem:[#allocation5 + $0x270] sm:$0xff]  ;;  %v1137_v34 = vld [vmem:[#allocation5 + $0x278] sm:$0xff] }
 0x96a   :  { %v965_v36 = vpop.permute.xlu1 %964 }
 0x96b   :  { %v960_v37 = vadd.f32 1e-05, %v958_v35  ;;  %v967_v59 = vsel %vm413_vm2, %v965_v36, 0.0  ;;  %v6092_v35 = vpack.c.bf16 %v1145_v32, %v1144_v31  ;;  %v6104_v36 = vpack.c.bf16 %v1137_v34, %v1136_v33 }
 0x96c   :  { %v1008_v47 = vpop.permute.xlu0 %1007 }
 0x96d   :  { %6478 = vrsqrt.f32 %v960_v37  ;;  %v1014_v48 = vmul.f32 %v4771_v45, %v1008_v47  ;;  %v1146_v37 = vld [vmem:[#allocation5 + $0x2c0] sm:$0xff]  ;;  %6093 = vmatpush3.bf16.msra.mxu0 %v6092_v35  ;;  %v1301_v47 = vld [vmem:[#allocation5 + $0x2d0] sm:$0xff] }
 0x96e   :  { %v973_v38 = vpop.permute.xlu1 %972  ;;  %6094 = vmatprep.subr.bf16.mxu0 %v6655_v0  ;;  %v4776_v45 = vld [vmem:[%s7349_s2 + $0x4] sm:$0x3] }
 0x96f   :  { %v975_v39 = vsel %vm413_vm2, %v973_v38, 0.0  ;;  %v1147_v38 = vld [vmem:[#allocation5 + $0x2c8] sm:$0xff] }
 0x970   :  { %976 = vadd.xlane.f32.xlu0 %v975_v39  ;;  %v1138_v39 = vld [vmem:[#allocation5 + $0x280] sm:$0xff] }
 0x977   :  { %v6479_v41 = vpop.eup %6478 }
 0x978   :  { %v962_v42 = vmul.f32 %v6479_v41, %v959_v40  ;;  %v1139_v40 = vld [vmem:[#allocation5 + $0x288] sm:$0xff] }
 0x97a   :  { %5401 = vmatmul.mubr.msk.f32.vlgmr.msra.gmra.mrb[8].mxu1 %vm487_vm3, %v962_v42  ;;  %v6095_v42 = vpack.c.bf16 %v1147_v38, %v1146_v37  ;;  %v1547_v37 = vld [vmem:[#allocation5 + $0x358] sm:$0xff]  ;;  %v1548_v38 = vld [vmem:[#allocation5 + $0x360] sm:$0xff] }
 0x97b   :  { %5438 = vmatprep.mubr.msk.f32.mxu1 %vm6656_vm0, %v6657_v1  ;;  %6099 = vmatpush3.bf16.msra.mxu1 %v6098_v27  ;;  %v6663_v27 = vmov 2  }
 0x97c   :  { %6100 = vmatprep.subr.bf16.mxu1 %v6655_v0  ;;  %6096 = vmatpush3.bf16.msra.mxu0 %v6095_v42 }
 0x97d   :  { %6109 = vmatprep.subr.bf16.mxu0 %v6655_v0  ;;  %6462 = vset.pattern.permute.xlu0 %v6663_v27 }
 0x97f   :  { %5420 = vmatmul.mubr.msk.f32.vlgmr.msra.gmra.mrb[10].mxu0 %vm81_vm1, %v4776_v45 }
 0x980   :  { %5457 = vmatprep.mubr.msk.f32.mxu0 %vm6656_vm0, %v6657_v1 }
 0x986   :  { %991 = vrot.lane.b32.xlu0 %v4769_v44, %s6661_s13  ;;  %v6107_v44 = vpack.c.bf16 %v1139_v40, %v1138_v39  ;;  %v1549_v40 = vld [vmem:[#allocation5 + $0x368] sm:$0xff] }
 0x9fd   :  { %v977_v3 = vpop.xlane.xlu0 %976 }
 0x9fe   :  { %v978_v5 = vmul.f32 0.03125, %v977_v3  ;;  %v1389_v3 = vld [vmem:[#allocation5 + $0x318] sm:$0xff] }
 0xa01   :  { %v992_v12 = vpop.permute.xlu0 %991 }
 0xa4d   :  { %v1088_v49 = vpop.f32.mrb[8].mxu1 }
 0xa4e   :  { %v1092_v50 = vadd.f32 %v1088_v49, %v1014_v48  ;;  %v5402_v51 = vpop.f32.mrb[9].mxu1  ;;  %v1302_v48 = vld [vmem:[#allocation5 + $0x2d8] sm:$0xff]  ;;  %v1303_v49 = vld [vmem:[#allocation5 + $0x2e0] sm:$0xff] }
 0xa50   :  { %v1098_v52 = vadd.f32 %v4773_v46, %v1092_v50  ;;  %v6110_v46 = vpack.c.bf16 %v1302_v48, %v1301_v47  ;;  %v1304_v50 = vld [vmem:[#allocation5 + $0x2e8] sm:$0xff] }
 0xa51   :  { %v6113_v51 = vpack.c.bf16 %v1304_v50, %v1303_v49 }
 0xa52   :  { %v4774_v53 = vmul.f32 -1.442695, %v1098_v52  ;;  %6111 = vmatpush3.bf16.msra.mxu0 %v6110_v46 }
 0xa53   :  { %6112 = vmatprep.subr.bf16.mxu0 %v6655_v0 }
 0xa54   :  { %6480 = vpow2.f32 %v4774_v53 }
 0xa56   :  { %6114 = vmatpush3.bf16.msra.mxu0 %v6113_v51 }
 0xa57   :  { %6115 = vmatprep.subr.bf16.mxu0 %v6655_v0 }
 0xa5e   :  { %v6481_v54 = vpop.eup %6480 }
 0xa5f   :  { %v1102_v55 = vadd.f32 1.0, %v6481_v54 }
 0xa61   :  { %6482 = vrcp.f32 %v1102_v55 }
 0xa6b   :  { %v6878_v56 = vpop.eup %6482 }
 0xa6c   :  { %v1105_v57 = vmul.f32 2.0, %v6878_v56 }
 0xa6e   :  { %v4775_v58 = vadd.f32 -1.0, %v1105_v57  ;;  %v1305_v57 = vld [vmem:[#allocation5 + $0x2f0] sm:$0xff] }
 0xa70   :  { %1109 = vrot.lane.b32.xlu1 %v4775_v58, %s6658_s1  ;;  %v1306_v58 = vld [vmem:[#allocation5 + $0x2f8] sm:$0xff] }
 0xa94   :  { %968 = vadd.xlane.f32.xlu1 %v967_v59  ;;  %v6116_v59 = vpack.c.bf16 %v1306_v58, %v1305_v57  ;;  %v4785_v57 = vld [vmem:[#allocation5 + $0x376] ss:$0 sm:$0xff]  ;;  %v4786_v58 = vld [vmem:[#allocation5 + $0x373] ss:$0 sm:$0xff] }
 0xa96   :  { %6117 = vmatpush3.bf16.msra.mxu0 %v6116_v59 }
 0xa97   :  { %6118 = vmatprep.subr.bf16.mxu0 %v6655_v0 }
 0xaa5   :  { %1001 = vrot.lane.b32.xlu1 %v4770_v60, %s6661_s13  ;;  %v1217_v60 = vpop.f32.mrb[10].mxu0 }
 0xae2   :  { %v1110_v61 = vpop.permute.xlu1 %1109 }
 0xae3   :  { %v1112_v62 = vmul.f32 %v6878_v56, %v1110_v61  ;;  %v5421_v61 = vpop.f32.mrb[11].mxu0 }
 0xae5   :  { %1114 = vrot.lane.b32.xlu1 %v1112_v62, %s6661_s13  ;;  %v1308_v62 = vld [vmem:[#allocation5 + $0x308] sm:$0xff] }
 0xb21   :  { %v969_v63 = vpop.xlane.xlu1 %968 }
 0xb22   :  { %v970_v2 = vmul.f32 0.03125, %v969_v63 }
 0xb24   :  { %v979_v4 = vmul.f32 %v970_v2, %v970_v2  ;;  %v981_v10 = vsub.f32 %v6859_v20, %v970_v2  ;;  %v1135_v20 = vld [vmem:[#allocation5 + $0x268] sm:$0xff]  ;;  %v1388_v2 = vld [vmem:[#allocation5 + $0x310] sm:$0xff] }
 0xb25   :  { %v1002_v15 = vpop.permute.xlu1 %1001  ;;  %v6101_v30 = vpack.c.bf16 %v1135_v20, %v1134_v28  ;;  %v4782_v28 = vld [vmem:[#allocation5 + $0x372] ss:$0 sm:$0xff] }
 0xb26   :  { %v980_v6 = vsub.f32 %v978_v5, %v979_v4  ;;  %v1390_v4 = vld [vmem:[#allocation5 + $0x320] sm:$0xff]  ;;  %v6122_v5 = vpack.c.bf16 %v1389_v3, %v1388_v2 }
 0xb27   :  { %6102 = vmatpush3.bf16.msra.mxu1 %v6101_v30 }
 0xb28   :  { %v982_v7 = vadd.f32 1e-05, %v980_v6  ;;  %6103 = vmatprep.subr.bf16.mxu1 %v6655_v0  ;;  %v1391_v6 = vld [vmem:[#allocation5 + $0x328] sm:$0xff] }
 0xb2a   :  { %6484 = vrsqrt.f32 %v982_v7  ;;  %v6125_v7 = vpack.c.bf16 %v1391_v6, %v1390_v4 }
 0xb2b   :  { %6105 = vmatpush3.bf16.msra.mxu1 %v6104_v36  ;;  %v1546_v36 = vld [vmem:[#allocation5 + $0x350] sm:$0xff] }
 0xb2c   :  { %6106 = vmatprep.subr.bf16.mxu1 %v6655_v0  ;;  %v6134_v39 = vpack.c.bf16 %v1547_v37, %v1546_v36  ;;  %v1664_v36 = vld [vmem:[#allocation5 + $0x380] sm:$0xff]  ;;  %v1673_v37 = vld [vmem:[#allocation5 + $0x3c8] sm:$0xff] }
 0xb2f   :  { %6108 = vmatpush3.bf16.msra.mxu1 %v6107_v44 }
 0xb30   :  { %6121 = vmatprep.subr.bf16.mxu1 %v6655_v0 }
 0xb34   :  { %v6485_v8 = vpop.eup %6484 }
 0xb35   :  { %v984_v11 = vmul.f32 %v6485_v8, %v981_v10  ;;  %v1392_v8 = vld [vmem:[#allocation5 + $0x330] sm:$0xff]  ;;  %v1393_v10 = vld [vmem:[#allocation5 + $0x338] sm:$0xff] }
 0xb37   :  { %v994_v14 = vmul.f32 %v992_v12, %v984_v11  ;;  %v6128_v11 = vpack.c.bf16 %v1393_v10, %v1392_v8 }
 0xb39   :  { %v1004_v16 = vadd.f32 %v1002_v15, %v994_v14  ;;  %v4779_v14 = vld [vmem:[#allocation5 + $0x370] ss:$0 sm:$0xff] }
 0xb3b   :  { %v1107_v17 = vmul.f32 %v6878_v56, %v1004_v16 }
 0xb57   :  { %v1115_v9 = vpop.permute.xlu1 %1114 }
 0xb58   :  { %v1117_v18 = vadd.f32 %v1115_v9, %v1107_v17 }
 0xb5a   :  { %6486 = vtanh.f32 %v1117_v18 }
 0xb64   :  { %v6487_v41 = vpop.eup %6486 }
 0xb65   :  { %1120 = vrot.lane.b32.xlu1 %v6487_v41, %s6658_s1  ;;  %v6137_v41 = vpack.c.bf16 %v1549_v40, %v1548_v38  ;;  %v1674_v38 = vld [vmem:[#allocation5 + $0x3d0] sm:$0xff]  ;;  %v1665_v40 = vld [vmem:[#allocation5 + $0x388] sm:$0xff] }
 0xbd7   :  { %v1121_v52 = vpop.permute.xlu1 %1120 }
 0xbd8   :  { %v1123_v53 = vmul.f32 %v6878_v56, %v1121_v52  ;;  %v1307_v56 = vld [vmem:[#allocation5 + $0x300] sm:$0xff] }
 0xbd9   :  { %v6119_v63 = vpack.c.bf16 %v1308_v62, %v1307_v56  ;;  %v4788_v56 = vld [vmem:[#allocation5 + $0x374] ss:$0 sm:$0xff] }
 0xbda   :  { %1125 = vrot.lane.b32.xlu0 %v1123_v53, %s6661_s13 }
 0xbdb   :  { %6120 = vmatpush3.bf16.msra.mxu0 %v6119_v63 }
 0xbdc   :  { %6133 = vmatprep.subr.bf16.mxu0 %v6655_v0 }
 0xc4c   :  { %v1126_v54 = vpop.permute.xlu0 %1125 }
 0xc4d   :  { %v6908_v55 = vsel %vm487_vm3, %v1126_v54, %v1117_v18  ;;  %v1394_v18 = vld [vmem:[#allocation5 + $0x340] sm:$0xff] }
 0xc4e   :  { %5439 = vmatmul.mubr.msk.f32.vlgmr.msra.gmra.mrb[10].mxu1 %vm81_vm1, %v6908_v55  ;;  %v6131_v21 = vpack.c.bf16 %v1395_v19, %v1394_v18 }
 0xc4f   :  { %5476 = vmatprep.mubr.msk.f32.mxu1 %vm6656_vm0, %v6657_v1  ;;  %6123 = vmatpush3.bf16.msra.mxu1 %v6122_v5 }
 0xc50   :  { %6124 = vmatprep.subr.bf16.mxu1 %v6655_v0 }
 0xc53   :  { %6126 = vmatpush3.bf16.msra.mxu1 %v6125_v7 }
 0xc54   :  { %6127 = vmatprep.subr.bf16.mxu1 %v6655_v0 }
 0xc57   :  { %6129 = vmatpush3.bf16.msra.mxu1 %v6128_v11  ;;  %v4784_v11 = vld [vmem:[#allocation5 + $0x375] ss:$0 sm:$0xff] }
 0xc58   :  { %6130 = vmatprep.subr.bf16.mxu1 %v6655_v0 }
 0xc5b   :  { %6132 = vmatpush3.bf16.msra.mxu1 %v6131_v21 }
 0xc5c   :  { %6139 = vmatprep.subr.bf16.mxu1 %v6655_v0 }
 0xd21   :  { %v1290_v12 = vpop.f32.mrb[10].mxu1 }
 0xd22   :  { %v1291_v15 = vadd.f32 %v1290_v12, %v1217_v60  ;;  %v5440_v16 = vpop.f32.mrb[11].mxu1 }
 0xd24   :  { %v1299_v17 = vadd.f32 %v4779_v14, %v1291_v15 }
 0xd26   :  { %v1300_v9 = vmax.f32 %v1299_v17, 0.0  ;;  %1475 = vrot.lane.b32.xlu1 %v1299_v17, %s6658_s1 }
 0xd28   :  { %5458 = vmatmul.mubr.msk.f32.vlgmr.msra.gmra.mrb[12].mxu0 %vm81_vm1, %v1300_v9 }
 0xd29   :  { %5487 = vmatprep.mubr.msk.f32.mxu0 %vm6656_vm0, %v6657_v1  ;;  %6135 = vmatpush3.bf16.msra.mxu0 %v6134_v39 }
 0xd2a   :  { %6136 = vmatprep.subr.bf16.mxu0 %v6655_v0 }
 0xd2d   :  { %6138 = vmatpush3.bf16.msra.mxu0 %v6137_v41  ;;  %v6143_v41 = vpack.c.bf16 %v1674_v38, %v1673_v37 }
 0xd2e   :  { %6151 = vmatprep.subr.bf16.mxu0 %v6655_v0 }
 0xd98   :  { %v1476_v31 = vpop.permute.xlu1 %1475 }
 0xdfb   :  { %v1383_v23 = vpop.f32.mrb[12].mxu0 }
 0xdfc   :  { %v1384_v24 = vadd.f32 %v4780_v22, %v1383_v23  ;;  %v5459_v25 = vpop.f32.mrb[13].mxu0 }
 0xdfe   :  { %v1387_v26 = vmax.f32 %v1384_v24, 0.0 }
 0xe00   :  { %5477 = vmatmul.mubr.msk.f32.vlgmr.msra.gmra.mrb[12].mxu1 %vm81_vm1, %v1387_v26 }
 0xe01   :  { %5506 = vmatprep.mubr.msk.f32.mxu1 %vm6656_vm0, %v6657_v1 }
 0xed3   :  { %v1470_v20 = vpop.f32.mrb[12].mxu1 }
 0xed4   :  { %v1471_v29 = vadd.f32 %v4782_v28, %v1470_v20  ;;  %v5478_v30 = vpop.f32.mrb[13].mxu1 }
 0xed6   :  { %v6927_v32 = vadd.f32 %v1476_v31, %v1471_v29  ;;  %v1671_v31 = vld [vmem:[#allocation5 + $0x3b8] sm:$0xff] }
 0xed8   :  { %v1479_v33 = vsel %vm413_vm2, %v6927_v32, 0.0  ;;  %v1483_v34 = vmul.f32 %v6927_v32, %v6927_v32 }
 0xed9   :  { %1480 = vadd.xlane.f32.xlu0 %v1479_v33  ;;  %v1672_v33 = vld [vmem:[#allocation5 + $0x3c0] sm:$0xff] }
 0xeda   :  { %v1484_v35 = vsel %vm413_vm2, %v1483_v34, 0.0 }
 0xedb   :  { %1485 = vadd.xlane.f32.xlu1 %v1484_v35  ;;  %v6140_v35 = vpack.c.bf16 %v1672_v33, %v1671_v31  ;;  %v1926_v31 = vld [vmem:[#allocation5 + $0x470] sm:$0xff] }
 0xedd   :  { %6141 = vmatpush3.bf16.msra.mxu1 %v6140_v35 }
 0xede   :  { %6142 = vmatprep.subr.bf16.mxu1 %v6655_v0 }
 0xee1   :  { %6144 = vmatpush3.bf16.msra.mxu1 %v6143_v41 }
 0xee2   :  { %6145 = vmatprep.subr.bf16.mxu1 %v6655_v0 }
 0xeec   :  { %1495 = vrot.lane.b32.xlu1 %v6927_v32, %s6660_s12 }
 0xeef   :  { %1538 = vperm.xlu0 %6462, %v6796_v13  }
 0xef0   :  { %1503 = vrot.lane.b32.xlu1 %v1483_v34, %s6660_s12  ;;  %v1663_v34 = vld [vmem:[#allocation5 + $0x378] sm:$0xff] }
 0xef1   :  { %v6152_v39 = vpack.c.bf16 %v1664_v36, %v1663_v34  ;;  %v4795_v34 = vld [vmem:[#allocation5 + $0x499] ss:$0 sm:$0xff] }
 0xf66   :  { %v1481_v42 = vpop.xlane.xlu0 %1480 }
 0xf67   :  { %v1482_v44 = vmul.f32 0.03125, %v1481_v42 }
 0xf68   :  { %v1486_v45 = vpop.xlane.xlu1 %1485 }
 0xf69   :  { %v1488_v47 = vmul.f32 %v1482_v44, %v1482_v44  ;;  %v1487_v48 = vmul.f32 0.03125, %v1486_v45  ;;  %v1490_v52 = vsub.f32 %v6927_v32, %v1482_v44  ;;  %v1675_v44 = vld [vmem:[#allocation5 + $0x3d8] sm:$0xff]  ;;  %v1676_v45 = vld [vmem:[#allocation5 + $0x3e0] sm:$0xff] }
 0xf6b   :  { %v1489_v13 = vsub.f32 %v1487_v48, %v1488_v47  ;;  %v1667_v47 = vld [vmem:[#allocation5 + $0x398] sm:$0xff]  ;;  %v1668_v48 = vld [vmem:[#allocation5 + $0x3a0] sm:$0xff] }
 0xf6c   :  { %v1496_v49 = vpop.permute.xlu1 %1495 }
 0xf6d   :  { %v1491_v46 = vadd.f32 1e-05, %v1489_v13  ;;  %v1498_v10 = vsel %vm413_vm2, %v1496_v49, 0.0  ;;  %v6146_v13 = vpack.c.bf16 %v1676_v45, %v1675_v44  ;;  %v6158_v49 = vpack.c.bf16 %v1668_v48, %v1667_v47 }
 0xf6e   :  { %v1539_v59 = vpop.permute.xlu0 %1538 }
 0xf6f   :  { %6488 = vrsqrt.f32 %v1491_v46  ;;  %v1545_v60 = vmul.f32 %v4786_v58, %v1539_v59  ;;  %v1677_v46 = vld [vmem:[#allocation5 + $0x3e8] sm:$0xff]  ;;  %6147 = vmatpush3.bf16.msra.mxu1 %v6146_v13  ;;  %v4791_v58 = vld [vmem:[%s7349_s2 + $0x6] sm:$0x3]  ;;  %v1832_v59 = vld [vmem:[#allocation5 + $0x3f8] sm:$0xff] }
 0xf70   :  { %v1504_v50 = vpop.permute.xlu1 %1503  ;;  %6148 = vmatprep.subr.bf16.mxu1 %v6655_v0 }
 0xf71   :  { %v1506_v51 = vsel %vm413_vm2, %v1504_v50, 0.0  ;;  %v1678_v50 = vld [vmem:[#allocation5 + $0x3f0] sm:$0xff] }
 0xf72   :  { %1507 = vadd.xlane.f32.xlu0 %v1506_v51  ;;  %v1669_v51 = vld [vmem:[#allocation5 + $0x3a8] sm:$0xff] }
 0xf79   :  { %v6489_v53 = vpop.eup %6488 }
 0xf7a   :  { %v1493_v54 = vmul.f32 %v6489_v53, %v1490_v52  ;;  %v1670_v52 = vld [vmem:[#allocation5 + $0x3b0] sm:$0xff] }
 0xf7c   :  { %5488 = vmatmul.mubr.msk.f32.vlgmr.msra.gmra.mrb[14].mxu0 %vm487_vm3, %v1493_v54  ;;  %v6149_v54 = vpack.c.bf16 %v1678_v50, %v1677_v46  ;;  %v2078_v46 = vld [vmem:[#allocation5 + $0x480] sm:$0xff]  ;;  %v2079_v50 = vld [vmem:[#allocation5 + $0x488] sm:$0xff] }
 0xf7d   :  { %5525 = vmatprep.mubr.msk.f32.mxu0 %vm6656_vm0, %v6657_v1  ;;  %6153 = vmatpush3.bf16.msra.mxu0 %v6152_v39  ;;  %v6664_v39 = vmov 3  }
 0xf7e   :  { %6154 = vmatprep.subr.bf16.mxu0 %v6655_v0  ;;  %6150 = vmatpush3.bf16.msra.mxu1 %v6149_v54 }
 0xf7f   :  { %6163 = vmatprep.subr.bf16.mxu1 %v6655_v0  ;;  %6463 = vset.pattern.permute.xlu0 %v6664_v39 }
 0xf81   :  { %5507 = vmatmul.mubr.msk.f32.vlgmr.msra.gmra.mrb[14].mxu1 %vm81_vm1, %v4791_v58 }
 0xf82   :  { %5544 = vmatprep.mubr.msk.f32.mxu1 %vm6656_vm0, %v6657_v1 }
 0xf88   :  { %1532 = vrot.lane.b32.xlu0 %v4785_v57, %s6661_s13  ;;  %v6161_v57 = vpack.c.bf16 %v1670_v52, %v1669_v51  ;;  %v7005_v51 = vld [vmem:[#allocation2] sm:$0x3] }
 0xfff   :  { %v1508_v17 = vpop.xlane.xlu0 %1507 }
0x1000   :  { %v1509_v18 = vmul.f32 0.03125, %v1508_v17  ;;  %v1920_v17 = vld [vmem:[#allocation5 + $0x440] sm:$0xff] }
0x1003   :  { %v1533_v27 = vpop.permute.xlu0 %1532 }
0x104f   :  { %v1619_v61 = vpop.f32.mrb[14].mxu0 }
0x1050   :  { %v1623_v62 = vadd.f32 %v1619_v61, %v1545_v60  ;;  %v5489_v63 = vpop.f32.mrb[15].mxu0  ;;  %v1833_v60 = vld [vmem:[#allocation5 + $0x400] sm:$0xff]  ;;  %v1834_v61 = vld [vmem:[#allocation5 + $0x408] sm:$0xff] }
0x1052   :  { %v1629_v2 = vadd.f32 %v4788_v56, %v1623_v62  ;;  %v6164_v56 = vpack.c.bf16 %v1833_v60, %v1832_v59  ;;  %v1835_v62 = vld [vmem:[#allocation5 + $0x410] sm:$0xff] }
0x1053   :  { %v6167_v63 = vpack.c.bf16 %v1835_v62, %v1834_v61 }
0x1054   :  { %v4789_v3 = vmul.f32 -1.442695, %v1629_v2  ;;  %6165 = vmatpush3.bf16.msra.mxu1 %v6164_v56 }
0x1055   :  { %6166 = vmatprep.subr.bf16.mxu1 %v6655_v0 }
0x1056   :  { %6490 = vpow2.f32 %v4789_v3 }
0x1058   :  { %6168 = vmatpush3.bf16.msra.mxu1 %v6167_v63 }
0x1059   :  { %6169 = vmatprep.subr.bf16.mxu1 %v6655_v0 }
0x1060   :  { %v6491_v4 = vpop.eup %6490 }
0x1061   :  { %v1633_v5 = vadd.f32 1.0, %v6491_v4 }
0x1063   :  { %6492 = vrcp.f32 %v1633_v5 }
0x106d   :  { %v6946_v6 = vpop.eup %6492 }
0x106e   :  { %v1636_v7 = vmul.f32 2.0, %v6946_v6 }
0x1070   :  { %v4790_v8 = vadd.f32 -1.0, %v1636_v7  ;;  %v1836_v7 = vld [vmem:[#allocation5 + $0x418] sm:$0xff] }
0x1072   :  { %1640 = vrot.lane.b32.xlu1 %v4790_v8, %s6658_s1  ;;  %v1837_v8 = vld [vmem:[#allocation5 + $0x420] sm:$0xff] }
0x1096   :  { %1499 = vadd.xlane.f32.xlu1 %v1498_v10  ;;  %v6170_v10 = vpack.c.bf16 %v1837_v8, %v1836_v7 }
0x1098   :  { %6171 = vmatpush3.bf16.msra.mxu1 %v6170_v10  ;;  %v4800_v10 = vld [vmem:[#allocation5 + $0x49e] ss:$0 sm:$0xff] }
0x1099   :  { %6172 = vmatprep.subr.bf16.mxu1 %v6655_v0 }
0x10a7   :  { %1522 = vrot.lane.b32.xlu1 %v4784_v11, %s6661_s13  ;;  %v1748_v11 = vpop.f32.mrb[14].mxu1 }
0x10e4   :  { %v1641_v12 = vpop.permute.xlu1 %1640 }
0x10e5   :  { %v1643_v14 = vmul.f32 %v6946_v6, %v1641_v12  ;;  %v5508_v12 = vpop.f32.mrb[15].mxu1 }
0x10e7   :  { %1645 = vrot.lane.b32.xlu1 %v1643_v14, %s6661_s13  ;;  %v1839_v14 = vld [vmem:[#allocation5 + $0x430] sm:$0xff] }
0x1123   :  { %v1500_v15 = vpop.xlane.xlu1 %1499 }
0x1124   :  { %v1501_v16 = vmul.f32 0.03125, %v1500_v15 }
0x1126   :  { %v1510_v9 = vmul.f32 %v1501_v16, %v1501_v16  ;;  %v1512_v23 = vsub.f32 %v6927_v32, %v1501_v16  ;;  %v1666_v32 = vld [vmem:[#allocation5 + $0x390] sm:$0xff]  ;;  %v1919_v16 = vld [vmem:[#allocation5 + $0x438] sm:$0xff] }
0x1127   :  { %v1523_v25 = vpop.permute.xlu1 %1522  ;;  %v6155_v42 = vpack.c.bf16 %v1666_v32, %v1665_v40  ;;  %v4797_v40 = vld [vmem:[#allocation5 + $0x49a] ss:$0 sm:$0xff] }
0x1128   :  { %v1511_v19 = vsub.f32 %v1509_v18, %v1510_v9  ;;  %v1921_v9 = vld [vmem:[#allocation5 + $0x448] sm:$0xff]  ;;  %v6176_v18 = vpack.c.bf16 %v1920_v17, %v1919_v16 }
0x1129   :  { %6156 = vmatpush3.bf16.msra.mxu0 %v6155_v42 }
0x112a   :  { %v1513_v21 = vadd.f32 1e-05, %v1511_v19  ;;  %6157 = vmatprep.subr.bf16.mxu0 %v6655_v0  ;;  %v1922_v19 = vld [vmem:[#allocation5 + $0x450] sm:$0xff] }
0x112c   :  { %6494 = vrsqrt.f32 %v1513_v21  ;;  %v6179_v21 = vpack.c.bf16 %v1922_v19, %v1921_v9 }
0x112d   :  { %6159 = vmatpush3.bf16.msra.mxu0 %v6158_v49  ;;  %v2077_v49 = vld [vmem:[#allocation5 + $0x478] sm:$0xff] }
0x112e   :  { %6160 = vmatprep.subr.bf16.mxu0 %v6655_v0  ;;  %v6188_v52 = vpack.c.bf16 %v2078_v46, %v2077_v49  ;;  %v2194_v49 = vld [vmem:[#allocation5 + $0x4a0] sm:$0xff] }
0x1131   :  { %6162 = vmatpush3.bf16.msra.mxu0 %v6161_v57 }
0x1132   :  { %6175 = vmatprep.subr.bf16.mxu0 %v6655_v0 }
0x1136   :  { %v6495_v22 = vpop.eup %6494 }
0x1137   :  { %v1515_v24 = vmul.f32 %v6495_v22, %v1512_v23  ;;  %v1923_v22 = vld [vmem:[#allocation5 + $0x458] sm:$0xff]  ;;  %v1924_v23 = vld [vmem:[#allocation5 + $0x460] sm:$0xff] }
0x1139   :  { %v1525_v26 = vmul.f32 %v1523_v25, %v1515_v24  ;;  %v6182_v24 = vpack.c.bf16 %v1924_v23, %v1923_v22 }
0x113b   :  { %v1535_v28 = vadd.f32 %v1533_v27, %v1525_v26  ;;  %v4794_v26 = vld [vmem:[#allocation5 + $0x498] ss:$0 sm:$0xff] }
0x113d   :  { %v1638_v20 = vmul.f32 %v6946_v6, %v1535_v28 }
0x1159   :  { %v1646_v29 = vpop.permute.xlu1 %1645 }
0x115a   :  { %v1648_v30 = vadd.f32 %v1646_v29, %v1638_v20 }
0x115c   :  { %6496 = vtanh.f32 %v1648_v30 }
0x1166   :  { %v6497_v53 = vpop.eup %6496 }
0x1167   :  { %1651 = vrot.lane.b32.xlu1 %v6497_v53, %s6658_s1  ;;  %v2080_v53 = vld [vmem:[#allocation5 + $0x490] sm:$0xff] }
0x1168   :  { %v6191_v54 = vpack.c.bf16 %v2080_v53, %v2079_v50  ;;  %v2195_v50 = vld [vmem:[#allocation5 + $0x4a8] sm:$0xff]  ;;  %v2205_v53 = vld [vmem:[#allocation5 + $0x4f8] sm:$0xff] }
0x11d9   :  { %v1652_v2 = vpop.permute.xlu1 %1651 }
0x11da   :  { %v1654_v3 = vmul.f32 %v6946_v6, %v1652_v2  ;;  %v1838_v6 = vld [vmem:[#allocation5 + $0x428] sm:$0xff] }
0x11db   :  { %v6173_v15 = vpack.c.bf16 %v1839_v14, %v1838_v6 }
0x11dc   :  { %1656 = vrot.lane.b32.xlu1 %v1654_v3, %s6661_s13 }
0x11dd   :  { %6174 = vmatpush3.bf16.msra.mxu1 %v6173_v15  ;;  %v4803_v15 = vld [vmem:[#allocation5 + $0x49c] ss:$0 sm:$0xff] }
0x11de   :  { %6187 = vmatprep.subr.bf16.mxu1 %v6655_v0 }
0x124e   :  { %v1657_v4 = vpop.permute.xlu1 %1656 }
0x124f   :  { %v6976_v5 = vsel %vm487_vm3, %v1657_v4, %v1648_v30  ;;  %v1925_v30 = vld [vmem:[#allocation5 + $0x468] sm:$0xff] }
0x1250   :  { %5526 = vmatmul.mubr.msk.f32.vlgmr.msra.gmra.mrb[16].mxu0 %vm81_vm1, %v6976_v5  ;;  %v6185_v33 = vpack.c.bf16 %v1926_v31, %v1925_v30 }
0x1251   :  { %5563 = vmatprep.mubr.msk.f32.mxu0 %vm6656_vm0, %v6657_v1  ;;  %6177 = vmatpush3.bf16.msra.mxu0 %v6176_v18 }
0x1252   :  { %6178 = vmatprep.subr.bf16.mxu0 %v6655_v0 }
0x1255   :  { %6180 = vmatpush3.bf16.msra.mxu0 %v6179_v21 }
0x1256   :  { %6181 = vmatprep.subr.bf16.mxu0 %v6655_v0 }
0x1259   :  { %6183 = vmatpush3.bf16.msra.mxu0 %v6182_v24 }
0x125a   :  { %6184 = vmatprep.subr.bf16.mxu0 %v6655_v0 }
0x125d   :  { %6186 = vmatpush3.bf16.msra.mxu0 %v6185_v33 }
0x125e   :  { %6193 = vmatprep.subr.bf16.mxu0 %v6655_v0 }
0x1323   :  { %v1821_v25 = vpop.f32.mrb[16].mxu0 }
0x1324   :  { %v1822_v27 = vadd.f32 %v1821_v25, %v1748_v11  ;;  %v5527_v28 = vpop.f32.mrb[17].mxu0  ;;  %v4801_v11 = vld [vmem:[#allocation5 + $0x49b] ss:$0 sm:$0xff] }
0x1326   :  { %v1830_v20 = vadd.f32 %v4794_v26, %v1822_v27  ;;  %v4799_v26 = vld [vmem:[#allocation5 + $0x49d] ss:$0 sm:$0xff] }
0x1328   :  { %v1831_v29 = vmax.f32 %v1830_v20, 0.0  ;;  %2006 = vrot.lane.b32.xlu0 %v1830_v20, %s6658_s1 }
0x132a   :  { %5545 = vmatmul.mubr.msk.f32.vlgmr.msra.gmra.mrb[16].mxu1 %vm81_vm1, %v1831_v29 }
0x132b   :  { %5574 = vmatprep.mubr.msk.f32.mxu1 %vm6656_vm0, %v6657_v1  ;;  %6189 = vmatpush3.bf16.msra.mxu1 %v6188_v52  ;;  %v2204_v52 = vld [vmem:[#allocation5 + $0x4f0] sm:$0xff] }
0x132c   :  { %6190 = vmatprep.subr.bf16.mxu1 %v6655_v0 }
0x132f   :  { %6192 = vmatpush3.bf16.msra.mxu1 %v6191_v54  ;;  %v6206_v54 = vpack.c.bf16 %v2195_v50, %v2194_v49  ;;  %v2457_v49 = vld [vmem:[#allocation5 + $0x598] sm:$0xff]  ;;  %v4810_v50 = vld [vmem:[#allocation5 + $0x5c1] ss:$0 sm:$0xff] }
0x1330   :  { %6205 = vmatprep.subr.bf16.mxu1 %v6655_v0 }
0x139a   :  { %v2007_v44 = vpop.permute.xlu0 %2006 }
0x13fd   :  { %v1914_v35 = vpop.f32.mrb[16].mxu1 }
0x13fe   :  { %v1915_v36 = vadd.f32 %v4795_v34, %v1914_v35  ;;  %v5546_v37 = vpop.f32.mrb[17].mxu1 }
0x1400   :  { %v1918_v38 = vmax.f32 %v1915_v36, 0.0 }
0x1402   :  { %5564 = vmatmul.mubr.msk.f32.vlgmr.msra.gmra.mrb[18].mxu0 %vm81_vm1, %v1918_v38 }
0x1403   :  { %5593 = vmatprep.mubr.msk.f32.mxu0 %vm6656_vm0, %v6657_v1 }
0x14d5   :  { %v2001_v32 = vpop.f32.mrb[18].mxu0 }
0x14d6   :  { %v2002_v41 = vadd.f32 %v4797_v40, %v2001_v32  ;;  %v5565_v42 = vpop.f32.mrb[19].mxu0 }
0x14d8   :  { %v6995_v45 = vadd.f32 %v2007_v44, %v2002_v41 }
0x14da   :  { %v2010_v47 = vsel %vm413_vm2, %v6995_v45, 0.0  ;;  %v2014_v48 = vmul.f32 %v6995_v45, %v6995_v45 }
0x14db   :  { %2011 = vadd.xlane.f32.xlu1 %v2010_v47 }
0x14dc   :  { %v2015_v13 = vsel %vm413_vm2, %v2014_v48, 0.0 }
0x14dd   :  { %2016 = vadd.xlane.f32.xlu0 %v2015_v13  ;;  %v2203_v13 = vld [vmem:[#allocation5 + $0x4e8] sm:$0xff] }
0x14ec   :  { %2026 = vrot.lane.b32.xlu1 %v6995_v45, %s6660_s12 }
0x14f0   :  { %2034 = vrot.lane.b32.xlu1 %v2014_v48, %s6660_s12  ;;  %v2202_v48 = vld [vmem:[#allocation5 + $0x4e0] sm:$0xff] }
0x14f1   :  { %v6194_v46 = vpack.c.bf16 %v2203_v13, %v2202_v48  ;;  %v2456_v13 = vld [vmem:[#allocation5 + $0x590] sm:$0xff] }
0x14f3   :  { %2069 = vperm.xlu0 %6463, %v7005_v51   ;;  %6195 = vmatpush3.bf16.msra.mxu0 %v6194_v46  ;;  %v6239_v46 = vpack.c.bf16 %v2457_v49, %v2456_v13 }
0x14f4   :  { %6196 = vmatprep.subr.bf16.mxu0 %v6655_v0 }
0x1568   :  { %v2012_v57 = vpop.xlane.xlu1 %2011 }
0x1569   :  { %v2013_v58 = vmul.f32 0.03125, %v2012_v57  ;;  %v2196_v57 = vld [vmem:[#allocation5 + $0x4b0] sm:$0xff] }
0x156a   :  { %v2017_v59 = vpop.xlane.xlu0 %2016 }
0x156b   :  { %v2019_v60 = vmul.f32 %v2013_v58, %v2013_v58  ;;  %v2018_v61 = vmul.f32 0.03125, %v2017_v59  ;;  %v2021_v4 = vsub.f32 %v6995_v45, %v2013_v58  ;;  %v6197_v58 = vpack.c.bf16 %v2205_v53, %v2204_v52 }
0x156c   :  { %v2027_v56 = vpop.permute.xlu1 %2026 }
0x156d   :  { %v2020_v62 = vsub.f32 %v2018_v61, %v2019_v60  ;;  %v2029_v25 = vsel %vm413_vm2, %v2027_v56, 0.0  ;;  %v2206_v60 = vld [vmem:[#allocation5 + $0x500] sm:$0xff]  ;;  %v2207_v61 = vld [vmem:[#allocation5 + $0x508] sm:$0xff]  ;;  %6198 = vmatpush3.bf16.msra.mxu0 %v6197_v58 }
0x156e   :  { %v2198_v56 = vld [vmem:[#allocation5 + $0x4c0] sm:$0xff]  ;;  %6199 = vmatprep.subr.bf16.mxu0 %v6655_v0 }
0x156f   :  { %v2022_v63 = vadd.f32 1e-05, %v2020_v62  ;;  %v2199_v62 = vld [vmem:[#allocation5 + $0x4c8] sm:$0xff]  ;;  %v4812_v58 = vld [vmem:[#allocation5 + $0x5c2] ss:$0 sm:$0xff] }
0x1570   :  { %v2035_v2 = vpop.permute.xlu1 %2034 }
0x1571   :  { %6498 = vrsqrt.f32 %v2022_v63  ;;  %v2037_v3 = vsel %vm413_vm2, %v2035_v2, 0.0  ;;  %v6200_v63 = vpack.c.bf16 %v2207_v61, %v2206_v60  ;;  %v6212_v2 = vpack.c.bf16 %v2199_v62, %v2198_v56 }
0x1572   :  { %2038 = vadd.xlane.f32.xlu0 %v2037_v3  ;;  %v2070_v12 = vpop.permute.xlu0 %2069  ;;  %v2208_v3 = vld [vmem:[#allocation5 + $0x510] sm:$0xff] }
0x1573   :  { %v2076_v6 = vmul.f32 %v4801_v11, %v2070_v12  ;;  %6201 = vmatpush3.bf16.msra.mxu0 %v6200_v63 }
0x1574   :  { %6202 = vmatprep.subr.bf16.mxu0 %v6655_v0 }
0x157b   :  { %v6499_v7 = vpop.eup %6498 }
0x157c   :  { %v2024_v8 = vmul.f32 %v6499_v7, %v2021_v4  ;;  %v2209_v4 = vld [vmem:[#allocation5 + $0x518] sm:$0xff]  ;;  %v2200_v7 = vld [vmem:[#allocation5 + $0x4d0] sm:$0xff] }
0x157d   :  { %v6203_v11 = vpack.c.bf16 %v2209_v4, %v2208_v3  ;;  %v2608_v4 = vld [vmem:[#allocation5 + $0x5a0] sm:$0xff] }
0x157e   :  { %5575 = vmatmul.mubr.msk.f32.vlgmr.msra.gmra.mrb[18].mxu1 %vm487_vm3, %v2024_v8  ;;  %v2201_v8 = vld [vmem:[#allocation5 + $0x4d8] sm:$0xff] }
0x157f   :  { %5612 = vmatprep.mubr.msk.f32.mxu1 %vm6656_vm0, %v6657_v1  ;;  %6207 = vmatpush3.bf16.msra.mxu1 %v6206_v54  ;;  %v6215_v12 = vpack.c.bf16 %v2201_v8, %v2200_v7  ;;  %v2609_v7 = vld [vmem:[#allocation5 + $0x5a8] sm:$0xff]  ;;  %v2610_v8 = vld [vmem:[#allocation5 + $0x5b0] sm:$0xff] }
0x1580   :  { %6208 = vmatprep.subr.bf16.mxu1 %v6655_v0  ;;  %6204 = vmatpush3.bf16.msra.mxu0 %v6203_v11  ;;  %v2611_v11 = vld [vmem:[#allocation5 + $0x5b8] sm:$0xff] }
0x1581   :  { %6217 = vmatprep.subr.bf16.mxu0 %v6655_v0 }
0x1588   :  { %2063 = vrot.lane.b32.xlu0 %v4800_v10, %s6661_s13 }
0x15ff   :  { %v2039_v30 = vpop.xlane.xlu0 %2038 }
0x1600   :  { %v2040_v33 = vmul.f32 0.03125, %v2039_v30 }
0x1603   :  { %v2064_v32 = vpop.permute.xlu0 %2063 }
0x1651   :  { %v2150_v14 = vpop.f32.mrb[18].mxu1 }
0x1652   :  { %v2154_v16 = vadd.f32 %v2150_v14, %v2076_v6  ;;  %v5576_v17 = vpop.f32.mrb[19].mxu1  ;;  %v4806_v6 = vld [vmem:[%s7349_s2 + $0x8] sm:$0x3] }
0x1653   :  { %5594 = vmatmul.mubr.msk.f32.vlgmr.msra.gmra.mrb[20].mxu0 %vm81_vm1, %v4806_v6  ;;  %v2363_v14 = vld [vmem:[#allocation5 + $0x520] sm:$0xff] }
0x1654   :  { %v2160_v9 = vadd.f32 %v4803_v15, %v2154_v16  ;;  %v2364_v15 = vld [vmem:[#allocation5 + $0x528] sm:$0xff]  ;;  %v2365_v16 = vld [vmem:[#allocation5 + $0x530] sm:$0xff]  ;;  %5631 = vmatprep.mubr.msk.f32.mxu0 %vm6656_vm0, %v6657_v1 }
0x1655   :  { %v6218_v17 = vpack.c.bf16 %v2364_v15, %v2363_v14 }
0x1656   :  { %v4804_v18 = vmul.f32 -1.442695, %v2160_v9  ;;  %v2366_v9 = vld [vmem:[#allocation5 + $0x538] sm:$0xff] }
0x1657   :  { %6219 = vmatpush3.bf16.msra.mxu0 %v6218_v17 }
0x1658   :  { %6500 = vpow2.f32 %v4804_v18  ;;  %v6221_v18 = vpack.c.bf16 %v2366_v9, %v2365_v16  ;;  %6220 = vmatprep.subr.bf16.mxu0 %v6655_v0 }
0x165b   :  { %6222 = vmatpush3.bf16.msra.mxu0 %v6221_v18 }
0x165c   :  { %6223 = vmatprep.subr.bf16.mxu0 %v6655_v0 }
0x1662   :  { %v6501_v19 = vpop.eup %6500 }
0x1663   :  { %v2164_v21 = vadd.f32 1.0, %v6501_v19 }
0x1665   :  { %6502 = vrcp.f32 %v2164_v21 }
0x166f   :  { %v7016_v22 = vpop.eup %6502 }
0x1670   :  { %v2167_v23 = vmul.f32 2.0, %v7016_v22 }
0x1672   :  { %v4805_v24 = vadd.f32 -1.0, %v2167_v23 }
0x1674   :  { %2171 = vrot.lane.b32.xlu1 %v4805_v24, %s6658_s1 }
0x1698   :  { %2030 = vadd.xlane.f32.xlu1 %v2029_v25  ;;  %v2367_v25 = vld [vmem:[#allocation5 + $0x540] sm:$0xff] }
0x16a9   :  { %2053 = vrot.lane.b32.xlu1 %v4799_v26, %s6661_s13  ;;  %v2368_v26 = vld [vmem:[#allocation5 + $0x548] sm:$0xff] }
0x16e6   :  { %v2172_v27 = vpop.permute.xlu1 %2171 }
0x16e7   :  { %v2174_v28 = vmul.f32 %v7016_v22, %v2172_v27  ;;  %v6224_v27 = vpack.c.bf16 %v2368_v26, %v2367_v25 }
0x16e9   :  { %2176 = vrot.lane.b32.xlu1 %v2174_v28, %s6661_s13  ;;  %6225 = vmatpush3.bf16.msra.mxu0 %v6224_v27 }
0x16ea   :  { %6226 = vmatprep.subr.bf16.mxu0 %v6655_v0 }
0x1725   :  { %v2031_v20 = vpop.xlane.xlu1 %2030 }
0x1726   :  { %v2032_v29 = vmul.f32 0.03125, %v2031_v20  ;;  %v2279_v28 = vpop.f32.mrb[20].mxu0 }
0x1727   :  { %v5595_v20 = vpop.f32.mrb[21].mxu0 }
0x1728   :  { %v2041_v31 = vmul.f32 %v2032_v29, %v2032_v29  ;;  %v2043_v37 = vsub.f32 %v6995_v45, %v2032_v29  ;;  %v2197_v45 = vld [vmem:[#allocation5 + $0x4b8] sm:$0xff]  ;;  %v4816_v20 = vld [vmem:[#allocation5 + $0x5c3] ss:$0 sm:$0xff] }
0x1729   :  { %v2054_v39 = vpop.permute.xlu1 %2053  ;;  %v6209_v59 = vpack.c.bf16 %v2197_v45, %v2196_v57  ;;  %v2370_v29 = vld [vmem:[#allocation5 + $0x558] sm:$0xff]  ;;  %v6665_v45 = vmov 4  }
0x172a   :  { %v2042_v34 = vsub.f32 %v2040_v33, %v2041_v31  ;;  %v2450_v31 = vld [vmem:[#allocation5 + $0x560] sm:$0xff]  ;;  %v2451_v33 = vld [vmem:[#allocation5 + $0x568] sm:$0xff]  ;;  %6464 = vset.pattern.permute.xlu0 %v6665_v45 }
0x172b   :  { %6210 = vmatpush3.bf16.msra.mxu1 %v6209_v59 }
0x172c   :  { %v2044_v35 = vadd.f32 1e-05, %v2042_v34  ;;  %6211 = vmatprep.subr.bf16.mxu1 %v6655_v0  ;;  %v2452_v34 = vld [vmem:[#allocation5 + $0x570] sm:$0xff] }
0x172e   :  { %6504 = vrsqrt.f32 %v2044_v35  ;;  %v6230_v35 = vpack.c.bf16 %v2451_v33, %v2450_v31  ;;  %v4818_v31 = vld [vmem:[#allocation5 + $0x5c4] ss:$0 sm:$0xff] }
0x172f   :  { %6213 = vmatpush3.bf16.msra.mxu1 %v6212_v2 }
0x1730   :  { %6214 = vmatprep.subr.bf16.mxu1 %v6655_v0 }
0x1733   :  { %6216 = vmatpush3.bf16.msra.mxu1 %v6215_v12  ;;  %v6245_v12 = vpack.c.bf16 %v2611_v11, %v2610_v8  ;;  %v2735_v11 = vld [vmem:[#allocation5 + $0x618] sm:$0xff] }
0x1734   :  { %6229 = vmatprep.subr.bf16.mxu1 %v6655_v0 }
0x1738   :  { %v6505_v36 = vpop.eup %6504 }
0x1739   :  { %v2046_v38 = vmul.f32 %v6505_v36, %v2043_v37  ;;  %v2453_v36 = vld [vmem:[#allocation5 + $0x578] sm:$0xff] }
0x173a   :  { %v6233_v37 = vpack.c.bf16 %v2453_v36, %v2452_v34 }
0x173b   :  { %v2056_v40 = vmul.f32 %v2054_v39, %v2046_v38  ;;  %v2454_v38 = vld [vmem:[#allocation5 + $0x580] sm:$0xff]  ;;  %v2455_v39 = vld [vmem:[#allocation5 + $0x588] sm:$0xff] }
0x173d   :  { %v2066_v41 = vadd.f32 %v2064_v32, %v2056_v40  ;;  %v6236_v40 = vpack.c.bf16 %v2455_v39, %v2454_v38 }
0x173f   :  { %v2169_v42 = vmul.f32 %v7016_v22, %v2066_v41  ;;  %v4809_v41 = vld [vmem:[#allocation5 + $0x5c0] ss:$0 sm:$0xff] }
0x175b   :  { %v2177_v44 = vpop.permute.xlu1 %2176 }
0x175c   :  { %v2179_v47 = vadd.f32 %v2177_v44, %v2169_v42 }
0x175e   :  { %6506 = vtanh.f32 %v2179_v47 }
0x1768   :  { %v6507_v10 = vpop.eup %6506 }
0x1769   :  { %2182 = vrot.lane.b32.xlu1 %v6507_v10, %s6658_s1  ;;  %v6242_v10 = vpack.c.bf16 %v2609_v7, %v2608_v4  ;;  %v2734_v4 = vld [vmem:[#allocation5 + $0x610] sm:$0xff]  ;;  %v2725_v7 = vld [vmem:[#allocation5 + $0x5c8] sm:$0xff] }
0x17db   :  { %v2183_v19 = vpop.permute.xlu1 %2182 }
0x17dc   :  { %v2185_v21 = vmul.f32 %v7016_v22, %v2183_v19  ;;  %v2369_v22 = vld [vmem:[#allocation5 + $0x550] sm:$0xff] }
0x17dd   :  { %v6227_v30 = vpack.c.bf16 %v2370_v29, %v2369_v22 }
0x17de   :  { %2187 = vrot.lane.b32.xlu1 %v2185_v21, %s6661_s13 }
0x17df   :  { %6228 = vmatpush3.bf16.msra.mxu0 %v6227_v30 }
0x17e0   :  { %6241 = vmatprep.subr.bf16.mxu0 %v6655_v0 }
0x1850   :  { %v2188_v23 = vpop.permute.xlu1 %2187 }
0x1851   :  { %v7046_v24 = vsel %vm487_vm3, %v2188_v23, %v2179_v47 }
0x1852   :  { %5613 = vmatmul.mubr.msk.f32.vlgmr.msra.gmra.mrb[20].mxu1 %vm81_vm1, %v7046_v24 }
0x1853   :  { %5650 = vmatprep.mubr.msk.f32.mxu1 %vm6656_vm0, %v6657_v1  ;;  %6231 = vmatpush3.bf16.msra.mxu1 %v6230_v35 }
0x1854   :  { %6232 = vmatprep.subr.bf16.mxu1 %v6655_v0 }
0x1857   :  { %6234 = vmatpush3.bf16.msra.mxu1 %v6233_v37 }
0x1858   :  { %6235 = vmatprep.subr.bf16.mxu1 %v6655_v0 }
0x185b   :  { %6237 = vmatpush3.bf16.msra.mxu1 %v6236_v40 }
0x185c   :  { %6238 = vmatprep.subr.bf16.mxu1 %v6655_v0 }
0x185f   :  { %6240 = vmatpush3.bf16.msra.mxu1 %v6239_v46 }
0x1860   :  { %6247 = vmatprep.subr.bf16.mxu1 %v6655_v0 }
0x1925   :  { %v2352_v32 = vpop.f32.mrb[20].mxu1 }
0x1926   :  { %v2353_v42 = vadd.f32 %v2352_v32, %v2279_v28  ;;  %v5614_v44 = vpop.f32.mrb[21].mxu1  ;;  %v4815_v28 = vld [vmem:[#allocation5 + $0x5c6] ss:$0 sm:$0xff] }
0x1928   :  { %v2361_v47 = vadd.f32 %v4809_v41, %v2353_v42  ;;  %v4814_v42 = vld [vmem:[#allocation5 + $0x5c5] ss:$0 sm:$0xff] }
0x192a   :  { %v2362_v48 = vmax.f32 %v2361_v47, 0.0  ;;  %2537 = vrot.lane.b32.xlu1 %v2361_v47, %s6658_s1 }
0x192c   :  { %5632 = vmatmul.mubr.msk.f32.vlgmr.msra.gmra.mrb[22].mxu0 %vm81_vm1, %v2362_v48 }
0x192d   :  { %5661 = vmatprep.mubr.msk.f32.mxu0 %vm6656_vm0, %v6657_v1  ;;  %6243 = vmatpush3.bf16.msra.mxu0 %v6242_v10  ;;  %v2726_v10 = vld [vmem:[#allocation5 + $0x5d0] sm:$0xff] }
0x192e   :  { %6244 = vmatprep.subr.bf16.mxu0 %v6655_v0 }
0x1931   :  { %6246 = vmatpush3.bf16.msra.mxu0 %v6245_v12  ;;  %v2736_v12 = vld [vmem:[#allocation5 + $0x620] sm:$0xff] }
0x1932   :  { %6259 = vmatprep.subr.bf16.mxu0 %v6655_v0 }
0x199c   :  { %v2538_v56 = vpop.permute.xlu1 %2537 }
0x19ff   :  { %v2445_v52 = vpop.f32.mrb[22].mxu0 }
0x1a00   :  { %v2446_v53 = vadd.f32 %v4810_v50, %v2445_v52  ;;  %v5633_v54 = vpop.f32.mrb[23].mxu0 }
0x1a02   :  { %v2449_v57 = vmax.f32 %v2446_v53, 0.0 }
0x1a04   :  { %5651 = vmatmul.mubr.msk.f32.vlgmr.msra.gmra.mrb[22].mxu1 %vm81_vm1, %v2449_v57 }
0x1a05   :  { %5680 = vmatprep.mubr.msk.f32.mxu1 %vm6656_vm0, %v6657_v1 }
0x1ad7   :  { %v2532_v59 = vpop.f32.mrb[22].mxu1 }
0x1ad8   :  { %v2533_v60 = vadd.f32 %v4812_v58, %v2532_v59  ;;  %v5652_v61 = vpop.f32.mrb[23].mxu1 }
0x1ada   :  { %v7065_v62 = vadd.f32 %v2538_v56, %v2533_v60 }
0x1adc   :  { %v2541_v63 = vsel %vm413_vm2, %v7065_v62, 0.0  ;;  %v2545_v2 = vmul.f32 %v7065_v62, %v7065_v62 }
0x1add   :  { %2542 = vadd.xlane.f32.xlu1 %v2541_v63 }
0x1ade   :  { %v2546_v3 = vsel %vm413_vm2, %v2545_v2, 0.0 }
0x1adf   :  { %2547 = vadd.xlane.f32.xlu0 %v2546_v3  ;;  %v2733_v3 = vld [vmem:[#allocation5 + $0x608] sm:$0xff] }
0x1ae0   :  { %v6248_v8 = vpack.c.bf16 %v2734_v4, %v2733_v3 }
0x1ae2   :  { %6249 = vmatpush3.bf16.msra.mxu1 %v6248_v8  ;;  %v2988_v8 = vld [vmem:[#allocation5 + $0x6c0] sm:$0xff] }
0x1ae3   :  { %6250 = vmatprep.subr.bf16.mxu1 %v6655_v0 }
0x1aee   :  { %2557 = vrot.lane.b32.xlu1 %v7065_v62, %s6660_s12 }
0x1af2   :  { %2565 = vrot.lane.b32.xlu1 %v2545_v2, %s6660_s12 }
0x1af5   :  { %2600 = vperm.xlu0 %6464, %v7005_v51  }
0x1b6a   :  { %v2543_v6 = vpop.xlane.xlu1 %2542 }
0x1b6b   :  { %v2544_v14 = vmul.f32 0.03125, %v2543_v6  ;;  %v6260_v6 = vpack.c.bf16 %v2726_v10, %v2725_v7  ;;  %v2987_v7 = vld [vmem:[#allocation5 + $0x6b8] sm:$0xff] }
0x1b6c   :  { %v2548_v15 = vpop.xlane.xlu0 %2547  ;;  %v6293_v10 = vpack.c.bf16 %v2988_v8, %v2987_v7 }
0x1b6d   :  { %v2550_v16 = vmul.f32 %v2544_v14, %v2544_v14  ;;  %v2549_v17 = vmul.f32 0.03125, %v2548_v15  ;;  %v2552_v25 = vsub.f32 %v7065_v62, %v2544_v14  ;;  %v2727_v14 = vld [vmem:[#allocation5 + $0x5d8] sm:$0xff]  ;;  %v6251_v15 = vpack.c.bf16 %v2736_v12, %v2735_v11  ;;  %v4825_v11 = vld [vmem:[#allocation5 + $0x6e9] ss:$0 sm:$0xff] }
0x1b6e   :  { %v2558_v9 = vpop.permute.xlu1 %2557 }
0x1b6f   :  { %v2551_v18 = vsub.f32 %v2549_v17, %v2550_v16  ;;  %v2560_v41 = vsel %vm413_vm2, %v2558_v9, 0.0  ;;  %v2737_v17 = vld [vmem:[#allocation5 + $0x628] sm:$0xff]  ;;  %v2738_v9 = vld [vmem:[#allocation5 + $0x630] sm:$0xff]  ;;  %6252 = vmatpush3.bf16.msra.mxu1 %v6251_v15  ;;  %v6666_v15 = vmov 5  }
0x1b70   :  { %6253 = vmatprep.subr.bf16.mxu1 %v6655_v0  ;;  %6465 = vset.pattern.permute.xlu0 %v6666_v15 }
0x1b71   :  { %v2553_v19 = vadd.f32 1e-05, %v2551_v18  ;;  %v2729_v18 = vld [vmem:[#allocation5 + $0x5e8] sm:$0xff] }
0x1b72   :  { %v2566_v21 = vpop.permute.xlu1 %2565 }
0x1b73   :  { %6508 = vrsqrt.f32 %v2553_v19  ;;  %v2568_v23 = vsel %vm413_vm2, %v2566_v21, 0.0  ;;  %v2730_v19 = vld [vmem:[#allocation5 + $0x5f0] sm:$0xff]  ;;  %v6254_v21 = vpack.c.bf16 %v2738_v9, %v2737_v17 }
0x1b74   :  { %2569 = vadd.xlane.f32.xlu0 %v2568_v23  ;;  %v2601_v22 = vpop.permute.xlu0 %2600  ;;  %v6266_v23 = vpack.c.bf16 %v2730_v19, %v2729_v18 }
0x1b75   :  { %v2607_v29 = vmul.f32 %v4816_v20, %v2601_v22  ;;  %6255 = vmatpush3.bf16.msra.mxu1 %v6254_v21 }
0x1b76   :  { %6256 = vmatprep.subr.bf16.mxu1 %v6655_v0 }
0x1b7d   :  { %v6509_v26 = vpop.eup %6508 }
0x1b7e   :  { %v2555_v27 = vmul.f32 %v6509_v26, %v2552_v25  ;;  %v2739_v25 = vld [vmem:[#allocation5 + $0x638] sm:$0xff]  ;;  %v2740_v26 = vld [vmem:[#allocation5 + $0x640] sm:$0xff] }
0x1b7f   :  { %v6257_v22 = vpack.c.bf16 %v2740_v26, %v2739_v25 }
0x1b80   :  { %5662 = vmatmul.mubr.msk.f32.vlgmr.msra.gmra.mrb[24].mxu0 %vm487_vm3, %v2555_v27  ;;  %v2731_v27 = vld [vmem:[#allocation5 + $0x5f8] sm:$0xff] }
0x1b81   :  { %5699 = vmatprep.mubr.msk.f32.mxu0 %vm6656_vm0, %v6657_v1  ;;  %6261 = vmatpush3.bf16.msra.mxu0 %v6260_v6 }
0x1b82   :  { %6262 = vmatprep.subr.bf16.mxu0 %v6655_v0  ;;  %6258 = vmatpush3.bf16.msra.mxu1 %v6257_v22 }
0x1b83   :  { %6271 = vmatprep.subr.bf16.mxu1 %v6655_v0 }
0x1b8a   :  { %2594 = vrot.lane.b32.xlu0 %v4815_v28, %s6661_s13  ;;  %v2732_v28 = vld [vmem:[#allocation5 + $0x600] sm:$0xff] }
0x1c01   :  { %v2570_v49 = vpop.xlane.xlu0 %2569 }
0x1c02   :  { %v2571_v50 = vmul.f32 0.03125, %v2570_v49  ;;  %v2901_v49 = vld [vmem:[#allocation5 + $0x680] sm:$0xff] }
0x1c05   :  { %v2595_v60 = vpop.permute.xlu0 %2594 }
0x1c53   :  { %v2681_v30 = vpop.f32.mrb[24].mxu0 }
0x1c54   :  { %v2685_v33 = vadd.f32 %v2681_v30, %v2607_v29  ;;  %v5663_v34 = vpop.f32.mrb[25].mxu0  ;;  %v6269_v29 = vpack.c.bf16 %v2732_v28, %v2731_v27  ;;  %v4821_v30 = vld [vmem:[%s7349_s2 + $0xa] sm:$0x3]  ;;  %v3140_v28 = vld [vmem:[#allocation5 + $0x6d0] sm:$0xff] }
0x1c55   :  { %5681 = vmatmul.mubr.msk.f32.vlgmr.msra.gmra.mrb[24].mxu1 %vm81_vm1, %v4821_v30  ;;  %v2896_v34 = vld [vmem:[#allocation5 + $0x658] sm:$0xff]  ;;  %v3139_v27 = vld [vmem:[#allocation5 + $0x6c8] sm:$0xff] }
0x1c56   :  { %v2691_v35 = vadd.f32 %v4818_v31, %v2685_v33  ;;  %v2894_v31 = vld [vmem:[#allocation5 + $0x648] sm:$0xff]  ;;  %v2895_v33 = vld [vmem:[#allocation5 + $0x650] sm:$0xff]  ;;  %5718 = vmatprep.mubr.msk.f32.mxu1 %vm6656_vm0, %v6657_v1  ;;  %v6296_v22 = vpack.c.bf16 %v3140_v28, %v3139_v27  ;;  %v3265_v27 = vld [vmem:[#allocation5 + $0x738] sm:$0xff] }
0x1c57   :  { %v3256_v28 = vld [vmem:[#allocation5 + $0x6f0] sm:$0xff] }
0x1c58   :  { %v4819_v36 = vmul.f32 -1.442695, %v2691_v35  ;;  %v6272_v35 = vpack.c.bf16 %v2895_v33, %v2894_v31 }
0x1c5a   :  { %6510 = vpow2.f32 %v4819_v36  ;;  %v2897_v36 = vld [vmem:[#allocation5 + $0x660] sm:$0xff]  ;;  %6273 = vmatpush3.bf16.msra.mxu1 %v6272_v35 }
0x1c5b   :  { %6274 = vmatprep.subr.bf16.mxu1 %v6655_v0 }
0x1c64   :  { %v6511_v37 = vpop.eup %6510 }
0x1c65   :  { %v2695_v38 = vadd.f32 1.0, %v6511_v37  ;;  %v6275_v37 = vpack.c.bf16 %v2897_v36, %v2896_v34 }
0x1c67   :  { %6512 = vrcp.f32 %v2695_v38  ;;  %6276 = vmatpush3.bf16.msra.mxu1 %v6275_v37 }
0x1c68   :  { %6277 = vmatprep.subr.bf16.mxu1 %v6655_v0 }
0x1c71   :  { %v7084_v39 = vpop.eup %6512 }
0x1c72   :  { %v2698_v40 = vmul.f32 2.0, %v7084_v39 }
0x1c74   :  { %v4820_v32 = vadd.f32 -1.0, %v2698_v40 }
0x1c76   :  { %2702 = vrot.lane.b32.xlu1 %v4820_v32, %s6658_s1 }
0x1c9a   :  { %2561 = vadd.xlane.f32.xlu1 %v2560_v41 }
0x1cab   :  { %2584 = vrot.lane.b32.xlu1 %v4814_v42, %s6661_s13  ;;  %v2898_v42 = vld [vmem:[#allocation5 + $0x668] sm:$0xff] }
0x1ce8   :  { %v2703_v44 = vpop.permute.xlu1 %2702 }
0x1ce9   :  { %v2705_v47 = vmul.f32 %v7084_v39, %v2703_v44  ;;  %v2899_v44 = vld [vmem:[#allocation5 + $0x670] sm:$0xff] }
0x1ceb   :  { %2707 = vrot.lane.b32.xlu1 %v2705_v47, %s6661_s13  ;;  %v6278_v47 = vpack.c.bf16 %v2899_v44, %v2898_v42 }
0x1ced   :  { %6279 = vmatpush3.bf16.msra.mxu1 %v6278_v47 }
0x1cee   :  { %6280 = vmatprep.subr.bf16.mxu1 %v6655_v0 }
0x1d27   :  { %v2562_v48 = vpop.xlane.xlu1 %2561 }
0x1d28   :  { %v2563_v13 = vmul.f32 0.03125, %v2562_v48  ;;  %v2810_v48 = vpop.f32.mrb[24].mxu1 }
0x1d2a   :  { %v2572_v46 = vmul.f32 %v2563_v13, %v2563_v13  ;;  %v2574_v57 = vsub.f32 %v7065_v62, %v2563_v13  ;;  %v2728_v62 = vld [vmem:[#allocation5 + $0x5e0] sm:$0xff]  ;;  %v5682_v13 = vpop.f32.mrb[25].mxu1 }
0x1d2b   :  { %v2585_v58 = vpop.permute.xlu1 %2584  ;;  %v6263_v16 = vpack.c.bf16 %v2728_v62, %v2727_v14  ;;  %v4831_v13 = vld [vmem:[#allocation5 + $0x6eb] ss:$0 sm:$0xff] }
0x1d2c   :  { %v2573_v52 = vsub.f32 %v2571_v50, %v2572_v46  ;;  %v2981_v50 = vld [vmem:[#allocation5 + $0x688] sm:$0xff] }
0x1d2d   :  { %6264 = vmatpush3.bf16.msra.mxu0 %v6263_v16  ;;  %v4827_v16 = vld [vmem:[#allocation5 + $0x6ea] ss:$0 sm:$0xff] }
0x1d2e   :  { %v2575_v53 = vadd.f32 1e-05, %v2573_v52  ;;  %6265 = vmatprep.subr.bf16.mxu0 %v6655_v0  ;;  %v2982_v52 = vld [vmem:[#allocation5 + $0x690] sm:$0xff] }
0x1d30   :  { %6514 = vrsqrt.f32 %v2575_v53  ;;  %v2983_v53 = vld [vmem:[#allocation5 + $0x698] sm:$0xff] }
0x1d31   :  { %6267 = vmatpush3.bf16.msra.mxu0 %v6266_v23 }
0x1d32   :  { %6268 = vmatprep.subr.bf16.mxu0 %v6655_v0 }
0x1d35   :  { %6270 = vmatpush3.bf16.msra.mxu0 %v6269_v29  ;;  %v3142_v29 = vld [vmem:[#allocation5 + $0x6e0] sm:$0xff] }
0x1d36   :  { %6283 = vmatprep.subr.bf16.mxu0 %v6655_v0 }
0x1d3a   :  { %v6515_v54 = vpop.eup %6514 }
0x1d3b   :  { %v2577_v45 = vmul.f32 %v6515_v54, %v2574_v57  ;;  %v6284_v54 = vpack.c.bf16 %v2982_v52, %v2981_v50  ;;  %v2984_v57 = vld [vmem:[#allocation5 + $0x6a0] sm:$0xff]  ;;  %v4833_v50 = vld [vmem:[#allocation5 + $0x6ec] ss:$0 sm:$0xff] }
0x1d3d   :  { %v2587_v59 = vmul.f32 %v2585_v58, %v2577_v45  ;;  %v6287_v45 = vpack.c.bf16 %v2984_v57, %v2983_v53  ;;  %v2985_v58 = vld [vmem:[#allocation5 + $0x6a8] sm:$0xff] }
0x1d3f   :  { %v2597_v61 = vadd.f32 %v2595_v60, %v2587_v59  ;;  %v2986_v59 = vld [vmem:[#allocation5 + $0x6b0] sm:$0xff] }
0x1d40   :  { %v6290_v60 = vpack.c.bf16 %v2986_v59, %v2985_v58 }
0x1d41   :  { %v2700_v56 = vmul.f32 %v7084_v39, %v2597_v61 }
0x1d5d   :  { %v2708_v63 = vpop.permute.xlu1 %2707 }
0x1d5e   :  { %v2710_v2 = vadd.f32 %v2708_v63, %v2700_v56  ;;  %v4824_v56 = vld [vmem:[#allocation5 + $0x6e8] ss:$0 sm:$0xff] }
0x1d60   :  { %6516 = vtanh.f32 %v2710_v2 }
0x1d6a   :  { %v6517_v20 = vpop.eup %6516 }
0x1d6b   :  { %2713 = vrot.lane.b32.xlu1 %v6517_v20, %s6658_s1  ;;  %v3141_v20 = vld [vmem:[#allocation5 + $0x6d8] sm:$0xff] }
0x1d6c   :  { %v6299_v30 = vpack.c.bf16 %v3142_v29, %v3141_v20  ;;  %v3266_v29 = vld [vmem:[#allocation5 + $0x740] sm:$0xff] }
0x1ddd   :  { %v2714_v38 = vpop.permute.xlu1 %2713 }
0x1dde   :  { %v2716_v40 = vmul.f32 %v7084_v39, %v2714_v38  ;;  %v2900_v39 = vld [vmem:[#allocation5 + $0x678] sm:$0xff] }
0x1ddf   :  { %v6281_v46 = vpack.c.bf16 %v2901_v49, %v2900_v39 }
0x1de0   :  { %2718 = vrot.lane.b32.xlu1 %v2716_v40, %s6661_s13 }
0x1de1   :  { %6282 = vmatpush3.bf16.msra.mxu1 %v6281_v46 }
0x1de2   :  { %6295 = vmatprep.subr.bf16.mxu1 %v6655_v0 }
0x1e52   :  { %v2719_v32 = vpop.permute.xlu1 %2718 }
0x1e53   :  { %v7114_v41 = vsel %vm487_vm3, %v2719_v32, %v2710_v2 }
0x1e54   :  { %5700 = vmatmul.mubr.msk.f32.vlgmr.msra.gmra.mrb[26].mxu0 %vm81_vm1, %v7114_v41 }
0x1e55   :  { %5737 = vmatprep.mubr.msk.f32.mxu0 %vm6656_vm0, %v6657_v1  ;;  %6285 = vmatpush3.bf16.msra.mxu0 %v6284_v54 }
0x1e56   :  { %6286 = vmatprep.subr.bf16.mxu0 %v6655_v0 }
0x1e59   :  { %6288 = vmatpush3.bf16.msra.mxu0 %v6287_v45 }
0x1e5a   :  { %6289 = vmatprep.subr.bf16.mxu0 %v6655_v0 }
0x1e5d   :  { %6291 = vmatpush3.bf16.msra.mxu0 %v6290_v60 }
0x1e5e   :  { %6292 = vmatprep.subr.bf16.mxu0 %v6655_v0 }
0x1e61   :  { %6294 = vmatpush3.bf16.msra.mxu0 %v6293_v10 }
0x1e62   :  { %6301 = vmatprep.subr.bf16.mxu0 %v6655_v0 }
0x1f27   :  { %v2883_v61 = vpop.f32.mrb[26].mxu0 }
0x1f28   :  { %v2884_v63 = vadd.f32 %v2883_v61, %v2810_v48  ;;  %v5701_v2 = vpop.f32.mrb[27].mxu0  ;;  %v4830_v48 = vld [vmem:[#allocation5 + $0x6ee] ss:$0 sm:$0xff] }
0x1f2a   :  { %v2892_v3 = vadd.f32 %v4824_v56, %v2884_v63  ;;  %v4829_v63 = vld [vmem:[#allocation5 + $0x6ed] ss:$0 sm:$0xff] }
0x1f2c   :  { %v2893_v4 = vmax.f32 %v2892_v3, 0.0  ;;  %3068 = vrot.lane.b32.xlu1 %v2892_v3, %s6658_s1 }
0x1f2e   :  { %5719 = vmatmul.mubr.msk.f32.vlgmr.msra.gmra.mrb[26].mxu1 %vm81_vm1, %v2893_v4 }
0x1f2f   :  { %5748 = vmatprep.mubr.msk.f32.mxu1 %vm6656_vm0, %v6657_v1  ;;  %6297 = vmatpush3.bf16.msra.mxu1 %v6296_v22  ;;  %v3257_v22 = vld [vmem:[#allocation5 + $0x6f8] sm:$0xff] }
0x1f30   :  { %6298 = vmatprep.subr.bf16.mxu1 %v6655_v0 }
0x1f33   :  { %6300 = vmatpush3.bf16.msra.mxu1 %v6299_v30  ;;  %v3267_v30 = vld [vmem:[#allocation5 + $0x748] sm:$0xff] }
0x1f34   :  { %6313 = vmatprep.subr.bf16.mxu1 %v6655_v0 }
0x1f9e   :  { %v3069_v19 = vpop.permute.xlu1 %3068 }
0x2001   :  { %v2976_v12 = vpop.f32.mrb[26].mxu1 }
0x2002   :  { %v2977_v6 = vadd.f32 %v4825_v11, %v2976_v12  ;;  %v5720_v14 = vpop.f32.mrb[27].mxu1 }
0x2004   :  { %v2980_v62 = vmax.f32 %v2977_v6, 0.0 }
0x2006   :  { %5738 = vmatmul.mubr.msk.f32.vlgmr.msra.gmra.mrb[28].mxu0 %vm81_vm1, %v2980_v62 }
0x2007   :  { %5767 = vmatprep.mubr.msk.f32.mxu0 %vm6656_vm0, %v6657_v1 }
0x20d9   :  { %v3063_v17 = vpop.f32.mrb[28].mxu0 }
0x20da   :  { %v3064_v9 = vadd.f32 %v4827_v16, %v3063_v17  ;;  %v5739_v18 = vpop.f32.mrb[29].mxu0 }
0x20dc   :  { %v7133_v21 = vadd.f32 %v3069_v19, %v3064_v9 }
0x20de   :  { %v3072_v23 = vsel %vm413_vm2, %v7133_v21, 0.0  ;;  %v3076_v25 = vmul.f32 %v7133_v21, %v7133_v21 }
0x20df   :  { %3073 = vadd.xlane.f32.xlu0 %v3072_v23 }
0x20e0   :  { %v3077_v26 = vsel %vm413_vm2, %v3076_v25, 0.0 }
0x20e1   :  { %3078 = vadd.xlane.f32.xlu1 %v3077_v26  ;;  %v3264_v26 = vld [vmem:[#allocation5 + $0x730] sm:$0xff] }
0x20e2   :  { %v6302_v20 = vpack.c.bf16 %v3265_v27, %v3264_v26 }
0x20e4   :  { %6303 = vmatpush3.bf16.msra.mxu0 %v6302_v20  ;;  %v3519_v20 = vld [vmem:[#allocation5 + $0x7e8] sm:$0xff] }
0x20e5   :  { %6304 = vmatprep.subr.bf16.mxu0 %v6655_v0 }
0x20f2   :  { %3088 = vrot.lane.b32.xlu1 %v7133_v21, %s6660_s12 }
0x20f5   :  { %3131 = vperm.xlu0 %6465, %v7005_v51  }
0x20f6   :  { %3096 = vrot.lane.b32.xlu1 %v3076_v25, %s6660_s12 }
0x216c   :  { %v3074_v31 = vpop.xlane.xlu0 %3073 }
0x216d   :  { %v3075_v33 = vmul.f32 0.03125, %v3074_v31  ;;  %v6314_v31 = vpack.c.bf16 %v3257_v22, %v3256_v28  ;;  %v3518_v28 = vld [vmem:[#allocation5 + $0x7e0] sm:$0xff] }
0x216e   :  { %v3079_v34 = vpop.xlane.xlu1 %3078  ;;  %v6347_v22 = vpack.c.bf16 %v3519_v20, %v3518_v28 }
0x216f   :  { %v3081_v35 = vmul.f32 %v3075_v33, %v3075_v33  ;;  %v3080_v36 = vmul.f32 0.03125, %v3079_v34  ;;  %v3083_v42 = vsub.f32 %v7133_v21, %v3075_v33  ;;  %v3258_v33 = vld [vmem:[#allocation5 + $0x700] sm:$0xff]  ;;  %v6305_v34 = vpack.c.bf16 %v3267_v30, %v3266_v29  ;;  %v4840_v29 = vld [vmem:[#allocation5 + $0x811] ss:$0 sm:$0xff] }
0x2171   :  { %v3082_v51 = vsub.f32 %v3080_v36, %v3081_v35  ;;  %v3268_v36 = vld [vmem:[#allocation5 + $0x750] sm:$0xff]  ;;  %6306 = vmatpush3.bf16.msra.mxu0 %v6305_v34  ;;  %v6667_v34 = vmov 6  }
0x2172   :  { %v3089_v37 = vpop.permute.xlu1 %3088  ;;  %6307 = vmatprep.subr.bf16.mxu0 %v6655_v0  ;;  %6466 = vset.pattern.permute.xlu0 %v6667_v34 }
0x2173   :  { %v3084_v38 = vadd.f32 1e-05, %v3082_v51  ;;  %v3091_v56 = vsel %vm413_vm2, %v3089_v37, 0.0  ;;  %v3269_v51 = vld [vmem:[#allocation5 + $0x758] sm:$0xff]  ;;  %v3260_v37 = vld [vmem:[#allocation5 + $0x710] sm:$0xff] }
0x2174   :  { %v3132_v39 = vpop.permute.xlu0 %3131 }
0x2175   :  { %6518 = vrsqrt.f32 %v3084_v38  ;;  %v3138_v49 = vmul.f32 %v4831_v13, %v3132_v39  ;;  %v3261_v38 = vld [vmem:[#allocation5 + $0x718] sm:$0xff] }
0x2176   :  { %v3097_v40 = vpop.permute.xlu1 %3096 }
0x2177   :  { %v3099_v32 = vsel %vm413_vm2, %v3097_v40, 0.0  ;;  %v6308_v40 = vpack.c.bf16 %v3269_v51, %v3268_v36 }
0x2178   :  { %3100 = vadd.xlane.f32.xlu0 %v3099_v32  ;;  %v6320_v32 = vpack.c.bf16 %v3261_v38, %v3260_v37 }
0x2179   :  { %6309 = vmatpush3.bf16.msra.mxu0 %v6308_v40 }
0x217a   :  { %6310 = vmatprep.subr.bf16.mxu0 %v6655_v0 }
0x217f   :  { %v6519_v44 = vpop.eup %6518 }
0x2180   :  { %v3086_v47 = vmul.f32 %v6519_v44, %v3083_v42  ;;  %v3270_v42 = vld [vmem:[#allocation5 + $0x760] sm:$0xff]  ;;  %v3271_v44 = vld [vmem:[#allocation5 + $0x768] sm:$0xff] }
0x2181   :  { %v6311_v39 = vpack.c.bf16 %v3271_v44, %v3270_v42 }
0x2182   :  { %5749 = vmatmul.mubr.msk.f32.vlgmr.msra.gmra.mrb[28].mxu1 %vm487_vm3, %v3086_v47  ;;  %v3262_v47 = vld [vmem:[#allocation5 + $0x720] sm:$0xff] }
0x2183   :  { %5786 = vmatprep.mubr.msk.f32.mxu1 %vm6656_vm0, %v6657_v1  ;;  %6315 = vmatpush3.bf16.msra.mxu1 %v6314_v31 }
0x2184   :  { %6316 = vmatprep.subr.bf16.mxu1 %v6655_v0  ;;  %6312 = vmatpush3.bf16.msra.mxu0 %v6311_v39  ;;  %v3672_v39 = vld [vmem:[#allocation5 + $0x800] sm:$0xff] }
0x2185   :  { %6325 = vmatprep.subr.bf16.mxu0 %v6655_v0 }
0x218e   :  { %3125 = vrot.lane.b32.xlu0 %v4830_v48, %s6661_s13  ;;  %v3263_v48 = vld [vmem:[#allocation5 + $0x728] sm:$0xff] }
0x2205   :  { %v3101_v8 = vpop.xlane.xlu0 %3100 }
0x2206   :  { %v3102_v11 = vmul.f32 0.03125, %v3101_v8  ;;  %v3432_v8 = vld [vmem:[#allocation5 + $0x7a8] sm:$0xff] }
0x2209   :  { %v3126_v9 = vpop.permute.xlu0 %3125 }
0x2255   :  { %v3212_v46 = vpop.f32.mrb[28].mxu1 }
0x2256   :  { %v3216_v52 = vadd.f32 %v3212_v46, %v3138_v49  ;;  %v5750_v53 = vpop.f32.mrb[29].mxu1  ;;  %v6323_v49 = vpack.c.bf16 %v3263_v48, %v3262_v47  ;;  %v4836_v46 = vld [vmem:[%s7349_s2 + $0xc] sm:$0x3]  ;;  %v7210_v47 = vld [vmem:[#allocation2] sm:$0x3]  ;;  %v3670_v48 = vld [vmem:[#allocation5 + $0x7f0] sm:$0xff] }
0x2257   :  { %5768 = vmatmul.mubr.msk.f32.vlgmr.msra.gmra.mrb[30].mxu0 %vm81_vm1, %v4836_v46  ;;  %v3427_v53 = vld [vmem:[#allocation5 + $0x780] sm:$0xff]  ;;  %v3673_v46 = vld [vmem:[#allocation5 + $0x808] sm:$0xff] }
0x2258   :  { %v3222_v54 = vadd.f32 %v4833_v50, %v3216_v52  ;;  %v3425_v50 = vld [vmem:[#allocation5 + $0x770] sm:$0xff]  ;;  %v3426_v52 = vld [vmem:[#allocation5 + $0x778] sm:$0xff]  ;;  %5805 = vmatprep.mubr.msk.f32.mxu0 %vm6656_vm0, %v6657_v1 }
0x225a   :  { %v4834_v57 = vmul.f32 -1.442695, %v3222_v54  ;;  %v6326_v54 = vpack.c.bf16 %v3426_v52, %v3425_v50  ;;  %v6353_v50 = vpack.c.bf16 %v3673_v46, %v3672_v39  ;;  %v3796_v39 = vld [vmem:[#allocation5 + $0x860] sm:$0xff] }
0x225c   :  { %6520 = vpow2.f32 %v4834_v57  ;;  %v3428_v57 = vld [vmem:[#allocation5 + $0x788] sm:$0xff]  ;;  %6327 = vmatpush3.bf16.msra.mxu0 %v6326_v54 }
0x225d   :  { %6328 = vmatprep.subr.bf16.mxu0 %v6655_v0 }
0x2266   :  { %v6521_v45 = vpop.eup %6520 }
0x2267   :  { %v3226_v58 = vadd.f32 1.0, %v6521_v45  ;;  %v6329_v45 = vpack.c.bf16 %v3428_v57, %v3427_v53 }
0x2269   :  { %6522 = vrcp.f32 %v3226_v58  ;;  %6330 = vmatpush3.bf16.msra.mxu0 %v6329_v45 }
0x226a   :  { %6331 = vmatprep.subr.bf16.mxu0 %v6655_v0 }
0x2273   :  { %v7152_v59 = vpop.eup %6522 }
0x2274   :  { %v3229_v60 = vmul.f32 2.0, %v7152_v59 }
0x2276   :  { %v4835_v61 = vadd.f32 -1.0, %v3229_v60 }
0x2278   :  { %3233 = vrot.lane.b32.xlu1 %v4835_v61, %s6658_s1 }
0x229c   :  { %3092 = vadd.xlane.f32.xlu1 %v3091_v56 }
0x22ad   :  { %3115 = vrot.lane.b32.xlu1 %v4829_v63, %s6661_s13  ;;  %v3429_v63 = vld [vmem:[#allocation5 + $0x790] sm:$0xff] }
0x22ea   :  { %v3234_v2 = vpop.permute.xlu1 %3233 }
0x22eb   :  { %v3236_v3 = vmul.f32 %v7152_v59, %v3234_v2  ;;  %v3430_v2 = vld [vmem:[#allocation5 + $0x798] sm:$0xff] }
0x22ed   :  { %3238 = vrot.lane.b32.xlu1 %v3236_v3, %s6661_s13  ;;  %v6332_v3 = vpack.c.bf16 %v3430_v2, %v3429_v63 }
0x22ef   :  { %6333 = vmatpush3.bf16.msra.mxu0 %v6332_v3 }
0x22f0   :  { %6334 = vmatprep.subr.bf16.mxu0 %v6655_v0 }
0x2329   :  { %v3093_v4 = vpop.xlane.xlu1 %3092 }
0x232a   :  { %v3094_v7 = vmul.f32 0.03125, %v3093_v4  ;;  %v3341_v4 = vpop.f32.mrb[30].mxu0 }
0x232c   :  { %v3103_v10 = vmul.f32 %v3094_v7, %v3094_v7  ;;  %v3105_v62 = vsub.f32 %v7133_v21, %v3094_v7  ;;  %v3259_v21 = vld [vmem:[#allocation5 + $0x708] sm:$0xff]  ;;  %v5769_v7 = vpop.f32.mrb[31].mxu0 }
0x232d   :  { %v3116_v16 = vpop.permute.xlu1 %3115  ;;  %v6317_v35 = vpack.c.bf16 %v3259_v21, %v3258_v33 }
0x232e   :  { %v3104_v12 = vsub.f32 %v3102_v11, %v3103_v10  ;;  %v3512_v11 = vld [vmem:[#allocation5 + $0x7b0] sm:$0xff] }
0x232f   :  { %6318 = vmatpush3.bf16.msra.mxu1 %v6317_v35  ;;  %v4842_v35 = vld [vmem:[#allocation5 + $0x812] ss:$0 sm:$0xff] }
0x2330   :  { %v3106_v6 = vadd.f32 1e-05, %v3104_v12  ;;  %6319 = vmatprep.subr.bf16.mxu1 %v6655_v0  ;;  %v3513_v12 = vld [vmem:[#allocation5 + $0x7b8] sm:$0xff] }
0x2332   :  { %6524 = vrsqrt.f32 %v3106_v6  ;;  %v3514_v6 = vld [vmem:[#allocation5 + $0x7c0] sm:$0xff] }
0x2333   :  { %6321 = vmatpush3.bf16.msra.mxu1 %v6320_v32 }
0x2334   :  { %6322 = vmatprep.subr.bf16.mxu1 %v6655_v0 }
0x2337   :  { %6324 = vmatpush3.bf16.msra.mxu1 %v6323_v49 }
0x2338   :  { %6337 = vmatprep.subr.bf16.mxu1 %v6655_v0 }
0x233c   :  { %v6525_v14 = vpop.eup %6524 }
0x233d   :  { %v3108_v15 = vmul.f32 %v6525_v14, %v3105_v62  ;;  %v6338_v14 = vpack.c.bf16 %v3513_v12, %v3512_v11  ;;  %v3515_v62 = vld [vmem:[#allocation5 + $0x7c8] sm:$0xff] }
0x233f   :  { %v3118_v17 = vmul.f32 %v3116_v16, %v3108_v15  ;;  %v6341_v15 = vpack.c.bf16 %v3515_v62, %v3514_v6  ;;  %v3516_v16 = vld [vmem:[#allocation5 + $0x7d0] sm:$0xff] }
0x2340   :  { %v4848_v6 = vld [vmem:[#allocation5 + $0x814] ss:$0 sm:$0xff] }
0x2341   :  { %v3128_v18 = vadd.f32 %v3126_v9, %v3118_v17  ;;  %v3517_v17 = vld [vmem:[#allocation5 + $0x7d8] sm:$0xff] }
0x2342   :  { %v6344_v9 = vpack.c.bf16 %v3517_v17, %v3516_v16 }
0x2343   :  { %v3231_v19 = vmul.f32 %v7152_v59, %v3128_v18 }
0x235f   :  { %v3239_v23 = vpop.permute.xlu1 %3238 }
0x2360   :  { %v3241_v25 = vadd.f32 %v3239_v23, %v3231_v19  ;;  %v4839_v19 = vld [vmem:[#allocation5 + $0x810] ss:$0 sm:$0xff] }
0x2362   :  { %6526 = vtanh.f32 %v3241_v25 }
0x236c   :  { %v6527_v13 = vpop.eup %6526 }
0x236d   :  { %3244 = vrot.lane.b32.xlu1 %v6527_v13, %s6658_s1  ;;  %v3671_v13 = vld [vmem:[#allocation5 + $0x7f8] sm:$0xff] }
0x236e   :  { %v6350_v49 = vpack.c.bf16 %v3671_v13, %v3670_v48  ;;  %v3795_v13 = vld [vmem:[#allocation5 + $0x858] sm:$0xff] }
0x236f   :  { %v6356_v46 = vpack.c.bf16 %v3796_v39, %v3795_v13 }
0x23df   :  { %v3245_v58 = vpop.permute.xlu1 %3244 }
0x23e0   :  { %v3247_v60 = vmul.f32 %v7152_v59, %v3245_v58  ;;  %v3431_v59 = vld [vmem:[#allocation5 + $0x7a0] sm:$0xff] }
0x23e1   :  { %v6335_v10 = vpack.c.bf16 %v3432_v8, %v3431_v59  ;;  %v4845_v59 = vld [vmem:[#allocation5 + $0x816] ss:$0 sm:$0xff]  ;;  %v4846_v8 = vld [vmem:[#allocation5 + $0x813] ss:$0 sm:$0xff] }
0x23e2   :  { %3249 = vrot.lane.b32.xlu1 %v3247_v60, %s6661_s13 }
0x23e3   :  { %6336 = vmatpush3.bf16.msra.mxu0 %v6335_v10 }
0x23e4   :  { %6349 = vmatprep.subr.bf16.mxu0 %v6655_v0 }
0x2454   :  { %v3250_v61 = vpop.permute.xlu1 %3249 }
0x2455   :  { %v7182_v56 = vsel %vm487_vm3, %v3250_v61, %v3241_v25 }
0x2456   :  { %5787 = vmatmul.mubr.msk.f32.vlgmr.msra.gmra.mrb[30].mxu1 %vm81_vm1, %v7182_v56 }
0x2457   :  { %5824 = vmatprep.mubr.msk.f32.mxu1 %vm6656_vm0, %v6657_v1  ;;  %6339 = vmatpush3.bf16.msra.mxu1 %v6338_v14 }
0x2458   :  { %6340 = vmatprep.subr.bf16.mxu1 %v6655_v0 }
0x245b   :  { %6342 = vmatpush3.bf16.msra.mxu1 %v6341_v15 }
0x245c   :  { %6343 = vmatprep.subr.bf16.mxu1 %v6655_v0 }
0x245f   :  { %6345 = vmatpush3.bf16.msra.mxu1 %v6344_v9 }
0x2460   :  { %6346 = vmatprep.subr.bf16.mxu1 %v6655_v0 }
0x2463   :  { %6348 = vmatpush3.bf16.msra.mxu1 %v6347_v22 }
0x2464   :  { %6355 = vmatprep.subr.bf16.mxu1 %v6655_v0 }
0x2529   :  { %v3414_v18 = vpop.f32.mrb[30].mxu1 }
0x252a   :  { %v3415_v23 = vadd.f32 %v3414_v18, %v3341_v4  ;;  %v5788_v25 = vpop.f32.mrb[31].mxu1 }
0x252c   :  { %v3423_v26 = vadd.f32 %v4839_v19, %v3415_v23 }
0x252e   :  { %v3424_v27 = vmax.f32 %v3423_v26, 0.0  ;;  %3599 = vrot.lane.b32.xlu1 %v3423_v26, %s6658_s1  ;;  %v4844_v26 = vld [vmem:[#allocation5 + $0x815] ss:$0 sm:$0xff] }
0x2530   :  { %5806 = vmatmul.mubr.msk.f32.vlgmr.msra.gmra.mrb[32].mxu0 %vm81_vm1, %v3424_v27 }
0x2531   :  { %5835 = vmatprep.mubr.msk.f32.mxu0 %vm6656_vm0, %v6657_v1  ;;  %6351 = vmatpush3.bf16.msra.mxu0 %v6350_v49  ;;  %v3787_v49 = vld [vmem:[#allocation5 + $0x818] sm:$0xff] }
0x2532   :  { %6352 = vmatprep.subr.bf16.mxu0 %v6655_v0 }
0x2535   :  { %6354 = vmatpush3.bf16.msra.mxu0 %v6353_v50  ;;  %v3788_v50 = vld [vmem:[#allocation5 + $0x820] sm:$0xff] }
0x2536   :  { %6367 = vmatprep.subr.bf16.mxu0 %v6655_v0 }
0x25a0   :  { %v3600_v38 = vpop.permute.xlu1 %3599 }
0x2603   :  { %v3507_v30 = vpop.f32.mrb[32].mxu0 }
0x2604   :  { %v3508_v31 = vadd.f32 %v4840_v29, %v3507_v30  ;;  %v5807_v33 = vpop.f32.mrb[33].mxu0 }
0x2606   :  { %v3511_v21 = vmax.f32 %v3508_v31, 0.0 }
0x2608   :  { %5825 = vmatmul.mubr.msk.f32.vlgmr.msra.gmra.mrb[32].mxu1 %vm81_vm1, %v3511_v21 }
0x2609   :  { %5854 = vmatprep.mubr.msk.f32.mxu1 %vm6656_vm0, %v6657_v1  ;;  %6357 = vmatpush3.bf16.msra.mxu1 %v6356_v46 }
0x260a   :  { %6358 = vmatprep.subr.bf16.mxu1 %v6655_v0 }
0x26db   :  { %v3594_v36 = vpop.f32.mrb[32].mxu1 }
0x26dc   :  { %v3595_v51 = vadd.f32 %v4842_v35, %v3594_v36  ;;  %v5826_v37 = vpop.f32.mrb[33].mxu1 }
0x26de   :  { %v7201_v40 = vadd.f32 %v3600_v38, %v3595_v51 }
0x26e0   :  { %v3603_v32 = vsel %vm413_vm2, %v7201_v40, 0.0  ;;  %v3607_v42 = vmul.f32 %v7201_v40, %v7201_v40 }
0x26e1   :  { %3604 = vadd.xlane.f32.xlu0 %v3603_v32 }
0x26e2   :  { %v3608_v44 = vsel %vm413_vm2, %v3607_v42, 0.0 }
0x26e3   :  { %3609 = vadd.xlane.f32.xlu1 %v3608_v44 }
0x26f4   :  { %3619 = vrot.lane.b32.xlu1 %v7201_v40, %s6660_s12 }
0x26f7   :  { %3662 = vperm.xlu0 %6466, %v7210_v47  }
0x26f8   :  { %3627 = vrot.lane.b32.xlu1 %v3607_v42, %s6660_s12 }
0x276e   :  { %v3605_v52 = vpop.xlane.xlu0 %3604 }
0x276f   :  { %v3606_v53 = vmul.f32 0.03125, %v3605_v52  ;;  %v3797_v52 = vld [vmem:[#allocation5 + $0x868] sm:$0xff] }
0x2770   :  { %v3610_v54 = vpop.xlane.xlu1 %3609 }
0x2771   :  { %v3612_v57 = vmul.f32 %v3606_v53, %v3606_v53  ;;  %v3611_v45 = vmul.f32 0.03125, %v3610_v54  ;;  %v3614_v3 = vsub.f32 %v7201_v40, %v3606_v53  ;;  %v3798_v53 = vld [vmem:[#allocation5 + $0x870] sm:$0xff]  ;;  %v6368_v54 = vpack.c.bf16 %v3788_v50, %v3787_v49  ;;  %v4049_v50 = vld [vmem:[#allocation5 + $0x908] sm:$0xff] }
0x2773   :  { %v3613_v58 = vsub.f32 %v3611_v45, %v3612_v57  ;;  %v3789_v57 = vld [vmem:[#allocation5 + $0x828] sm:$0xff]  ;;  %v6359_v45 = vpack.c.bf16 %v3798_v53, %v3797_v52  ;;  %v4050_v52 = vld [vmem:[#allocation5 + $0x910] sm:$0xff] }
0x2774   :  { %v3620_v60 = vpop.permute.xlu1 %3619  ;;  %v6401_v53 = vpack.c.bf16 %v4050_v52, %v4049_v50 }
0x2775   :  { %v3615_v61 = vadd.f32 1e-05, %v3613_v58  ;;  %v3622_v25 = vsel %vm413_vm2, %v3620_v60, 0.0  ;;  %v3799_v60 = vld [vmem:[#allocation5 + $0x878] sm:$0xff]  ;;  %6360 = vmatpush3.bf16.msra.mxu1 %v6359_v45 }
0x2776   :  { %v3663_v10 = vpop.permute.xlu0 %3662  ;;  %6361 = vmatprep.subr.bf16.mxu1 %v6655_v0 }
0x2777   :  { %6528 = vrsqrt.f32 %v3615_v61  ;;  %v3669_v11 = vmul.f32 %v4846_v8, %v3663_v10  ;;  %v3800_v61 = vld [vmem:[#allocation5 + $0x880] sm:$0xff]  ;;  %v3793_v8 = vld [vmem:[#allocation5 + $0x848] sm:$0xff]  ;;  %v3794_v10 = vld [vmem:[#allocation5 + $0x850] sm:$0xff] }
0x2778   :  { %v3628_v63 = vpop.permute.xlu1 %3627 }
0x2779   :  { %v3630_v2 = vsel %vm413_vm2, %v3628_v63, 0.0  ;;  %v3791_v63 = vld [vmem:[#allocation5 + $0x838] sm:$0xff] }
0x277a   :  { %3631 = vadd.xlane.f32.xlu0 %v3630_v2  ;;  %v3792_v2 = vld [vmem:[#allocation5 + $0x840] sm:$0xff] }
0x2781   :  { %v6529_v4 = vpop.eup %6528 }
0x2782   :  { %v3617_v7 = vmul.f32 %v6529_v4, %v3614_v3  ;;  %v6362_v3 = vpack.c.bf16 %v3800_v61, %v3799_v60  ;;  %v6374_v4 = vpack.c.bf16 %v3792_v2, %v3791_v63  ;;  %v6668_v60 = vmov 7   ;;  %v4857_v61 = vld [vmem:[#allocation5 + $0x93a] ss:$0 sm:$0xff] }
0x2783   :  { %6467 = vset.pattern.permute.xlu0 %v6668_v60 }
0x2784   :  { %5836 = vmatmul.mubr.msk.f32.vlgmr.msra.gmra.mrb[34].mxu0 %vm487_vm3, %v3617_v7  ;;  %v3801_v7 = vld [vmem:[#allocation5 + $0x888] sm:$0xff]  ;;  %6363 = vmatpush3.bf16.msra.mxu1 %v6362_v3 }
0x2785   :  { %5873 = vmatprep.mubr.msk.f32.mxu0 %vm6656_vm0, %v6657_v1  ;;  %6369 = vmatpush3.bf16.msra.mxu0 %v6368_v54  ;;  %v4855_v54 = vld [vmem:[#allocation5 + $0x939] ss:$0 sm:$0xff] }
0x2786   :  { %6370 = vmatprep.subr.bf16.mxu0 %v6655_v0  ;;  %6364 = vmatprep.subr.bf16.mxu1 %v6655_v0 }
0x2790   :  { %3656 = vrot.lane.b32.xlu0 %v4845_v59, %s6661_s13  ;;  %v3802_v59 = vld [vmem:[#allocation5 + $0x890] sm:$0xff] }
0x2807   :  { %v3632_v29 = vpop.xlane.xlu0 %3631 }
0x2808   :  { %v3633_v31 = vmul.f32 0.03125, %v3632_v29 }
0x280b   :  { %v3657_v38 = vpop.permute.xlu0 %3656 }
0x2857   :  { %v3743_v12 = vpop.f32.mrb[34].mxu0 }
0x2858   :  { %v3747_v14 = vadd.f32 %v3743_v12, %v3669_v11  ;;  %v5837_v62 = vpop.f32.mrb[35].mxu0  ;;  %v6365_v12 = vpack.c.bf16 %v3802_v59, %v3801_v7 }
0x2859   :  { %v3956_v62 = vld [vmem:[#allocation5 + $0x898] sm:$0xff] }
0x285a   :  { %v3753_v15 = vadd.f32 %v4848_v6, %v3747_v14  ;;  %v6377_v6 = vpack.c.bf16 %v3794_v10, %v3793_v8  ;;  %6366 = vmatpush3.bf16.msra.mxu1 %v6365_v12  ;;  %v4851_v14 = vld [vmem:[%s7349_s2 + $0xe] sm:$0x3]  ;;  %v4202_v12 = vld [vmem:[#allocation5 + $0x920] sm:$0xff] }
0x285b   :  { %6379 = vmatprep.subr.bf16.mxu1 %v6655_v0 }
0x285c   :  { %v4849_v16 = vmul.f32 -1.442695, %v3753_v15  ;;  %v3957_v15 = vld [vmem:[#allocation5 + $0x8a0] sm:$0xff] }
0x285d   :  { %5855 = vmatmul.mubr.msk.f32.vlgmr.msra.gmra.mrb[34].mxu1 %vm81_vm1, %v4851_v14 }
0x285e   :  { %6530 = vpow2.f32 %v4849_v16  ;;  %v3958_v16 = vld [vmem:[#allocation5 + $0x8a8] sm:$0xff]  ;;  %5892 = vmatprep.mubr.msk.f32.mxu1 %vm6656_vm0, %v6657_v1 }
0x2868   :  { %v6531_v17 = vpop.eup %6530 }
0x2869   :  { %v3757_v9 = vadd.f32 1.0, %v6531_v17  ;;  %v6380_v17 = vpack.c.bf16 %v3957_v15, %v3956_v62  ;;  %v4204_v62 = vld [vmem:[#allocation5 + $0x930] sm:$0xff] }
0x286b   :  { %6532 = vrcp.f32 %v3757_v9  ;;  %v3959_v9 = vld [vmem:[#allocation5 + $0x8b0] sm:$0xff]  ;;  %6381 = vmatpush3.bf16.msra.mxu1 %v6380_v17 }
0x286c   :  { %6382 = vmatprep.subr.bf16.mxu1 %v6655_v0 }
0x2875   :  { %v7222_v18 = vpop.eup %6532 }
0x2876   :  { %v3760_v19 = vmul.f32 2.0, %v7222_v18 }
0x2878   :  { %v4850_v23 = vadd.f32 -1.0, %v3760_v19  ;;  %v6383_v19 = vpack.c.bf16 %v3959_v9, %v3958_v16 }
0x287a   :  { %3764 = vrot.lane.b32.xlu1 %v4850_v23, %s6658_s1  ;;  %6384 = vmatpush3.bf16.msra.mxu1 %v6383_v19 }
0x287b   :  { %6385 = vmatprep.subr.bf16.mxu1 %v6655_v0 }
0x289e   :  { %3623 = vadd.xlane.f32.xlu1 %v3622_v25 }
0x28af   :  { %3646 = vrot.lane.b32.xlu1 %v4844_v26, %s6661_s13 }
0x28ec   :  { %v3765_v27 = vpop.permute.xlu1 %3764 }
0x28ed   :  { %v3767_v28 = vmul.f32 %v7222_v18, %v3765_v27 }
0x28ef   :  { %3769 = vrot.lane.b32.xlu1 %v3767_v28, %s6661_s13  ;;  %v3960_v28 = vld [vmem:[#allocation5 + $0x8b8] sm:$0xff] }
0x292b   :  { %v3624_v20 = vpop.xlane.xlu1 %3623 }
0x292c   :  { %v3625_v22 = vmul.f32 0.03125, %v3624_v20  ;;  %v3961_v20 = vld [vmem:[#allocation5 + $0x8c0] sm:$0xff] }
0x292e   :  { %v3634_v30 = vmul.f32 %v3625_v22, %v3625_v22  ;;  %v3636_v35 = vsub.f32 %v7201_v40, %v3625_v22  ;;  %v3790_v40 = vld [vmem:[#allocation5 + $0x830] sm:$0xff]  ;;  %v6386_v22 = vpack.c.bf16 %v3961_v20, %v3960_v28 }
0x292f   :  { %v3647_v51 = vpop.permute.xlu1 %3646  ;;  %v6371_v58 = vpack.c.bf16 %v3790_v40, %v3789_v57 }
0x2930   :  { %v3635_v33 = vsub.f32 %v3633_v31, %v3634_v30  ;;  %v3872_v29 = vpop.f32.mrb[34].mxu1  ;;  %6387 = vmatpush3.bf16.msra.mxu1 %v6386_v22  ;;  %v3963_v31 = vld [vmem:[#allocation5 + $0x8d0] sm:$0xff] }
0x2931   :  { %6372 = vmatpush3.bf16.msra.mxu0 %v6371_v58  ;;  %v5856_v30 = vpop.f32.mrb[35].mxu1  ;;  %6388 = vmatprep.subr.bf16.mxu1 %v6655_v0 }
0x2932   :  { %v3637_v21 = vadd.f32 1e-05, %v3635_v33  ;;  %6373 = vmatprep.subr.bf16.mxu0 %v6655_v0 }
0x2934   :  { %6534 = vrsqrt.f32 %v3637_v21  ;;  %v4043_v21 = vld [vmem:[#allocation5 + $0x8d8] sm:$0xff] }
0x2935   :  { %6375 = vmatpush3.bf16.msra.mxu0 %v6374_v4 }
0x2936   :  { %6376 = vmatprep.subr.bf16.mxu0 %v6655_v0 }
0x2939   :  { %6378 = vmatpush3.bf16.msra.mxu0 %v6377_v6  ;;  %v4203_v6 = vld [vmem:[#allocation5 + $0x928] sm:$0xff] }
0x293a   :  { %6391 = vmatprep.subr.bf16.mxu0 %v6655_v0  ;;  %v6407_v15 = vpack.c.bf16 %v4204_v62, %v4203_v6  ;;  %v4316_v6 = vld [vmem:[#allocation7 + $0x8] sm:$0xff] }
0x293e   :  { %v6535_v34 = vpop.eup %6534 }
0x293f   :  { %v3639_v36 = vmul.f32 %v6535_v34, %v3636_v35  ;;  %v4044_v34 = vld [vmem:[#allocation5 + $0x8e0] sm:$0xff]  ;;  %v4045_v35 = vld [vmem:[#allocation5 + $0x8e8] sm:$0xff] }
0x2941   :  { %v3649_v37 = vmul.f32 %v3647_v51, %v3639_v36  ;;  %v6392_v36 = vpack.c.bf16 %v4044_v34, %v4043_v21  ;;  %v4046_v51 = vld [vmem:[#allocation5 + $0x8f0] sm:$0xff] }
0x2943   :  { %v3659_v32 = vadd.f32 %v3657_v38, %v3649_v37  ;;  %v6395_v37 = vpack.c.bf16 %v4046_v51, %v4045_v35  ;;  %v4047_v38 = vld [vmem:[#allocation5 + $0x8f8] sm:$0xff] }
0x2944   :  { %v4863_v35 = vld [vmem:[#allocation5 + $0x93c] ss:$0 sm:$0xff] }
0x2945   :  { %v3762_v42 = vmul.f32 %v7222_v18, %v3659_v32  ;;  %v4048_v32 = vld [vmem:[#allocation5 + $0x900] sm:$0xff] }
0x2961   :  { %v3770_v44 = vpop.permute.xlu1 %3769 }
0x2962   :  { %v3772_v48 = vadd.f32 %v3770_v44, %v3762_v42  ;;  %v6398_v42 = vpack.c.bf16 %v4048_v32, %v4047_v38 }
0x2964   :  { %6536 = vtanh.f32 %v3772_v48 }
0x296e   :  { %v6537_v11 = vpop.eup %6536 }
0x296f   :  { %3775 = vrot.lane.b32.xlu1 %v6537_v11, %s6658_s1  ;;  %v4201_v11 = vld [vmem:[#allocation5 + $0x918] sm:$0xff] }
0x2970   :  { %v6404_v14 = vpack.c.bf16 %v4202_v12, %v4201_v11  ;;  %v4315_v12 = vld [vmem:[#allocation7] sm:$0xff] }
0x2971   :  { %v6410_v62 = vpack.c.bf16 %v4316_v6, %v4315_v12  ;;  %v6669_v12 = vmov 1983009808   ;;  %v4713_v6 = vlaneseq }
0x29e1   :  { %v3776_v23 = vpop.permute.xlu1 %3775 }
0x29e2   :  { %v3778_v25 = vmul.f32 %v7222_v18, %v3776_v23  ;;  %v3962_v18 = vld [vmem:[#allocation5 + $0x8c8] sm:$0xff] }
0x29e3   :  { %v6389_v33 = vpack.c.bf16 %v3963_v31, %v3962_v18  ;;  %v4860_v18 = vld [vmem:[#allocation5 + $0x93e] ss:$0 sm:$0xff]  ;;  %v4861_v31 = vld [vmem:[#allocation5 + $0x93b] ss:$0 sm:$0xff] }
0x29e4   :  { %3780 = vrot.lane.b32.xlu1 %v3778_v25, %s6661_s13 }
0x29e5   :  { %6390 = vmatpush3.bf16.msra.mxu1 %v6389_v33 }
0x29e6   :  { %6403 = vmatprep.subr.bf16.mxu1 %v6655_v0 }
0x2a56   :  { %v3781_v26 = vpop.permute.xlu1 %3780 }
0x2a57   :  { %v7252_v27 = vsel %vm487_vm3, %v3781_v26, %v3772_v48  ;;  %v4854_v48 = vld [vmem:[#allocation5 + $0x938] ss:$0 sm:$0xff] }
0x2a58   :  { %5874 = vmatmul.mubr.msk.f32.vlgmr.msra.gmra.mrb[36].mxu0 %vm81_vm1, %v7252_v27 }
0x2a59   :  { %5911 = vmatprep.mubr.msk.f32.mxu0 %vm6656_vm0, %v6657_v1  ;;  %6393 = vmatpush3.bf16.msra.mxu0 %v6392_v36 }
0x2a5a   :  { %6394 = vmatprep.subr.bf16.mxu0 %v6655_v0 }
0x2a5d   :  { %6396 = vmatpush3.bf16.msra.mxu0 %v6395_v37 }
0x2a5e   :  { %6397 = vmatprep.subr.bf16.mxu0 %v6655_v0 }
0x2a61   :  { %6399 = vmatpush3.bf16.msra.mxu0 %v6398_v42 }
0x2a62   :  { %6400 = vmatprep.subr.bf16.mxu0 %v6655_v0 }
0x2a65   :  { %6402 = vmatpush3.bf16.msra.mxu0 %v6401_v53 }
0x2a66   :  { %6409 = vmatprep.subr.bf16.mxu0 %v6655_v0 }
0x2b2b   :  { %v3945_v44 = vpop.f32.mrb[36].mxu0 }
0x2b2c   :  { %v3946_v13 = vadd.f32 %v3945_v44, %v3872_v29  ;;  %v5875_v39 = vpop.f32.mrb[37].mxu0 }
0x2b2e   :  { %v3954_v49 = vadd.f32 %v4854_v48, %v3946_v13 }
0x2b30   :  { %v3955_v46 = vmax.f32 %v3954_v49, 0.0  ;;  %4130 = vrot.lane.b32.xlu0 %v3954_v49, %s6658_s1  ;;  %v4859_v49 = vld [vmem:[#allocation5 + $0x93d] ss:$0 sm:$0xff] }
0x2b32   :  { %5893 = vmatmul.mubr.msk.f32.vlgmr.msra.gmra.mrb[36].mxu1 %vm81_vm1, %v3955_v46 }
0x2b33   :  { %5922 = vmatprep.mubr.msk.f32.mxu1 %vm6656_vm0, %v6657_v1  ;;  %6405 = vmatpush3.bf16.msra.mxu1 %v6404_v14  ;;  %v4317_v14 = vld [vmem:[#allocation7 + $0x10] sm:$0xff] }
0x2b34   :  { %6406 = vmatprep.subr.bf16.mxu1 %v6655_v0 }
0x2b37   :  { %6408 = vmatpush3.bf16.msra.mxu1 %v6407_v15  ;;  %v4318_v15 = vld [vmem:[#allocation7 + $0x18] sm:$0xff] }
0x2b38   :  { %6421 = vmatprep.subr.bf16.mxu1 %v6655_v0 }
0x2ba2   :  { %v4131_v4 = vpop.permute.xlu0 %4130 }
0x2c05   :  { %v4038_v57 = vpop.f32.mrb[36].mxu1 }
0x2c06   :  { %v4039_v40 = vadd.f32 %v4855_v54, %v4038_v57  ;;  %v5894_v45 = vpop.f32.mrb[37].mxu1 }
0x2c08   :  { %v4042_v58 = vmax.f32 %v4039_v40, 0.0 }
0x2c0a   :  { %5912 = vmatmul.mubr.msk.f32.vlgmr.msra.gmra.mrb[38].mxu0 %vm81_vm1, %v4042_v58 }
0x2c0b   :  { %5941 = vmatprep.mubr.msk.f32.mxu0 %vm6656_vm0, %v6657_v1  ;;  %6411 = vmatpush3.bf16.msra.mxu0 %v6410_v62 }
0x2c0c   :  { %6412 = vmatprep.subr.bf16.mxu0 %v6655_v0 }
0x2cdd   :  { %v4125_v63 = vpop.f32.mrb[38].mxu0 }
0x2cde   :  { %v4126_v2 = vadd.f32 %v4857_v61, %v4125_v63  ;;  %v5913_v3 = vpop.f32.mrb[39].mxu0 }
0x2ce0   :  { %v7271_v7 = vadd.f32 %v4131_v4, %v4126_v2 }
0x2ce2   :  { %v4134_v59 = vsel %vm413_vm2, %v7271_v7, 0.0  ;;  %v4138_v8 = vmul.f32 %v7271_v7, %v7271_v7 }
0x2ce3   :  { %4135 = vadd.xlane.f32.xlu1 %v4134_v59 }
0x2ce4   :  { %v4139_v10 = vsel %vm413_vm2, %v4138_v8, 0.0 }
0x2ce5   :  { %4140 = vadd.xlane.f32.xlu0 %v4139_v10 }
0x2cf4   :  { %4150 = vrot.lane.b32.xlu1 %v7271_v7, %s6660_s12 }
0x2cf8   :  { %4158 = vrot.lane.b32.xlu1 %v4138_v8, %s6660_s12 }
0x2cfb   :  { %4193 = vperm.xlu0 %6467, %v7210_v47  }
0x2d70   :  { %v4136_v16 = vpop.xlane.xlu1 %4135 }
0x2d71   :  { %v4137_v17 = vmul.f32 0.03125, %v4136_v16  ;;  %v6413_v16 = vpack.c.bf16 %v4318_v15, %v4317_v14 }
0x2d72   :  { %v4141_v9 = vpop.xlane.xlu0 %4140 }
0x2d73   :  { %v4143_v19 = vmul.f32 %v4137_v17, %v4137_v17  ;;  %v4142_v23 = vmul.f32 0.03125, %v4141_v9  ;;  %v4145_v22 = vsub.f32 %v7271_v7, %v4137_v17  ;;  %v4319_v17 = vld [vmem:[#allocation7 + $0x20] sm:$0xff]  ;;  %6414 = vmatpush3.bf16.msra.mxu0 %v6413_v16 }
0x2d74   :  { %v4151_v25 = vpop.permute.xlu1 %4150  ;;  %6415 = vmatprep.subr.bf16.mxu0 %v6655_v0 }
0x2d75   :  { %v4144_v26 = vsub.f32 %v4142_v23, %v4143_v19  ;;  %v4153_v39 = vsel %vm413_vm2, %v4151_v25, 0.0  ;;  %v4321_v19 = vld [vmem:[#allocation7 + $0x30] sm:$0xff]  ;;  %v4322_v23 = vld [vmem:[#allocation7 + $0x38] sm:$0xff] }
0x2d77   :  { %v4146_v28 = vadd.f32 1e-05, %v4144_v26  ;;  %v6419_v26 = vpack.c.bf16 %v4322_v23, %v4321_v19 }
0x2d78   :  { %v4159_v20 = vpop.permute.xlu1 %4158 }
0x2d79   :  { %6538 = vrsqrt.f32 %v4146_v28  ;;  %v4161_v47 = vsel %vm413_vm2, %v4159_v20, 0.0  ;;  %v4402_v28 = vld [vmem:[#allocation7 + $0x40] sm:$0xff]  ;;  %v4403_v20 = vld [vmem:[#allocation7 + $0x48] sm:$0xff] }
0x2d7a   :  { %4162 = vadd.xlane.f32.xlu0 %v4161_v47  ;;  %v4194_v33 = vpop.permute.xlu0 %4193  ;;  %v6422_v47 = vpack.c.bf16 %v4403_v20, %v4402_v28 }
0x2d7b   :  { %v4200_v21 = vmul.f32 %v4861_v31, %v4194_v33  ;;  %v4404_v31 = vld [vmem:[#allocation7 + $0x50] sm:$0xff]  ;;  %v4405_v33 = vld [vmem:[#allocation7 + $0x58] sm:$0xff] }
0x2d83   :  { %v6539_v29 = vpop.eup %6538 }
0x2d84   :  { %v4148_v30 = vmul.f32 %v6539_v29, %v4145_v22 }
0x2d86   :  { %5923 = vmatmul.mubr.msk.f32.vlgmr.msra.gmra.mrb[38].mxu1 %vm487_vm3, %v4148_v30 }
0x2d87   :  { %5952 = vmatprep.mubr.msk.f32.mxu1 %vm6656_vm0, %v6657_v1  ;;  %6423 = vmatpush3.bf16.msra.mxu1 %v6422_v47 }
0x2d88   :  { %6424 = vmatprep.subr.bf16.mxu1 %v6655_v0 }
0x2d90   :  { %4187 = vrot.lane.b32.xlu0 %v4860_v18, %s6661_s13 }
0x2e07   :  { %v4163_v54 = vpop.xlane.xlu0 %4162 }
0x2e08   :  { %v4164_v40 = vmul.f32 0.03125, %v4163_v54 }
0x2e0b   :  { %v4188_v4 = vpop.permute.xlu0 %4187 }
0x2e59   :  { %v4274_v34 = vpop.f32.mrb[38].mxu1 }
0x2e5a   :  { %v4278_v36 = vadd.f32 %v4274_v34, %v4200_v21  ;;  %v5924_v51 = vpop.f32.mrb[39].mxu1  ;;  %v6425_v21 = vpack.c.bf16 %v4405_v33, %v4404_v31  ;;  %v4866_v34 = vld [vmem:[#allocation7 + $0xa0] ss:$0 sm:$0xff] }
0x2e5c   :  { %v4284_v37 = vadd.f32 %v4863_v35, %v4278_v36  ;;  %6426 = vmatpush3.bf16.msra.mxu1 %v6425_v21  ;;  %v4485_v35 = vld [vmem:[#allocation7 + $0x60] sm:$0xff]  ;;  %v4486_v36 = vld [vmem:[#allocation7 + $0x68] sm:$0xff] }
0x2e5d   :  { %6427 = vmatprep.subr.bf16.mxu1 %v6655_v0  ;;  %v4873_v21 = vld [vmem:[#allocation7 + $0xa4] ss:$0 sm:$0xff] }
0x2e5e   :  { %v4864_v38 = vmul.f32 -1.442695, %v4284_v37 }
0x2e60   :  { %6540 = vpow2.f32 %v4864_v38 }
0x2e6a   :  { %v6541_v32 = vpop.eup %6540 }
0x2e6b   :  { %v4288_v42 = vadd.f32 1.0, %v6541_v32  ;;  %v6428_v32 = vpack.c.bf16 %v4486_v36, %v4485_v35 }
0x2e6d   :  { %6542 = vrcp.f32 %v4288_v42 }
0x2e77   :  { %v6543_v44 = vpop.eup %6542 }
0x2e78   :  { %v4291_v48 = vmul.f32 2.0, %v6543_v44 }
0x2e7a   :  { %v4865_v13 = vadd.f32 -1.0, %v4291_v48  ;;  %v4488_v48 = vld [vmem:[#allocation7 + $0x78] sm:$0xff] }
0x2e7c   :  { %4295 = vrot.lane.b32.xlu1 %v4865_v13, %s6658_s1 }
0x2ea0   :  { %4154 = vadd.xlane.f32.xlu1 %v4153_v39  ;;  %v4868_v39 = vld [vmem:[#allocation7 + $0xa1] ss:$0 sm:$0xff] }
0x2eb1   :  { %4177 = vrot.lane.b32.xlu1 %v4859_v49, %s6661_s13 }
0x2eee   :  { %v4296_v46 = vpop.permute.xlu1 %4295 }
0x2eef   :  { %v4298_v50 = vmul.f32 %v6543_v44, %v4296_v46 }
0x2ef1   :  { %4300 = vrot.lane.b32.xlu1 %v4298_v50, %s6661_s13 }
0x2f2d   :  { %v4155_v52 = vpop.xlane.xlu1 %4154 }
0x2f2e   :  { %v4156_v53 = vmul.f32 0.03125, %v4155_v52 }
0x2f30   :  { %v4165_v57 = vmul.f32 %v4156_v53, %v4156_v53  ;;  %v4167_v61 = vsub.f32 %v7271_v7, %v4156_v53  ;;  %v4320_v7 = vld [vmem:[#allocation7 + $0x28] sm:$0xff]  ;;  %v4870_v53 = vld [vmem:[#allocation7 + $0xa2] ss:$0 sm:$0xff] }
0x2f31   :  { %v4178_v2 = vpop.permute.xlu1 %4177  ;;  %v6416_v9 = vpack.c.bf16 %v4320_v7, %v4319_v17  ;;  %v4714_v17 = vshrl.u32 %v4713_v6, 7 }
0x2f32   :  { %v4166_v45 = vsub.f32 %v4164_v40, %v4165_v57 }
0x2f33   :  { %6417 = vmatpush3.bf16.msra.mxu0 %v6416_v9 }
0x2f34   :  { %v4168_v58 = vadd.f32 1e-05, %v4166_v45  ;;  %6418 = vmatprep.subr.bf16.mxu0 %v6655_v0 }
0x2f36   :  { %6544 = vrsqrt.f32 %v4168_v58 }
0x2f37   :  { %6420 = vmatpush3.bf16.msra.mxu0 %v6419_v26 }
0x2f38   :  { %6433 = vmatprep.subr.bf16.mxu0 %v6655_v0 }
0x2f40   :  { %v6545_v60 = vpop.eup %6544 }
0x2f41   :  { %v4170_v63 = vmul.f32 %v6545_v60, %v4167_v61 }
0x2f43   :  { %v4180_v3 = vmul.f32 %v4178_v2, %v4170_v63  ;;  %v4599_v63 = vld [vmem:[#allocation7 + $0x80] sm:$0xff]  ;;  %v4600_v2 = vld [vmem:[#allocation7 + $0x88] sm:$0xff] }
0x2f45   :  { %v4190_v59 = vadd.f32 %v4188_v4, %v4180_v3  ;;  %v6434_v3 = vpack.c.bf16 %v4600_v2, %v4599_v63  ;;  %v4601_v4 = vld [vmem:[#allocation7 + $0x90] sm:$0xff] }
0x2f47   :  { %v4293_v8 = vmul.f32 %v6543_v44, %v4190_v59  ;;  %v4602_v59 = vld [vmem:[#allocation7 + $0x98] sm:$0xff] }
0x2f63   :  { %v4301_v10 = vpop.permute.xlu1 %4300 }
0x2f64   :  { %v4303_v11 = vadd.f32 %v4301_v10, %v4293_v8  ;;  %v6437_v8 = vpack.c.bf16 %v4602_v59, %v4601_v4 }
0x2f66   :  { %6546 = vtanh.f32 %v4303_v11 }
0x2f70   :  { %v6547_v25 = vpop.eup %6546 }
0x2f71   :  { %4306 = vrot.lane.b32.xlu1 %v6547_v25, %s6658_s1 }
0x2fe3   :  { %v4307_v22 = vpop.permute.xlu1 %4306 }
0x2fe4   :  { %v4309_v29 = vmul.f32 %v6543_v44, %v4307_v22  ;;  %v4487_v44 = vld [vmem:[#allocation7 + $0x70] sm:$0xff] }
0x2fe5   :  { %v6431_v13 = vpack.c.bf16 %v4488_v48, %v4487_v44 }
0x2fe6   :  { %4311 = vrot.lane.b32.xlu1 %v4309_v29, %s6661_s13 }
0x3058   :  { %v4312_v30 = vpop.permute.xlu1 %4311 }
0x3059   :  { %v4314_v18 = vsel %vm487_vm3, %v4312_v30, %v4303_v11 }
0x305a   :  { %5942 = vmatmul.mubr.msk.f32.vlgmr.msra.gmra.mrb[40].mxu0 %vm81_vm1, %v4314_v18 }
0x305b   :  { %5974 = vmatprep.mubr.msk.f32.mxu0 %vm6656_vm0, %v6657_v1  ;;  %6435 = vmatpush3.bf16.msra.mxu0 %v6434_v3 }
0x305c   :  { %6436 = vmatprep.subr.bf16.mxu0 %v6655_v0 }
0x305f   :  { %6438 = vmatpush3.bf16.msra.mxu0 %v6437_v8 }
0x312d   :  { %v4397_v51 = vpop.f32.mrb[40].mxu0 }
0x312e   :  { %v4398_v37 = vadd.f32 %v4866_v34, %v4397_v51  ;;  %v5943_v38 = vpop.f32.mrb[41].mxu0 }
0x3130   :  { %v4401_v42 = vmax.f32 %v4398_v37, 0.0  ;;  %4568 = vrot.lane.b32.xlu1 %v4398_v37, %s6660_s12 }
0x3132   :  { %5953 = vmatmul.mubr.msk.f32.vlgmr.msra.gmra.mrb[40].mxu1 %vm487_vm3, %v4401_v42 }
0x3133   :  { %6429 = vmatpush3.bf16.msra.mxu1 %v6428_v32  ;;  %5963 = vmatprep.mubr.msk.f32.mxu1 %vm6656_vm0, %v6657_v1 }
0x3134   :  { %6430 = vmatprep.subr.bf16.mxu1 %v6655_v0 }
0x3137   :  { %6432 = vmatpush3.bf16.msra.mxu1 %v6431_v13 }
0x31a2   :  { %v4569_v45 = vpop.permute.xlu1 %4568 }
0x3205   :  { %v4480_v49 = vpop.f32.mrb[40].mxu1 }
0x3206   :  { %v4481_v46 = vadd.f32 %v4868_v39, %v4480_v49  ;;  %v5954_v50 = vpop.f32.mrb[41].mxu1 }
0x3208   :  { %v4484_v52 = vmax.f32 %v4481_v46, 0.0 }
0x320a   :  { %5964 = vmatmul.mubr.msk.f32.vlgmr.msra.gmra.mrb[42].mxu1 %vm487_vm3, %v4484_v52 }
0x32dd   :  { %v4563_v54 = vpop.f32.mrb[42].mxu1 }
0x32de   :  { %v4564_v57 = vadd.f32 %v4870_v53, %v4563_v54  ;;  %v5965_v40 = vpop.f32.mrb[43].mxu1 }
0x32e0   :  { %v4571_v58 = vadd.f32 %v4569_v45, %v4564_v57 }
0x32e2   :  { %v4572_v1 = vsel %vm413_vm2, %v4571_v58, 0.0  ;;  %v4576_v60 = vmul.f32 %v4571_v58, %v4571_v58 }
0x32e3   :  { %4573 = vadd.xlane.f32.xlu1 %v4572_v1 }
0x32e4   :  { %v4577_v61 = vsel %vm413_vm2, %v4576_v60, 0.0 }
0x32e5   :  { %4578 = vadd.xlane.f32.xlu0 %v4577_v61 }
0x32f4   :  { %4691 = vrot.lane.b32.xlu1 %v7046_v24, %s6658_s1 }
0x32f8   :  { %4694 = vrot.lane.b32.xlu1 %v7182_v56, %s6658_s1  ;;  %v4711_v56 = vunpack.c.l.s4 %v6669_v12 }
0x32fa   :  { %v4712_v16 = vunpack.c.0.s8 %v4711_v56 }
0x32fb   :  { %4688 = vrot.lane.b32.xlu0 %v6908_v55, %s6658_s1 }
0x32fc   :  { %v4715_v25 = vsub.s32 %v4712_v16, %v4714_v17 }
0x32ff   :  { %4697 = vrot.lane.b32.xlu0 %v4314_v18, %s6658_s1 }
0x3370   :  { %v4574_v10 = vpop.xlane.xlu1 %4573 }
0x3371   :  { %v4575_v24 = vmul.f32 0.03125, %v4574_v10 }
0x3372   :  { %v4579_v11 = vpop.xlane.xlu0 %4578 }
0x3373   :  { %v4581_v14 = vmul.f32 %v4575_v24, %v4575_v24  ;;  %v4580_v55 = vmul.f32 0.03125, %v4579_v11  ;;  %v4583_v31 = vsub.f32 %v4571_v58, %v4575_v24 }
0x3374   :  { %v4692_v62 = vpop.permute.xlu1 %4691 }
0x3375   :  { %v4582_v15 = vsub.f32 %v4580_v55, %v4581_v14  ;;  %v4701_v23 = vsel %vm81_vm1, %v6976_v5, %v4692_v62  ;;  %v4872_v5 = vld [vmem:[#allocation7 + $0xa3] ss:$0 sm:$0xff] }
0x3376   :  { %v4689_v7 = vpop.permute.xlu0 %4688 }
0x3377   :  { %v4584_v9 = vadd.f32 1e-05, %v4582_v15  ;;  %v4700_v0 = vsel %vm81_vm1, %v6840_v43, %v4689_v7 }
0x3378   :  { %v4695_v19 = vpop.permute.xlu1 %4694  ;;  %v4708_v26 = vcombine.low %v4700_v0, %v4701_v23 }
0x3379   :  { %6548 = vrsqrt.f32 %v4584_v9  ;;  %v4702_v20 = vsel %vm81_vm1, %v7114_v41, %v4695_v19  ;;  %v4874_v41 = vld [vmem:[#allocation7 + $0xa5] ss:$0 sm:$0xff] }
0x337a   :  { %v4698_v28 = vpop.permute.xlu0 %4697  ;;  %v4716_v29 = vrot.slane %v4708_v26, %v4715_v25 }
0x337b   :  { %v4703_v47 = vsel %vm81_vm1, %v7252_v27, %v4698_v28 }
0x337c   :  { %v4709_v22 = vcombine.low %v4702_v20, %v4703_v47 }
0x337e   :  { %v4723_v30 = vrot.slane %v4709_v22, %v4715_v25 }
0x3380   :  { %v4724_v18 = vcombine.low %v4716_v29, %v4723_v30 }
0x3382   :  { %4726 = vst [vmem:[%s7353_s6] sm:$0xff] %v4724_v18  ;;  %s6622_s6 = scalar_lea.vmem %s4734_s29, 32 }
0x3383   :  { %v6549_v43 = vpop.eup %6548  ;;  %p6623_p10 = scmp.ne.s32.totalorder %s4734_s29, %s6622_s6  ;;  %p6628_p12 = scmp.lt.s32.totalorder %s6622_s6, %s6622_s6 }
0x3384   :  { %v4586_v33 = vmul.f32 %v6549_v43, %v4583_v31 }
0x3385   :  { %p6629_p13 = por %p6628_p12, %p6627_p11 }
0x3386   :  { %v4592_v34 = vmul.f32 %v4872_v5, %v4586_v33 }
0x3387   :  { %p6630_p0 = pnand %p6629_p13, %p6623_p10 }
0x3388   :  { %v4598_v35 = vadd.f32 %v4873_v21, %v4592_v34 }
0x338a   :  { %5975 = vmatmul.mubr.msk.f32.vlgmr.msra.gmra.mrb[42].mxu0 %vm487_vm3, %v4598_v35 }
0x345d   :  { %v4677_v36 = vpop.f32.mrb[42].mxu0 }
0x345e   :  { %v4678_v27 = vadd.f32 %v4874_v41, %v4677_v36  ;;  %v5976_v51 = vpop.f32.mrb[43].mxu0 }
0x3460   :  { %v4876_v37 = vmul.f32 -1.442695, %v4678_v27 }
0x3462   :  { %6550 = vpow2.f32 %v4876_v37 }
0x346c   :  { %v6551_v38 = vpop.eup %6550 }
0x346d   :  { %v4684_v32 = vadd.f32 1.0, %v6551_v38 }
0x346f   :  { %6552 = vrcp.f32 %v4684_v32 }
0x3479   :  { %v6553_v42 = vpop.eup %6552 }
0x347a   :  { %4687 = vst [vmem:[#allocation8] sm:$0x3] %v6553_v42 }
0x347b   :  { %6633 = shalt.err (!%p6630_p0)
}
0x347c   :  { %s6634_s0 = scalar_lea.hbm %s7352_s5, 32 }
0x347d   :  { %p6635_p1 = scmp.ne.s32.totalorder %s7352_s5, %s6634_s0  ;;  %p6638_p2 = scmp.lt.u32.totalorder %s6634_s0, %s7352_s5 }
0x347f   :  { %p6640_p3 = pnand %p6638_p2, %p6635_p1 }
0x3481   :  { %6643 = shalt.err (!%p6640_p3)
}
0x3482   :  { %4736 = dma.vmem_to_hbm [thread:$0]  %s4734_s29, 32, %s7352_s5, [#allocation4]  }
0x3483   :  { %6648 = dma.done.wait [#allocation4], 32  }
0x3484   :  { %6649 = vsyncadd [#allocation4], 4294967264 }
0x3485   :  { %4744 = vsyncpa [#allocation3], 1 }
0x3486   :  { %4745 = vsyncpa [#allocation6], 1 }
0x3487   :  { %4746 = vsyncpa [#allocation4], 1 }

</bundles_post_ra>
